<compile_context>
chip_gen: v6e
topology: v6e:2x2x1
jax: 0.10.0
libtpu: 0.0.40
codegen_flags: <defaults>
</compile_context>

<pallas_src>
import functools

import jax
import jax.numpy as jnp
from jax.experimental import pallas as pl
from jax.experimental.pallas import tpu as pltpu

# ---- hyperparameters (the module's undefined globals, small & typical) ----
OBS_LEN = 8
PRED_LEN = 8
EMBEDDING_DIM = 16
H_DIM = 32
MLP_DIM = 64
BOTTLENECK_DIM = 32
NOISE_DIM = (8,)
NUM_LAYERS = 1
POOLING_TYPE = True
BATCH_NORM = False
DROPOUT = 0.0
ACTIVATION_RELU = "relu"
DECODER_TIMESTEP_POOLING = False
LEAKY_SLOPE = 0.01          # nn.LeakyReLU default
TRAIN_OR_TEST = 0           # training path (no speed_control / simulated trajectories)

F32 = jnp.float32
BF16 = jnp.bfloat16


# --------------------------------------------------------------------------------
# small helpers
# --------------------------------------------------------------------------------
def _vmem():
    return pl.BlockSpec(memory_space=pltpu.MemorySpace.VMEM)


def _leaky(x):
    return jnp.where(x >= 0, x, LEAKY_SLOPE * x)


def _relu(x):
    return jnp.maximum(x, 0.0)


def _round_up(x, m):
    return ((x + m - 1) // m) * m


# --------------------------------------------------------------------------------
# 1) Encoder: spatial embedding + hoisted ih projection + full LSTM recurrence
# --------------------------------------------------------------------------------
def _encoder_kernel(xy_ref, spd_ref,
                    w1xy_ref, w1s_ref, b1_ref, w2_ref, b2_ref,
                    wih_ref, whh_ref, bl_ref, h_out_ref, *, obs_len, batch, h_dim):
    xy = xy_ref[...]                                                       # (T*Bp, 2)
    spd = spd_ref[...]                                                     # (T*Bp, 1)
    # Linear(3, 2E) split into xy broadcast mul-adds + speed row (no K=3 MXU push)
    pre = _leaky(xy[:, 0:1] * w1xy_ref[0:1, :] + xy[:, 1:2] * w1xy_ref[1:2, :]
                 + spd * w1s_ref[...] + b1_ref[...])                       # (T*Bp, 2E)
    e = jnp.dot(pre, w2_ref[...], preferred_element_type=F32) + b2_ref[...]  # (T*Bp, E)
    # hoisted input-to-hidden contribution for ALL timesteps (one matmul + folded bias)
    xg = jnp.dot(e, wih_ref[...], preferred_element_type=F32) + bl_ref[...]  # (T*Bp, 4H)
    whh = whh_ref[...]                                                     # loaded once

    h = jnp.zeros((batch, h_dim), F32)
    c = jnp.zeros((batch, h_dim), F32)
    for t in range(obs_len):                                               # static unroll
        gates = xg[t * batch:(t + 1) * batch, :] + jnp.dot(h, whh, preferred_element_type=F32)
        s = jax.nn.sigmoid(gates)                                          # one EUP pass / 128 lanes
        i_g = s[:, 0:h_dim]
        f_g = s[:, h_dim:2 * h_dim]
        o_g = s[:, 2 * h_dim:3 * h_dim]
        g_g = jnp.tanh(gates[:, 3 * h_dim:4 * h_dim])
        c = f_g * c + i_g * g_g
        h = o_g * jnp.tanh(c)
    h_out_ref[...] = h


def encoder_forward(params, obs_traj_rel_p, obs_ped_speed_p):
    T, Bp, _ = obs_traj_rel_p.shape
    xy = obs_traj_rel_p.reshape(T * Bp, 2)
    spd = obs_ped_speed_p.reshape(T * Bp, 1)
    p = params
    kern = functools.partial(_encoder_kernel, obs_len=T, batch=Bp, h_dim=H_DIM)
    return pl.pallas_call(
        kern,
        out_shape=jax.ShapeDtypeStruct((Bp, H_DIM), F32),
        in_specs=[_vmem()] * 10,
        out_specs=_vmem(),
    )(xy, spd,
      p["enc_sp_w1_xy"], p["enc_sp_w1_s"], p["enc_sp_b1"], p["enc_sp_w2"], p["enc_sp_b2"],
      p["enc_wih"], p["enc_whh"], p["enc_b"])


# --------------------------------------------------------------------------------
# 2) SocialSpeedPoolingModule: per-group grid, i-loop, bf16 MXU weights
# --------------------------------------------------------------------------------
def _sspm_kernel(starts_ref, sizes_ref,                       # scalar prefetch (SMEM)
                 h_ref, pos_ref, spd_ref,                     # padded per-ped slabs
                 pw1xy_ref, pw1s_ref, pb1_ref, pw2_ref, pb2_ref,
                 mw1h_ref, mw1e_ref, mb1_ref, mw2_ref, mb2_ref,
                 out_ref, *, max_n):
    g = pl.program_id(0)
    start = starts_ref[g]
    n = sizes_ref[g]

    out_ref[...] = jnp.zeros_like(out_ref)                    # deterministic padded rows

    hid = h_ref[pl.ds(start, max_n), :]                       # (max_n, H)
    pos = pos_ref[pl.ds(start, max_n), :]                     # (max_n, 2)
    spd = spd_ref[pl.ds(start, max_n), :]                     # (max_n, 1)

    # pos_embedding first layer (Linear(3, 2E)) split by linearity:
    #   pre1[i, j] = leaky((pos[j]-pos[i]) @ Wxy + spd[j] * Ws + b1) = leaky(u[j] - a[i])
    wxy0 = pw1xy_ref[0:1, :]
    wxy1 = pw1xy_ref[1:2, :]
    a = pos[:, 0:1] * wxy0 + pos[:, 1:2] * wxy1               # (max_n, 2E)
    u = a + spd * pw1s_ref[...] + pb1_ref[...]                # j-term incl bias
    # hidden contribution of pre-pool MLP layer 1, hoisted (only depends on j)
    hh = jnp.dot(hid.astype(BF16), mw1h_ref[...], preferred_element_type=F32)  # (max_n, 512)

    pw2 = pw2_ref[...]
    pb2 = pb2_ref[...]
    mw1e = mw1e_ref[...]
    mb1 = mb1_ref[...]
    mw2 = mw2_ref[...]
    mb2 = mb2_ref[...]

    j_idx = jax.lax.broadcasted_iota(jnp.int32, (max_n, 1), 0)
    valid = j_idx < n                                         # mask padded / foreign rows
    neg = jnp.float32(-1e30)

    def body(i, carry):
        pos_i = pos_ref[pl.ds(start + i, 1), :]               # (1, 2)
        a_i = pos_i[:, 0:1] * wxy0 + pos_i[:, 1:2] * wxy1     # (1, 2E)
        pre1 = _leaky(u - a_i)                                # (max_n, 2E)
        pe = jnp.dot(pre1, pw2, preferred_element_type=F32) + pb2          # (max_n, E)
        h1 = _leaky(hh + jnp.dot(pe.astype(BF16), mw1e,
                                 preferred_element_type=F32) + mb1)        # (max_n, 512)
        h2 = _leaky(jnp.dot(h1.astype(BF16), mw2,
                            preferred_element_type=F32) + mb2)             # (max_n, BOTT)
        h2 = jnp.where(valid, h2, neg)
        out_ref[0, pl.ds(i, 1), :] = jnp.max(h2, axis=0, keepdims=True)    # pooled row i
        return carry

    jax.lax.fori_loop(0, n, body, 0)


def _full2(shape):
    # full-array block with constant index map (DMA'd once, resident across the grid)
    return pl.BlockSpec(shape, lambda g, starts, sizes: (0, 0))


def sspm_forward(params, h_slab, pos_slab, spd_slab, starts, sizes, num_groups, max_n):
    p = params
    weights = (p["sspm_pw1_xy"], p["sspm_pw1_s"], p["sspm_pb1"], p["sspm_pw2"], p["sspm_pb2"],
               p["sspm_mw1_h"], p["sspm_mw1_e"], p["sspm_mb1"], p["sspm_mw2"], p["sspm_mb2"])
    grid_spec = pltpu.PrefetchScalarGridSpec(
        num_scalar_prefetch=2,
        grid=(num_groups,),
        in_specs=[_full2(h_slab.shape), _full2(pos_slab.shape), _full2(spd_slab.shape)]
                + [_full2(w.shape) for w in weights],
        out_specs=pl.BlockSpec((1, max_n, BOTTLENECK_DIM),
                               lambda g, starts, sizes: (g, 0, 0)),
    )
    return pl.pallas_call(
        functools.partial(_sspm_kernel, max_n=max_n),
        out_shape=jax.ShapeDtypeStruct((num_groups, max_n, BOTTLENECK_DIM), F32),
        grid_spec=grid_spec,
        compiler_params=pltpu.CompilerParams(dimension_semantics=("parallel",)),
    )(starts, sizes, h_slab, pos_slab, spd_slab, *weights)


# --------------------------------------------------------------------------------
# 3) Fused mlp_decoder_context + noise merge + full PRED_LEN decoder rollout
# --------------------------------------------------------------------------------
def _ctx_decoder_kernel(fh_ref, ph_ref, z_ref, rel0_ref, spd_ref,
                        cw1h_ref, cw1p_ref, cb1_ref, cw2_ref, cb2_ref,
                        sw1xy_ref, sw1s_ref, sb1_ref, sw2_ref, sb2_ref,
                        wih_ref, whh_ref, bl_ref, wp_ref, bp_ref,
                        out_ref, *, pred_len, h_dim):
    # mlp_decoder_context (split first layer kills the host concat); cw2/cb2 are
    # zero-padded in the last NOISE lanes so relu(0) + z places the group noise there.
    h1 = _relu(jnp.dot(fh_ref[...], cw1h_ref[...], preferred_element_type=F32)
               + jnp.dot(ph_ref[...], cw1p_ref[...], preferred_element_type=F32)
               + cb1_ref[...])
    h = _relu(jnp.dot(h1, cw2_ref[...], preferred_element_type=F32) + cb2_ref[...]) + z_ref[...]
    c = jnp.zeros_like(h)

    # hoist all weight loads above the unrolled rollout
    wxy0 = sw1xy_ref[0:1, :]
    wxy1 = sw1xy_ref[1:2, :]
    w1s = sw1s_ref[...]
    b1 = sb1_ref[...]
    w2 = sw2_ref[...]
    b2 = sb2_ref[...]
    wih = wih_ref[...]
    whh = whh_ref[...]
    bl = bl_ref[...]
    wp = wp_ref[...]
    bp = bp_ref[...]

    def embed(xy, s):
        pre = _leaky(xy[:, 0:1] * wxy0 + xy[:, 1:2] * wxy1 + s * w1s + b1)
        return jnp.dot(pre, w2, preferred_element_type=F32) + b2

    def lstm_step(x, h, c):
        gates = (jnp.dot(x, wih, preferred_element_type=F32)
                 + jnp.dot(h, whh, preferred_element_type=F32) + bl)       # (Bp, 4H)
        s = jax.nn.sigmoid(gates)
        i_g = s[:, 0:h_dim]
        f_g = s[:, h_dim:2 * h_dim]
        o_g = s[:, 2 * h_dim:3 * h_dim]
        g_g = jnp.tanh(gates[:, 3 * h_dim:4 * h_dim])
        c_new = f_g * c + i_g * g_g
        return o_g * jnp.tanh(c_new), c_new

    dec_in = embed(rel0_ref[...], spd_ref[0])                 # [last_rel, speed_0]
    preds = []
    for t in range(pred_len):                                 # static unroll
        h, c = lstm_step(dec_in, h, c)
        rel = jnp.dot(h, wp, preferred_element_type=F32) + bp
        preds.append(rel)
        if t + 1 != pred_len:                                 # last embedding is dead in torch
            dec_in = embed(rel, spd_ref[t + 1])
        # DECODER_TIMESTEP_POOLING == False -> no per-step pooling / hidden refresh
    out_ref[...] = jnp.stack(preds, axis=0)                   # single store (PRED_LEN, Bp, 2)


def ctx_decoder_forward(params, final_h, pool_h, z_pad, rel0, pred_speed_p):
    p = params
    Tp, Bp, _ = pred_speed_p.shape
    kern = functools.partial(_ctx_decoder_kernel, pred_len=Tp, h_dim=H_DIM)
    return pl.pallas_call(
        kern,
        out_shape=jax.ShapeDtypeStruct((Tp, Bp, 2), F32),
        in_specs=[_vmem()] * 20,
        out_specs=_vmem(),
    )(final_h, pool_h, z_pad, rel0, pred_speed_p,
      p["ctx_w1_h"], p["ctx_w1_p"], p["ctx_b1"], p["ctx_w2_pad"], p["ctx_b2_pad"],
      p["dec_sp_w1_xy"], p["dec_sp_w1_s"], p["dec_sp_b1"], p["dec_sp_w2"], p["dec_sp_b2"],
      p["dec_wih"], p["dec_whh"], p["dec_b"], p["h2p_w"], p["h2p_b"])


# --------------------------------------------------------------------------------
# Parameter initialization (kernel-friendly layouts: fused 4H-lane LSTM gates [i,f,o,g],
# pre-split first-layer weights, bf16 MXU weights for the 512-wide SSPM MLP,
# zero-padded context second layer for the in-kernel noise merge)
# --------------------------------------------------------------------------------
def _rand(key, shape, scale=0.1, dtype=F32):
    return (jax.random.normal(key, shape, F32) * scale).astype(dtype)


def init_params(key):
    ks = iter(jax.random.split(key, 40))
    p = {}
    E2 = 2 * EMBEDDING_DIM
    # Encoder spatial embedding: Linear(3, 2E) split xy-rows / speed-row, LeakyReLU, Linear(2E, E)
    p["enc_sp_w1_xy"] = _rand(next(ks), (2, E2))
    p["enc_sp_w1_s"] = _rand(next(ks), (1, E2))
    p["enc_sp_b1"] = _rand(next(ks), (1, E2), 0.01)
    p["enc_sp_w2"] = _rand(next(ks), (E2, EMBEDDING_DIM))
    p["enc_sp_b2"] = _rand(next(ks), (1, EMBEDDING_DIM), 0.01)
    # Encoder LSTM, gates fused on the lane axis (order [i,f,o,g]); b = b_ih + b_hh folded
    p["enc_wih"] = _rand(next(ks), (EMBEDDING_DIM, 4 * H_DIM))
    p["enc_whh"] = _rand(next(ks), (H_DIM, 4 * H_DIM))
    p["enc_b"] = _rand(next(ks), (1, 4 * H_DIM), 0.01)
    # SSPM pos_embedding: Linear(3, 2E) split, LeakyReLU, Linear(2E, E)
    p["sspm_pw1_xy"] = _rand(next(ks), (2, E2))
    p["sspm_pw1_s"] = _rand(next(ks), (1, E2))
    p["sspm_pb1"] = _rand(next(ks), (1, E2), 0.01)
    p["sspm_pw2"] = _rand(next(ks), (E2, EMBEDDING_DIM))
    p["sspm_pb2"] = _rand(next(ks), (1, EMBEDDING_DIM), 0.01)
    # SSPM mlp_pre_pool [H+E, 512, BOTTLENECK]; first layer split; MXU weights in bf16
    p["sspm_mw1_h"] = _rand(next(ks), (H_DIM, 512), dtype=BF16)
    p["sspm_mw1_e"] = _rand(next(ks), (EMBEDDING_DIM, 512), dtype=BF16)
    p["sspm_mb1"] = _rand(next(ks), (1, 512), 0.01)
    p["sspm_mw2"] = _rand(next(ks), (512, BOTTLENECK_DIM), dtype=BF16)
    p["sspm_mb2"] = _rand(next(ks), (1, BOTTLENECK_DIM), 0.01)
    # mlp_decoder_context [H+BOTT, MLP, H - noise]: first layer split, second layer zero-padded
    out_ctx = H_DIM - NOISE_DIM[0]
    p["ctx_w1_h"] = _rand(next(ks), (H_DIM, MLP_DIM))
    p["ctx_w1_p"] = _rand(next(ks), (BOTTLENECK_DIM, MLP_DIM))
    p["ctx_b1"] = _rand(next(ks), (1, MLP_DIM), 0.01)
    w2 = _rand(next(ks), (MLP_DIM, out_ctx))
    b2 = _rand(next(ks), (1, out_ctx), 0.01)
    p["ctx_w2_pad"] = jnp.pad(w2, ((0, 0), (0, NOISE_DIM[0])))
    p["ctx_b2_pad"] = jnp.pad(b2, ((0, 0), (0, NOISE_DIM[0])))
    # Decoder spatial embedding (same split)
    p["dec_sp_w1_xy"] = _rand(next(ks), (2, E2))
    p["dec_sp_w1_s"] = _rand(next(ks), (1, E2))
    p["dec_sp_b1"] = _rand(next(ks), (1, E2), 0.01)
    p["dec_sp_w2"] = _rand(next(ks), (E2, EMBEDDING_DIM))
    p["dec_sp_b2"] = _rand(next(ks), (1, EMBEDDING_DIM), 0.01)
    # Decoder LSTM (fused gates) + hidden2pos
    p["dec_wih"] = _rand(next(ks), (EMBEDDING_DIM, 4 * H_DIM))
    p["dec_whh"] = _rand(next(ks), (H_DIM, 4 * H_DIM))
    p["dec_b"] = _rand(next(ks), (1, 4 * H_DIM), 0.01)
    p["h2p_w"] = _rand(next(ks), (H_DIM, 2))
    p["h2p_b"] = _rand(next(ks), (1, 2), 0.01)
    # decoder.mlp / decoder.pool_net unused (DECODER_TIMESTEP_POOLING == False)
    return p


# --------------------------------------------------------------------------------
# Forward pass (train_or_test == 0 path)
# --------------------------------------------------------------------------------
def trajectory_generator_forward(params, obs_traj, obs_traj_rel, seq_start_end,
                                 obs_ped_speed, pred_ped_speed, noise_key):
    T_obs, B, _ = obs_traj_rel.shape
    Bp = max(8, _round_up(B, 8))                              # pad batch once to a sublane multiple

    # static group metadata (seq_start_end is a static Python structure)
    starts_l = [int(s) for (s, _) in seq_start_end]
    sizes_l = [int(e) - int(s) for (s, e) in seq_start_end]
    num_groups = len(seq_start_end)
    max_n = max(sizes_l)
    group_id_l, flat_idx_l = [], []
    for gi, n in enumerate(sizes_l):
        group_id_l += [gi] * n
        flat_idx_l += [gi * max_n + j for j in range(n)]
    group_id_l += [0] * (Bp - B)
    flat_idx_l += [0] * (Bp - B)
    group_id = jnp.asarray(group_id_l, jnp.int32)
    flat_idx = jnp.asarray(flat_idx_l, jnp.int32)
    starts = jnp.asarray(starts_l, jnp.int32)
    sizes = jnp.asarray(sizes_l, jnp.int32)

    padB = ((0, 0), (0, Bp - B), (0, 0))
    rel_p = jnp.pad(obs_traj_rel.astype(F32), padB)           # (T, Bp, 2)
    ospd_p = jnp.pad(obs_ped_speed.astype(F32), padB)         # (T, Bp, 1)
    pspd_p = jnp.pad(pred_ped_speed.astype(F32), padB)        # (Tp, Bp, 1)

    # 1) encoder
    final_h = encoder_forward(params, rel_p, ospd_p)          # (Bp, H)

    # 2) SSPM  (POOLING_TYPE == True, train_or_test == 0 -> next_speed = pred_ped_speed[0])
    h_slab = jnp.pad(final_h, ((0, max_n), (0, 0)))           # slack so pl.ds stays in-bounds
    pos_slab = jnp.pad(obs_traj[-1].astype(F32), ((0, Bp + max_n - B), (0, 0)))
    spd_slab = jnp.pad(pspd_p[0], ((0, max_n), (0, 0)))
    sspm_out = sspm_forward(params, h_slab, pos_slab, spd_slab, starts, sizes, num_groups, max_n)
    pool_h = sspm_out.reshape(num_groups * max_n, BOTTLENECK_DIM)[flat_idx]   # (Bp, BOTT), one gather

    # group noise: one gather instead of per-group tile/concat; left-pad into the noise lanes
    z = jax.random.normal(noise_key, (num_groups, NOISE_DIM[0]), F32)
    z_pad = jnp.pad(z[group_id], ((0, 0), (H_DIM - NOISE_DIM[0], 0)))         # (Bp, H)

    # 3) fused context MLP + noise merge + PRED_LEN rollout
    pred = ctx_decoder_forward(params, final_h, pool_h, z_pad, rel_p[-1], pspd_p)
    # TODO(synk): the train_or_test==1 speed_control / simulated-trajectory branch is
    # host-side scalar control flow on dataset globals and is not executed in this path.
    return pred[:, :B, :]


# --------------------------------------------------------------------------------
if __name__ == "__main__":
    key = jax.random.PRNGKey(0)
    kp, kx, kxr, ks, kps, kn = jax.random.split(key, 6)
    params = init_params(kp)

    B = 6
    seq_start_end = ((0, 3), (3, 6))                          # two pedestrian groups of 3
    obs_traj = jax.random.normal(kx, (OBS_LEN, B, 2), F32)
    obs_traj_rel = jax.random.normal(kxr, (OBS_LEN, B, 2), F32)
    obs_ped_speed = jax.nn.sigmoid(jax.random.normal(ks, (OBS_LEN, B, 1), F32))
    pred_ped_speed = jax.nn.sigmoid(jax.random.normal(kps, (PRED_LEN, B, 1), F32))

    fwd = jax.jit(lambda prm, ot, otr, ops, pps, nk: trajectory_generator_forward(
        prm, ot, otr, seq_start_end, ops, pps, nk))
    out = fwd(params, obs_traj, obs_traj_rel, obs_ped_speed, pred_ped_speed, kn)
    out = jax.block_until_ready(out)
    assert out.shape == (PRED_LEN, B, 2) and out.dtype == jnp.float32
    assert bool(jnp.all(jnp.isfinite(out)))
    print("KERNEL_OK")
</pallas_src>

<mosaic_0001>
module attributes {stable_mosaic.version = 11 : i64} {
  func.func @_encoder_kernel(%arg0: memref<64x2xf32, #tpu.memory_space<vmem>>, %arg1: memref<64x1xf32, #tpu.memory_space<vmem>>, %arg2: memref<2x32xf32, #tpu.memory_space<vmem>>, %arg3: memref<1x32xf32, #tpu.memory_space<vmem>>, %arg4: memref<1x32xf32, #tpu.memory_space<vmem>>, %arg5: memref<32x16xf32, #tpu.memory_space<vmem>>, %arg6: memref<1x16xf32, #tpu.memory_space<vmem>>, %arg7: memref<16x128xf32, #tpu.memory_space<vmem>>, %arg8: memref<32x128xf32, #tpu.memory_space<vmem>>, %arg9: memref<1x128xf32, #tpu.memory_space<vmem>>, %arg10: memref<8x32xf32, #tpu.memory_space<vmem>>) attributes {dimension_semantics = [], scalar_prefetch = 0 : i64, scratch_operands = 0 : i64, tpu.core_type = #tpu.core_type<tc>} {
    %c0 = arith.constant 0 : index
    %c0_0 = arith.constant 0 : index
    %0 = vector.load %arg0[%c0, %c0_0] : memref<64x2xf32, #tpu.memory_space<vmem>>, vector<64x2xf32>
    %c0_1 = arith.constant 0 : index
    %c0_2 = arith.constant 0 : index
    %1 = vector.load %arg1[%c0_1, %c0_2] : memref<64x1xf32, #tpu.memory_space<vmem>>, vector<64x1xf32>
    %2 = vector.extract_strided_slice %0 {offsets = [0, 0], sizes = [64, 1], strides = [1, 1]} : vector<64x2xf32> to vector<64x1xf32>
    %c0_3 = arith.constant 0 : index
    %c0_4 = arith.constant 0 : index
    %3 = vector.load %arg2[%c0_3, %c0_4] : memref<2x32xf32, #tpu.memory_space<vmem>>, vector<1x32xf32>
    %4 = vector.broadcast %2 : vector<64x1xf32> to vector<64x32xf32>
    %5 = vector.broadcast %3 : vector<1x32xf32> to vector<64x32xf32>
    %6 = arith.mulf %4, %5 : vector<64x32xf32>
    %7 = vector.extract_strided_slice %0 {offsets = [0, 1], sizes = [64, 1], strides = [1, 1]} : vector<64x2xf32> to vector<64x1xf32>
    %c1 = arith.constant 1 : index
    %c0_5 = arith.constant 0 : index
    %8 = vector.load %arg2[%c1, %c0_5] : memref<2x32xf32, #tpu.memory_space<vmem>>, vector<1x32xf32>
    %9 = vector.broadcast %7 : vector<64x1xf32> to vector<64x32xf32>
    %10 = vector.broadcast %8 : vector<1x32xf32> to vector<64x32xf32>
    %11 = arith.mulf %9, %10 : vector<64x32xf32>
    %12 = arith.addf %6, %11 : vector<64x32xf32>
    %c0_6 = arith.constant 0 : index
    %c0_7 = arith.constant 0 : index
    %13 = vector.load %arg3[%c0_6, %c0_7] : memref<1x32xf32, #tpu.memory_space<vmem>>, vector<1x32xf32>
    %14 = vector.broadcast %1 : vector<64x1xf32> to vector<64x32xf32>
    %15 = vector.broadcast %13 : vector<1x32xf32> to vector<64x32xf32>
    %16 = arith.mulf %14, %15 : vector<64x32xf32>
    %17 = arith.addf %12, %16 : vector<64x32xf32>
    %c0_8 = arith.constant 0 : index
    %c0_9 = arith.constant 0 : index
    %18 = vector.load %arg4[%c0_8, %c0_9] : memref<1x32xf32, #tpu.memory_space<vmem>>, vector<1x32xf32>
    %19 = vector.broadcast %18 : vector<1x32xf32> to vector<64x32xf32>
    %20 = arith.addf %17, %19 : vector<64x32xf32>
    %cst = arith.constant 0.000000e+00 : f32
    %21 = vector.broadcast %cst : f32 to vector<64x32xf32>
    %22 = arith.cmpf oge, %20, %21 : vector<64x32xf32>
    %cst_10 = arith.constant 0.00999999977 : f32
    %23 = vector.broadcast %cst_10 : f32 to vector<64x32xf32>
    %24 = arith.mulf %23, %20 : vector<64x32xf32>
    %25 = arith.select %22, %20, %24 : vector<64x32xi1>, vector<64x32xf32>
    %c0_11 = arith.constant 0 : index
    %c0_12 = arith.constant 0 : index
    %26 = vector.load %arg5[%c0_11, %c0_12] : memref<32x16xf32, #tpu.memory_space<vmem>>, vector<32x16xf32>
    %cst_13 = arith.constant dense<0.000000e+00> : vector<64x16xf32>
    %27 = tpu.matmul %25, %26, %cst_13 {dimension_numbers = #tpu.dot_dimension_numbers<[1], [0], [0], [1], [0, 0, 1, 1], [], []>} : vector<64x32xf32>, vector<32x16xf32>, vector<64x16xf32> -> vector<64x16xf32>
    %c0_14 = arith.constant 0 : index
    %c0_15 = arith.constant 0 : index
    %28 = vector.load %arg6[%c0_14, %c0_15] : memref<1x16xf32, #tpu.memory_space<vmem>>, vector<1x16xf32>
    %29 = vector.broadcast %28 : vector<1x16xf32> to vector<64x16xf32>
    %30 = arith.addf %27, %29 : vector<64x16xf32>
    %c0_16 = arith.constant 0 : index
    %c0_17 = arith.constant 0 : index
    %31 = vector.load %arg7[%c0_16, %c0_17] : memref<16x128xf32, #tpu.memory_space<vmem>>, vector<16x128xf32>
    %cst_18 = arith.constant dense<0.000000e+00> : vector<64x128xf32>
    %32 = tpu.matmul %30, %31, %cst_18 {dimension_numbers = #tpu.dot_dimension_numbers<[1], [0], [0], [1], [0, 0, 1, 1], [], []>} : vector<64x16xf32>, vector<16x128xf32>, vector<64x128xf32> -> vector<64x128xf32>
    %c0_19 = arith.constant 0 : index
    %c0_20 = arith.constant 0 : index
    %33 = vector.load %arg9[%c0_19, %c0_20] : memref<1x128xf32, #tpu.memory_space<vmem>>, vector<1x128xf32>
    %34 = vector.broadcast %33 : vector<1x128xf32> to vector<64x128xf32>
    %35 = arith.addf %32, %34 : vector<64x128xf32>
    %c0_21 = arith.constant 0 : index
    %c0_22 = arith.constant 0 : index
    %36 = vector.load %arg8[%c0_21, %c0_22] : memref<32x128xf32, #tpu.memory_space<vmem>>, vector<32x128xf32>
    %cst_23 = arith.constant 0.000000e+00 : f32
    %37 = vector.broadcast %cst_23 : f32 to vector<8x32xf32>
    %cst_24 = arith.constant 0.000000e+00 : f32
    %38 = vector.broadcast %cst_24 : f32 to vector<8x32xf32>
    %39 = vector.extract_strided_slice %35 {offsets = [0, 0], sizes = [8, 128], strides = [1, 1]} : vector<64x128xf32> to vector<8x128xf32>
    %cst_25 = arith.constant dense<0.000000e+00> : vector<8x128xf32>
    %40 = tpu.matmul %37, %36, %cst_25 {dimension_numbers = #tpu.dot_dimension_numbers<[1], [0], [0], [1], [0, 0, 1, 1], [], []>} : vector<8x32xf32>, vector<32x128xf32>, vector<8x128xf32> -> vector<8x128xf32>
    %41 = arith.addf %39, %40 : vector<8x128xf32>
    %42 = arith.negf %41 : vector<8x128xf32>
    %43 = math.exp %42 : vector<8x128xf32>
    %cst_26 = arith.constant 1.000000e+00 : f32
    %44 = vector.broadcast %cst_26 : f32 to vector<8x128xf32>
    %45 = arith.addf %44, %43 : vector<8x128xf32>
    %46 = arith.divf %44, %45 : vector<8x128xf32>
    %47 = vector.extract_strided_slice %46 {offsets = [0, 0], sizes = [8, 32], strides = [1, 1]} : vector<8x128xf32> to vector<8x32xf32>
    %48 = vector.extract_strided_slice %46 {offsets = [0, 32], sizes = [8, 32], strides = [1, 1]} : vector<8x128xf32> to vector<8x32xf32>
    %49 = vector.extract_strided_slice %46 {offsets = [0, 64], sizes = [8, 32], strides = [1, 1]} : vector<8x128xf32> to vector<8x32xf32>
    %50 = vector.extract_strided_slice %41 {offsets = [0, 96], sizes = [8, 32], strides = [1, 1]} : vector<8x128xf32> to vector<8x32xf32>
    %51 = math.tanh %50 : vector<8x32xf32>
    %52 = arith.mulf %48, %38 : vector<8x32xf32>
    %53 = arith.mulf %47, %51 : vector<8x32xf32>
    %54 = arith.addf %52, %53 : vector<8x32xf32>
    %55 = math.tanh %54 : vector<8x32xf32>
    %56 = arith.mulf %49, %55 : vector<8x32xf32>
    %57 = vector.extract_strided_slice %35 {offsets = [8, 0], sizes = [8, 128], strides = [1, 1]} : vector<64x128xf32> to vector<8x128xf32>
    %cst_27 = arith.constant dense<0.000000e+00> : vector<8x128xf32>
    %58 = tpu.matmul %56, %36, %cst_27 {dimension_numbers = #tpu.dot_dimension_numbers<[1], [0], [0], [1], [0, 0, 1, 1], [], []>} : vector<8x32xf32>, vector<32x128xf32>, vector<8x128xf32> -> vector<8x128xf32>
    %59 = arith.addf %57, %58 : vector<8x128xf32>
    %60 = arith.negf %59 : vector<8x128xf32>
    %61 = math.exp %60 : vector<8x128xf32>
    %cst_28 = arith.constant 1.000000e+00 : f32
    %62 = vector.broadcast %cst_28 : f32 to vector<8x128xf32>
    %63 = arith.addf %62, %61 : vector<8x128xf32>
    %64 = arith.divf %62, %63 : vector<8x128xf32>
    %65 = vector.extract_strided_slice %64 {offsets = [0, 0], sizes = [8, 32], strides = [1, 1]} : vector<8x128xf32> to vector<8x32xf32>
    %66 = vector.extract_strided_slice %64 {offsets = [0, 32], sizes = [8, 32], strides = [1, 1]} : vector<8x128xf32> to vector<8x32xf32>
    %67 = vector.extract_strided_slice %64 {offsets = [0, 64], sizes = [8, 32], strides = [1, 1]} : vector<8x128xf32> to vector<8x32xf32>
    %68 = vector.extract_strided_slice %59 {offsets = [0, 96], sizes = [8, 32], strides = [1, 1]} : vector<8x128xf32> to vector<8x32xf32>
    %69 = math.tanh %68 : vector<8x32xf32>
    %70 = arith.mulf %66, %54 : vector<8x32xf32>
    %71 = arith.mulf %65, %69 : vector<8x32xf32>
    %72 = arith.addf %70, %71 : vector<8x32xf32>
    %73 = math.tanh %72 : vector<8x32xf32>
    %74 = arith.mulf %67, %73 : vector<8x32xf32>
    %75 = vector.extract_strided_slice %35 {offsets = [16, 0], sizes = [8, 128], strides = [1, 1]} : vector<64x128xf32> to vector<8x128xf32>
    %cst_29 = arith.constant dense<0.000000e+00> : vector<8x128xf32>
    %76 = tpu.matmul %74, %36, %cst_29 {dimension_numbers = #tpu.dot_dimension_numbers<[1], [0], [0], [1], [0, 0, 1, 1], [], []>} : vector<8x32xf32>, vector<32x128xf32>, vector<8x128xf32> -> vector<8x128xf32>
    %77 = arith.addf %75, %76 : vector<8x128xf32>
    %78 = arith.negf %77 : vector<8x128xf32>
    %79 = math.exp %78 : vector<8x128xf32>
    %cst_30 = arith.constant 1.000000e+00 : f32
    %80 = vector.broadcast %cst_30 : f32 to vector<8x128xf32>
    %81 = arith.addf %80, %79 : vector<8x128xf32>
    %82 = arith.divf %80, %81 : vector<8x128xf32>
    %83 = vector.extract_strided_slice %82 {offsets = [0, 0], sizes = [8, 32], strides = [1, 1]} : vector<8x128xf32> to vector<8x32xf32>
    %84 = vector.extract_strided_slice %82 {offsets = [0, 32], sizes = [8, 32], strides = [1, 1]} : vector<8x128xf32> to vector<8x32xf32>
    %85 = vector.extract_strided_slice %82 {offsets = [0, 64], sizes = [8, 32], strides = [1, 1]} : vector<8x128xf32> to vector<8x32xf32>
    %86 = vector.extract_strided_slice %77 {offsets = [0, 96], sizes = [8, 32], strides = [1, 1]} : vector<8x128xf32> to vector<8x32xf32>
    %87 = math.tanh %86 : vector<8x32xf32>
    %88 = arith.mulf %84, %72 : vector<8x32xf32>
    %89 = arith.mulf %83, %87 : vector<8x32xf32>
    %90 = arith.addf %88, %89 : vector<8x32xf32>
    %91 = math.tanh %90 : vector<8x32xf32>
    %92 = arith.mulf %85, %91 : vector<8x32xf32>
    %93 = vector.extract_strided_slice %35 {offsets = [24, 0], sizes = [8, 128], strides = [1, 1]} : vector<64x128xf32> to vector<8x128xf32>
    %cst_31 = arith.constant dense<0.000000e+00> : vector<8x128xf32>
    %94 = tpu.matmul %92, %36, %cst_31 {dimension_numbers = #tpu.dot_dimension_numbers<[1], [0], [0], [1], [0, 0, 1, 1], [], []>} : vector<8x32xf32>, vector<32x128xf32>, vector<8x128xf32> -> vector<8x128xf32>
    %95 = arith.addf %93, %94 : vector<8x128xf32>
    %96 = arith.negf %95 : vector<8x128xf32>
    %97 = math.exp %96 : vector<8x128xf32>
    %cst_32 = arith.constant 1.000000e+00 : f32
    %98 = vector.broadcast %cst_32 : f32 to vector<8x128xf32>
    %99 = arith.addf %98, %97 : vector<8x128xf32>
    %100 = arith.divf %98, %99 : vector<8x128xf32>
    %101 = vector.extract_strided_slice %100 {offsets = [0, 0], sizes = [8, 32], strides = [1, 1]} : vector<8x128xf32> to vector<8x32xf32>
    %102 = vector.extract_strided_slice %100 {offsets = [0, 32], sizes = [8, 32], strides = [1, 1]} : vector<8x128xf32> to vector<8x32xf32>
    %103 = vector.extract_strided_slice %100 {offsets = [0, 64], sizes = [8, 32], strides = [1, 1]} : vector<8x128xf32> to vector<8x32xf32>
    %104 = vector.extract_strided_slice %95 {offsets = [0, 96], sizes = [8, 32], strides = [1, 1]} : vector<8x128xf32> to vector<8x32xf32>
    %105 = math.tanh %104 : vector<8x32xf32>
    %106 = arith.mulf %102, %90 : vector<8x32xf32>
    %107 = arith.mulf %101, %105 : vector<8x32xf32>
    %108 = arith.addf %106, %107 : vector<8x32xf32>
    %109 = math.tanh %108 : vector<8x32xf32>
    %110 = arith.mulf %103, %109 : vector<8x32xf32>
    %111 = vector.extract_strided_slice %35 {offsets = [32, 0], sizes = [8, 128], strides = [1, 1]} : vector<64x128xf32> to vector<8x128xf32>
    %cst_33 = arith.constant dense<0.000000e+00> : vector<8x128xf32>
    %112 = tpu.matmul %110, %36, %cst_33 {dimension_numbers = #tpu.dot_dimension_numbers<[1], [0], [0], [1], [0, 0, 1, 1], [], []>} : vector<8x32xf32>, vector<32x128xf32>, vector<8x128xf32> -> vector<8x128xf32>
    %113 = arith.addf %111, %112 : vector<8x128xf32>
    %114 = arith.negf %113 : vector<8x128xf32>
    %115 = math.exp %114 : vector<8x128xf32>
    %cst_34 = arith.constant 1.000000e+00 : f32
    %116 = vector.broadcast %cst_34 : f32 to vector<8x128xf32>
    %117 = arith.addf %116, %115 : vector<8x128xf32>
    %118 = arith.divf %116, %117 : vector<8x128xf32>
    %119 = vector.extract_strided_slice %118 {offsets = [0, 0], sizes = [8, 32], strides = [1, 1]} : vector<8x128xf32> to vector<8x32xf32>
    %120 = vector.extract_strided_slice %118 {offsets = [0, 32], sizes = [8, 32], strides = [1, 1]} : vector<8x128xf32> to vector<8x32xf32>
    %121 = vector.extract_strided_slice %118 {offsets = [0, 64], sizes = [8, 32], strides = [1, 1]} : vector<8x128xf32> to vector<8x32xf32>
    %122 = vector.extract_strided_slice %113 {offsets = [0, 96], sizes = [8, 32], strides = [1, 1]} : vector<8x128xf32> to vector<8x32xf32>
    %123 = math.tanh %122 : vector<8x32xf32>
    %124 = arith.mulf %120, %108 : vector<8x32xf32>
    %125 = arith.mulf %119, %123 : vector<8x32xf32>
    %126 = arith.addf %124, %125 : vector<8x32xf32>
    %127 = math.tanh %126 : vector<8x32xf32>
    %128 = arith.mulf %121, %127 : vector<8x32xf32>
    %129 = vector.extract_strided_slice %35 {offsets = [40, 0], sizes = [8, 128], strides = [1, 1]} : vector<64x128xf32> to vector<8x128xf32>
    %cst_35 = arith.constant dense<0.000000e+00> : vector<8x128xf32>
    %130 = tpu.matmul %128, %36, %cst_35 {dimension_numbers = #tpu.dot_dimension_numbers<[1], [0], [0], [1], [0, 0, 1, 1], [], []>} : vector<8x32xf32>, vector<32x128xf32>, vector<8x128xf32> -> vector<8x128xf32>
    %131 = arith.addf %129, %130 : vector<8x128xf32>
    %132 = arith.negf %131 : vector<8x128xf32>
    %133 = math.exp %132 : vector<8x128xf32>
    %cst_36 = arith.constant 1.000000e+00 : f32
    %134 = vector.broadcast %cst_36 : f32 to vector<8x128xf32>
    %135 = arith.addf %134, %133 : vector<8x128xf32>
    %136 = arith.divf %134, %135 : vector<8x128xf32>
    %137 = vector.extract_strided_slice %136 {offsets = [0, 0], sizes = [8, 32], strides = [1, 1]} : vector<8x128xf32> to vector<8x32xf32>
    %138 = vector.extract_strided_slice %136 {offsets = [0, 32], sizes = [8, 32], strides = [1, 1]} : vector<8x128xf32> to vector<8x32xf32>
    %139 = vector.extract_strided_slice %136 {offsets = [0, 64], sizes = [8, 32], strides = [1, 1]} : vector<8x128xf32> to vector<8x32xf32>
    %140 = vector.extract_strided_slice %131 {offsets = [0, 96], sizes = [8, 32], strides = [1, 1]} : vector<8x128xf32> to vector<8x32xf32>
    %141 = math.tanh %140 : vector<8x32xf32>
    %142 = arith.mulf %138, %126 : vector<8x32xf32>
    %143 = arith.mulf %137, %141 : vector<8x32xf32>
    %144 = arith.addf %142, %143 : vector<8x32xf32>
    %145 = math.tanh %144 : vector<8x32xf32>
    %146 = arith.mulf %139, %145 : vector<8x32xf32>
    %147 = vector.extract_strided_slice %35 {offsets = [48, 0], sizes = [8, 128], strides = [1, 1]} : vector<64x128xf32> to vector<8x128xf32>
    %cst_37 = arith.constant dense<0.000000e+00> : vector<8x128xf32>
    %148 = tpu.matmul %146, %36, %cst_37 {dimension_numbers = #tpu.dot_dimension_numbers<[1], [0], [0], [1], [0, 0, 1, 1], [], []>} : vector<8x32xf32>, vector<32x128xf32>, vector<8x128xf32> -> vector<8x128xf32>
    %149 = arith.addf %147, %148 : vector<8x128xf32>
    %150 = arith.negf %149 : vector<8x128xf32>
    %151 = math.exp %150 : vector<8x128xf32>
    %cst_38 = arith.constant 1.000000e+00 : f32
    %152 = vector.broadcast %cst_38 : f32 to vector<8x128xf32>
    %153 = arith.addf %152, %151 : vector<8x128xf32>
    %154 = arith.divf %152, %153 : vector<8x128xf32>
    %155 = vector.extract_strided_slice %154 {offsets = [0, 0], sizes = [8, 32], strides = [1, 1]} : vector<8x128xf32> to vector<8x32xf32>
    %156 = vector.extract_strided_slice %154 {offsets = [0, 32], sizes = [8, 32], strides = [1, 1]} : vector<8x128xf32> to vector<8x32xf32>
    %157 = vector.extract_strided_slice %154 {offsets = [0, 64], sizes = [8, 32], strides = [1, 1]} : vector<8x128xf32> to vector<8x32xf32>
    %158 = vector.extract_strided_slice %149 {offsets = [0, 96], sizes = [8, 32], strides = [1, 1]} : vector<8x128xf32> to vector<8x32xf32>
    %159 = math.tanh %158 : vector<8x32xf32>
    %160 = arith.mulf %156, %144 : vector<8x32xf32>
    %161 = arith.mulf %155, %159 : vector<8x32xf32>
    %162 = arith.addf %160, %161 : vector<8x32xf32>
    %163 = math.tanh %162 : vector<8x32xf32>
    %164 = arith.mulf %157, %163 : vector<8x32xf32>
    %165 = vector.extract_strided_slice %35 {offsets = [56, 0], sizes = [8, 128], strides = [1, 1]} : vector<64x128xf32> to vector<8x128xf32>
    %cst_39 = arith.constant dense<0.000000e+00> : vector<8x128xf32>
    %166 = tpu.matmul %164, %36, %cst_39 {dimension_numbers = #tpu.dot_dimension_numbers<[1], [0], [0], [1], [0, 0, 1, 1], [], []>} : vector<8x32xf32>, vector<32x128xf32>, vector<8x128xf32> -> vector<8x128xf32>
    %167 = arith.addf %165, %166 : vector<8x128xf32>
    %168 = arith.negf %167 : vector<8x128xf32>
    %169 = math.exp %168 : vector<8x128xf32>
    %cst_40 = arith.constant 1.000000e+00 : f32
    %170 = vector.broadcast %cst_40 : f32 to vector<8x128xf32>
    %171 = arith.addf %170, %169 : vector<8x128xf32>
    %172 = arith.divf %170, %171 : vector<8x128xf32>
    %173 = vector.extract_strided_slice %172 {offsets = [0, 0], sizes = [8, 32], strides = [1, 1]} : vector<8x128xf32> to vector<8x32xf32>
    %174 = vector.extract_strided_slice %172 {offsets = [0, 32], sizes = [8, 32], strides = [1, 1]} : vector<8x128xf32> to vector<8x32xf32>
    %175 = vector.extract_strided_slice %172 {offsets = [0, 64], sizes = [8, 32], strides = [1, 1]} : vector<8x128xf32> to vector<8x32xf32>
    %176 = vector.extract_strided_slice %167 {offsets = [0, 96], sizes = [8, 32], strides = [1, 1]} : vector<8x128xf32> to vector<8x32xf32>
    %177 = math.tanh %176 : vector<8x32xf32>
    %178 = arith.mulf %174, %162 : vector<8x32xf32>
    %179 = arith.mulf %173, %177 : vector<8x32xf32>
    %180 = arith.addf %178, %179 : vector<8x32xf32>
    %181 = math.tanh %180 : vector<8x32xf32>
    %182 = arith.mulf %175, %181 : vector<8x32xf32>
    %c0_41 = arith.constant 0 : index
    %c0_42 = arith.constant 0 : index
    %183 = vector.load %arg10[%c0_41, %c0_42] : memref<8x32xf32, #tpu.memory_space<vmem>>, vector<8x32xf32>
    tpu.vector_store %arg10[%c0_41, %c0_42], %182 {strides = array<i32>} : memref<8x32xf32, #tpu.memory_space<vmem>>, vector<8x32xf32>,
    return
  }
}

module attributes {stable_mosaic.version = 11 : i64} {
  func.func @_sspm_kernel(%arg0: i32, %arg1: memref<2xi32, #tpu.memory_space<smem>>, %arg2: memref<2xi32, #tpu.memory_space<smem>>, %arg3: memref<11x32xf32, #tpu.memory_space<vmem>>, %arg4: memref<11x2xf32, #tpu.memory_space<vmem>>, %arg5: memref<11x1xf32, #tpu.memory_space<vmem>>, %arg6: memref<2x32xf32, #tpu.memory_space<vmem>>, %arg7: memref<1x32xf32, #tpu.memory_space<vmem>>, %arg8: memref<1x32xf32, #tpu.memory_space<vmem>>, %arg9: memref<32x16xf32, #tpu.memory_space<vmem>>, %arg10: memref<1x16xf32, #tpu.memory_space<vmem>>, %arg11: memref<32x512xbf16, #tpu.memory_space<vmem>>, %arg12: memref<16x512xbf16, #tpu.memory_space<vmem>>, %arg13: memref<1x512xf32, #tpu.memory_space<vmem>>, %arg14: memref<512x32xbf16, #tpu.memory_space<vmem>>, %arg15: memref<1x32xf32, #tpu.memory_space<vmem>>, %arg16: memref<1x3x32xf32, #tpu.memory_space<vmem>>) attributes {dimension_semantics = [#tpu.dimension_semantics<parallel>], iteration_bounds = array<i64: 2>, scalar_prefetch = 2 : i64, scratch_operands = 0 : i64, tpu.core_type = #tpu.core_type<tc>, window_params = [{pipeline_mode = #tpu.pipeline_mode<synchronous>, transform_indices = @transform_0, window_bounds = array<i64: 11, 32>}, {pipeline_mode = #tpu.pipeline_mode<synchronous>, transform_indices = @transform_1, window_bounds = array<i64: 11, 2>}, {pipeline_mode = #tpu.pipeline_mode<synchronous>, transform_indices = @transform_2, window_bounds = array<i64: 11, 1>}, {pipeline_mode = #tpu.pipeline_mode<synchronous>, transform_indices = @transform_3, window_bounds = array<i64: 2, 32>}, {pipeline_mode = #tpu.pipeline_mode<synchronous>, transform_indices = @transform_4, window_bounds = array<i64: 1, 32>}, {pipeline_mode = #tpu.pipeline_mode<synchronous>, transform_indices = @transform_5, window_bounds = array<i64: 1, 32>}, {pipeline_mode = #tpu.pipeline_mode<synchronous>, transform_indices = @transform_6, window_bounds = array<i64: 32, 16>}, {pipeline_mode = #tpu.pipeline_mode<synchronous>, transform_indices = @transform_7, window_bounds = array<i64: 1, 16>}, {pipeline_mode = #tpu.pipeline_mode<synchronous>, transform_indices = @transform_8, window_bounds = array<i64: 32, 512>}, {pipeline_mode = #tpu.pipeline_mode<synchronous>, transform_indices = @transform_9, window_bounds = array<i64: 16, 512>}, {pipeline_mode = #tpu.pipeline_mode<synchronous>, transform_indices = @transform_10, window_bounds = array<i64: 1, 512>}, {pipeline_mode = #tpu.pipeline_mode<synchronous>, transform_indices = @transform_11, window_bounds = array<i64: 512, 32>}, {pipeline_mode = #tpu.pipeline_mode<synchronous>, transform_indices = @transform_12, window_bounds = array<i64: 1, 32>}, {transform_indices = @transform_13, window_bounds = array<i64: 1, 3, 32>}]} {
    %0 = arith.index_cast %arg0 : i32 to index
    %1 = memref.load %arg1[%0] : memref<2xi32, #tpu.memory_space<smem>>
    %2 = arith.index_cast %arg0 : i32 to index
    %3 = memref.load %arg2[%2] : memref<2xi32, #tpu.memory_space<smem>>
    %cst = arith.constant 0.000000e+00 : f32
    %4 = vector.broadcast %cst : f32 to vector<1x3x32xf32>
    %c0 = arith.constant 0 : index
    %c0_0 = arith.constant 0 : index
    %c0_1 = arith.constant 0 : index
    %5 = vector.load %arg16[%c0, %c0_0, %c0_1] : memref<1x3x32xf32, #tpu.memory_space<vmem>>, vector<1x3x32xf32>
    tpu.vector_store %arg16[%c0, %c0_0, %c0_1], %4 {strides = array<i32>} : memref<1x3x32xf32, #tpu.memory_space<vmem>>, vector<1x3x32xf32>,
    %6 = arith.index_cast %1 : i32 to index
    %c0_2 = arith.constant 0 : index
    %7 = vector.load %arg3[%6, %c0_2] : memref<11x32xf32, #tpu.memory_space<vmem>>, vector<3x32xf32>
    %8 = arith.index_cast %1 : i32 to index
    %c0_3 = arith.constant 0 : index
    %9 = vector.load %arg4[%8, %c0_3] : memref<11x2xf32, #tpu.memory_space<vmem>>, vector<3x2xf32>
    %10 = arith.index_cast %1 : i32 to index
    %c0_4 = arith.constant 0 : index
    %11 = vector.load %arg5[%10, %c0_4] : memref<11x1xf32, #tpu.memory_space<vmem>>, vector<3x1xf32>
    %c0_5 = arith.constant 0 : index
    %c0_6 = arith.constant 0 : index
    %12 = vector.load %arg6[%c0_5, %c0_6] : memref<2x32xf32, #tpu.memory_space<vmem>>, vector<1x32xf32>
    %c1 = arith.constant 1 : index
    %c0_7 = arith.constant 0 : index
    %13 = vector.load %arg6[%c1, %c0_7] : memref<2x32xf32, #tpu.memory_space<vmem>>, vector<1x32xf32>
    %14 = vector.extract_strided_slice %9 {offsets = [0, 0], sizes = [3, 1], strides = [1, 1]} : vector<3x2xf32> to vector<3x1xf32>
    %15 = vector.broadcast %14 : vector<3x1xf32> to vector<3x32xf32>
    %16 = vector.broadcast %12 : vector<1x32xf32> to vector<3x32xf32>
    %17 = arith.mulf %15, %16 : vector<3x32xf32>
    %18 = vector.extract_strided_slice %9 {offsets = [0, 1], sizes = [3, 1], strides = [1, 1]} : vector<3x2xf32> to vector<3x1xf32>
    %19 = vector.broadcast %18 : vector<3x1xf32> to vector<3x32xf32>
    %20 = vector.broadcast %13 : vector<1x32xf32> to vector<3x32xf32>
    %21 = arith.mulf %19, %20 : vector<3x32xf32>
    %22 = arith.addf %17, %21 : vector<3x32xf32>
    %c0_8 = arith.constant 0 : index
    %c0_9 = arith.constant 0 : index
    %23 = vector.load %arg7[%c0_8, %c0_9] : memref<1x32xf32, #tpu.memory_space<vmem>>, vector<1x32xf32>
    %24 = vector.broadcast %11 : vector<3x1xf32> to vector<3x32xf32>
    %25 = vector.broadcast %23 : vector<1x32xf32> to vector<3x32xf32>
    %26 = arith.mulf %24, %25 : vector<3x32xf32>
    %27 = arith.addf %22, %26 : vector<3x32xf32>
    %c0_10 = arith.constant 0 : index
    %c0_11 = arith.constant 0 : index
    %28 = vector.load %arg8[%c0_10, %c0_11] : memref<1x32xf32, #tpu.memory_space<vmem>>, vector<1x32xf32>
    %29 = vector.broadcast %28 : vector<1x32xf32> to vector<3x32xf32>
    %30 = arith.addf %27, %29 : vector<3x32xf32>
    %31 = arith.truncf %7 : vector<3x32xf32> to vector<3x32xbf16>
    %c0_12 = arith.constant 0 : index
    %c0_13 = arith.constant 0 : index
    %32 = vector.load %arg11[%c0_12, %c0_13] : memref<32x512xbf16, #tpu.memory_space<vmem>>, vector<32x512xbf16>
    %cst_14 = arith.constant dense<0.000000e+00> : vector<3x512xf32>
    %33 = tpu.matmul %31, %32, %cst_14 {dimension_numbers = #tpu.dot_dimension_numbers<[1], [0], [0], [1], [0, 0, 1, 1], [], []>} : vector<3x32xbf16>, vector<32x512xbf16>, vector<3x512xf32> -> vector<3x512xf32>
    %c0_15 = arith.constant 0 : index
    %c0_16 = arith.constant 0 : index
    %34 = vector.load %arg9[%c0_15, %c0_16] : memref<32x16xf32, #tpu.memory_space<vmem>>, vector<32x16xf32>
    %c0_17 = arith.constant 0 : index
    %c0_18 = arith.constant 0 : index
    %35 = vector.load %arg10[%c0_17, %c0_18] : memref<1x16xf32, #tpu.memory_space<vmem>>, vector<1x16xf32>
    %c0_19 = arith.constant 0 : index
    %c0_20 = arith.constant 0 : index
    %36 = vector.load %arg12[%c0_19, %c0_20] : memref<16x512xbf16, #tpu.memory_space<vmem>>, vector<16x512xbf16>
    %c0_21 = arith.constant 0 : index
    %c0_22 = arith.constant 0 : index
    %37 = vector.load %arg13[%c0_21, %c0_22] : memref<1x512xf32, #tpu.memory_space<vmem>>, vector<1x512xf32>
    %c0_23 = arith.constant 0 : index
    %c0_24 = arith.constant 0 : index
    %38 = vector.load %arg14[%c0_23, %c0_24] : memref<512x32xbf16, #tpu.memory_space<vmem>>, vector<512x32xbf16>
    %c0_25 = arith.constant 0 : index
    %c0_26 = arith.constant 0 : index
    %39 = vector.load %arg15[%c0_25, %c0_26] : memref<1x32xf32, #tpu.memory_space<vmem>>, vector<1x32xf32>
    %40 = tpu.iota {dimensions = array<i32: 0>} : vector<3x1xi32>
    %41 = vector.broadcast %3 : i32 to vector<3x1xi32>
    %42 = arith.cmpi slt, %40, %41 : vector<3x1xi32>
    %c0_i32 = arith.constant 0 : i32
    %cst_27 = arith.constant -1.000000e+30 : f32
    %c0_i32_28 = arith.constant 0 : i32
    %43 = arith.subi %3, %c0_i32_28 : i32
    %44 = arith.addi %c0_i32_28, %43 : i32
    %c1_i32 = arith.constant 1 : i32
    scf.for %arg17 = %c0_i32_28 to %44 step %c1_i32  : i32 {
      %45 = arith.addi %1, %arg17 : i32
      %46 = arith.index_cast %45 : i32 to index
      %c0_29 = arith.constant 0 : index
      %47 = vector.load %arg4[%46, %c0_29] : memref<11x2xf32, #tpu.memory_space<vmem>>, vector<1x2xf32>
      %48 = vector.extract_strided_slice %47 {offsets = [0, 0], sizes = [1, 1], strides = [1, 1]} : vector<1x2xf32> to vector<1x1xf32>
      %49 = vector.broadcast %48 : vector<1x1xf32> to vector<1x32xf32>
      %50 = arith.mulf %49, %12 : vector<1x32xf32>
      %51 = vector.extract_strided_slice %47 {offsets = [0, 1], sizes = [1, 1], strides = [1, 1]} : vector<1x2xf32> to vector<1x1xf32>
      %52 = vector.broadcast %51 : vector<1x1xf32> to vector<1x32xf32>
      %53 = arith.mulf %52, %13 : vector<1x32xf32>
      %54 = arith.addf %50, %53 : vector<1x32xf32>
      %55 = vector.broadcast %54 : vector<1x32xf32> to vector<3x32xf32>
      %56 = arith.subf %30, %55 : vector<3x32xf32>
      %cst_30 = arith.constant 0.000000e+00 : f32
      %57 = vector.broadcast %cst_30 : f32 to vector<3x32xf32>
      %58 = arith.cmpf oge, %56, %57 : vector<3x32xf32>
      %cst_31 = arith.constant 0.00999999977 : f32
      %59 = vector.broadcast %cst_31 : f32 to vector<3x32xf32>
      %60 = arith.mulf %59, %56 : vector<3x32xf32>
      %61 = arith.select %58, %56, %60 : vector<3x32xi1>, vector<3x32xf32>
      %cst_32 = arith.constant dense<0.000000e+00> : vector<3x16xf32>
      %62 = tpu.matmul %61, %34, %cst_32 {dimension_numbers = #tpu.dot_dimension_numbers<[1], [0], [0], [1], [0, 0, 1, 1], [], []>} : vector<3x32xf32>, vector<32x16xf32>, vector<3x16xf32> -> vector<3x16xf32>
      %63 = vector.broadcast %35 : vector<1x16xf32> to vector<3x16xf32>
      %64 = arith.addf %62, %63 : vector<3x16xf32>
      %65 = arith.truncf %64 : vector<3x16xf32> to vector<3x16xbf16>
      %cst_33 = arith.constant dense<0.000000e+00> : vector<3x512xf32>
      %66 = tpu.matmul %65, %36, %cst_33 {dimension_numbers = #tpu.dot_dimension_numbers<[1], [0], [0], [1], [0, 0, 1, 1], [], []>} : vector<3x16xbf16>, vector<16x512xbf16>, vector<3x512xf32> -> vector<3x512xf32>
      %67 = arith.addf %33, %66 : vector<3x512xf32>
      %68 = vector.broadcast %37 : vector<1x512xf32> to vector<3x512xf32>
      %69 = arith.addf %67, %68 : vector<3x512xf32>
      %cst_34 = arith.constant 0.000000e+00 : f32
      %70 = vector.broadcast %cst_34 : f32 to vector<3x512xf32>
      %71 = arith.cmpf oge, %69, %70 : vector<3x512xf32>
      %cst_35 = arith.constant 0.00999999977 : f32
      %72 = vector.broadcast %cst_35 : f32 to vector<3x512xf32>
      %73 = arith.mulf %72, %69 : vector<3x512xf32>
      %74 = arith.select %71, %69, %73 : vector<3x512xi1>, vector<3x512xf32>
      %75 = arith.truncf %74 : vector<3x512xf32> to vector<3x512xbf16>
      %cst_36 = arith.constant dense<0.000000e+00> : vector<3x32xf32>
      %76 = tpu.matmul %75, %38, %cst_36 {dimension_numbers = #tpu.dot_dimension_numbers<[1], [0], [0], [1], [0, 0, 1, 1], [], []>} : vector<3x512xbf16>, vector<512x32xbf16>, vector<3x32xf32> -> vector<3x32xf32>
      %77 = vector.broadcast %39 : vector<1x32xf32> to vector<3x32xf32>
      %78 = arith.addf %76, %77 : vector<3x32xf32>
      %cst_37 = arith.constant 0.000000e+00 : f32
      %79 = vector.broadcast %cst_37 : f32 to vector<3x32xf32>
      %80 = arith.cmpf oge, %78, %79 : vector<3x32xf32>
      %cst_38 = arith.constant 0.00999999977 : f32
      %81 = vector.broadcast %cst_38 : f32 to vector<3x32xf32>
      %82 = arith.mulf %81, %78 : vector<3x32xf32>
      %83 = arith.select %80, %78, %82 : vector<3x32xi1>, vector<3x32xf32>
      %84 = vector.shape_cast %42 : vector<3x1xi1> to vector<3x1xi1>
      %85 = vector.broadcast %84 : vector<3x1xi1> to vector<3x32xi1>
      %86 = vector.broadcast %cst_27 : f32 to vector<3x32xf32>
      %87 = arith.select %85, %83, %86 : vector<3x32xi1>, vector<3x32xf32>
      %cst_39 = arith.constant dense<0xFF800000> : vector<32xf32>
      %88 = vector.multi_reduction <maximumf>, %87, %cst_39 [0] : vector<3x32xf32> to vector<32xf32>
      %89 = vector.shape_cast %88 : vector<32xf32> to vector<1x32xf32>
      %c0_40 = arith.constant 0 : index
      %90 = arith.index_cast %arg17 : i32 to index
      %c0_41 = arith.constant 0 : index
      %91 = vector.load %arg16[%c0_40, %90, %c0_41] : memref<1x3x32xf32, #tpu.memory_space<vmem>>, vector<1x1x32xf32>
      %92 = vector.shape_cast %91 : vector<1x1x32xf32> to vector<1x32xf32>
      %93 = vector.shape_cast %89 : vector<1x32xf32> to vector<1x1x32xf32>
      tpu.vector_store %arg16[%c0_40, %90, %c0_41], %93 {strides = array<i32>} : memref<1x3x32xf32, #tpu.memory_space<vmem>>, vector<1x1x32xf32>,
    }
    return
  }
  func.func @transform_0(%arg0: i32, %arg1: memref<2xi32, #tpu.memory_space<smem>>, %arg2: memref<2xi32, #tpu.memory_space<smem>>) -> (i32, i32) {
    %c0_i32 = arith.constant 0 : i32
    %c0_i32_0 = arith.constant 0 : i32
    %c0_i32_1 = arith.constant 0 : i32
    return %c0_i32, %c0_i32_0 : i32, i32
  }
  func.func @transform_1(%arg0: i32, %arg1: memref<2xi32, #tpu.memory_space<smem>>, %arg2: memref<2xi32, #tpu.memory_space<smem>>) -> (i32, i32) {
    %c0_i32 = arith.constant 0 : i32
    %c0_i32_0 = arith.constant 0 : i32
    %c0_i32_1 = arith.constant 0 : i32
    return %c0_i32, %c0_i32_0 : i32, i32
  }
  func.func @transform_2(%arg0: i32, %arg1: memref<2xi32, #tpu.memory_space<smem>>, %arg2: memref<2xi32, #tpu.memory_space<smem>>) -> (i32, i32) {
    %c0_i32 = arith.constant 0 : i32
    %c0_i32_0 = arith.constant 0 : i32
    %c0_i32_1 = arith.constant 0 : i32
    return %c0_i32, %c0_i32_0 : i32, i32
  }
  func.func @transform_3(%arg0: i32, %arg1: memref<2xi32, #tpu.memory_space<smem>>, %arg2: memref<2xi32, #tpu.memory_space<smem>>) -> (i32, i32) {
    %c0_i32 = arith.constant 0 : i32
    %c0_i32_0 = arith.constant 0 : i32
    %c0_i32_1 = arith.constant 0 : i32
    return %c0_i32, %c0_i32_0 : i32, i32
  }
  func.func @transform_4(%arg0: i32, %arg1: memref<2xi32, #tpu.memory_space<smem>>, %arg2: memref<2xi32, #tpu.memory_space<smem>>) -> (i32, i32) {
    %c0_i32 = arith.constant 0 : i32
    %c0_i32_0 = arith.constant 0 : i32
    %c0_i32_1 = arith.constant 0 : i32
    return %c0_i32, %c0_i32_0 : i32, i32
  }
  func.func @transform_5(%arg0: i32, %arg1: memref<2xi32, #tpu.memory_space<smem>>, %arg2: memref<2xi32, #tpu.memory_space<smem>>) -> (i32, i32) {
    %c0_i32 = arith.constant 0 : i32
    %c0_i32_0 = arith.constant 0 : i32
    %c0_i32_1 = arith.constant 0 : i32
    return %c0_i32, %c0_i32_0 : i32, i32
  }
  func.func @transform_6(%arg0: i32, %arg1: memref<2xi32, #tpu.memory_space<smem>>, %arg2: memref<2xi32, #tpu.memory_space<smem>>) -> (i32, i32) {
    %c0_i32 = arith.constant 0 : i32
    %c0_i32_0 = arith.constant 0 : i32
    %c0_i32_1 = arith.constant 0 : i32
    return %c0_i32, %c0_i32_0 : i32, i32
  }
  func.func @transform_7(%arg0: i32, %arg1: memref<2xi32, #tpu.memory_space<smem>>, %arg2: memref<2xi32, #tpu.memory_space<smem>>) -> (i32, i32) {
    %c0_i32 = arith.constant 0 : i32
    %c0_i32_0 = arith.constant 0 : i32
    %c0_i32_1 = arith.constant 0 : i32
    return %c0_i32, %c0_i32_0 : i32, i32
  }
  func.func @transform_8(%arg0: i32, %arg1: memref<2xi32, #tpu.memory_space<smem>>, %arg2: memref<2xi32, #tpu.memory_space<smem>>) -> (i32, i32) {
    %c0_i32 = arith.constant 0 : i32
    %c0_i32_0 = arith.constant 0 : i32
    %c0_i32_1 = arith.constant 0 : i32
    return %c0_i32, %c0_i32_0 : i32, i32
  }
  func.func @transform_9(%arg0: i32, %arg1: memref<2xi32, #tpu.memory_space<smem>>, %arg2: memref<2xi32, #tpu.memory_space<smem>>) -> (i32, i32) {
    %c0_i32 = arith.constant 0 : i32
    %c0_i32_0 = arith.constant 0 : i32
    %c0_i32_1 = arith.constant 0 : i32
    return %c0_i32, %c0_i32_0 : i32, i32
  }
  func.func @transform_10(%arg0: i32, %arg1: memref<2xi32, #tpu.memory_space<smem>>, %arg2: memref<2xi32, #tpu.memory_space<smem>>) -> (i32, i32) {
    %c0_i32 = arith.constant 0 : i32
    %c0_i32_0 = arith.constant 0 : i32
    %c0_i32_1 = arith.constant 0 : i32
    return %c0_i32, %c0_i32_0 : i32, i32
  }
  func.func @transform_11(%arg0: i32, %arg1: memref<2xi32, #tpu.memory_space<smem>>, %arg2: memref<2xi32, #tpu.memory_space<smem>>) -> (i32, i32) {
    %c0_i32 = arith.constant 0 : i32
    %c0_i32_0 = arith.constant 0 : i32
    %c0_i32_1 = arith.constant 0 : i32
    return %c0_i32, %c0_i32_0 : i32, i32
  }
  func.func @transform_12(%arg0: i32, %arg1: memref<2xi32, #tpu.memory_space<smem>>, %arg2: memref<2xi32, #tpu.memory_space<smem>>) -> (i32, i32) {
    %c0_i32 = arith.constant 0 : i32
    %c0_i32_0 = arith.constant 0 : i32
    %c0_i32_1 = arith.constant 0 : i32
    return %c0_i32, %c0_i32_0 : i32, i32
  }
  func.func @transform_13(%arg0: i32, %arg1: memref<2xi32, #tpu.memory_space<smem>>, %arg2: memref<2xi32, #tpu.memory_space<smem>>) -> (i32, i32, i32) {
    %c0_i32 = arith.constant 0 : i32
    %c0_i32_0 = arith.constant 0 : i32
    %c0_i32_1 = arith.constant 0 : i32
    return %arg0, %c0_i32, %c0_i32_0 : i32, i32, i32
  }
}

module attributes {stable_mosaic.version = 11 : i64} {
  func.func @_ctx_decoder_kernel(%arg0: memref<8x32xf32, #tpu.memory_space<vmem>>, %arg1: memref<8x32xf32, #tpu.memory_space<vmem>>, %arg2: memref<8x32xf32, #tpu.memory_space<vmem>>, %arg3: memref<8x2xf32, #tpu.memory_space<vmem>>, %arg4: memref<8x8x1xf32, #tpu.memory_space<vmem>>, %arg5: memref<32x64xf32, #tpu.memory_space<vmem>>, %arg6: memref<32x64xf32, #tpu.memory_space<vmem>>, %arg7: memref<1x64xf32, #tpu.memory_space<vmem>>, %arg8: memref<64x32xf32, #tpu.memory_space<vmem>>, %arg9: memref<1x32xf32, #tpu.memory_space<vmem>>, %arg10: memref<2x32xf32, #tpu.memory_space<vmem>>, %arg11: memref<1x32xf32, #tpu.memory_space<vmem>>, %arg12: memref<1x32xf32, #tpu.memory_space<vmem>>, %arg13: memref<32x16xf32, #tpu.memory_space<vmem>>, %arg14: memref<1x16xf32, #tpu.memory_space<vmem>>, %arg15: memref<16x128xf32, #tpu.memory_space<vmem>>, %arg16: memref<32x128xf32, #tpu.memory_space<vmem>>, %arg17: memref<1x128xf32, #tpu.memory_space<vmem>>, %arg18: memref<32x2xf32, #tpu.memory_space<vmem>>, %arg19: memref<1x2xf32, #tpu.memory_space<vmem>>, %arg20: memref<8x8x2xf32, #tpu.memory_space<vmem>>) attributes {dimension_semantics = [], scalar_prefetch = 0 : i64, scratch_operands = 0 : i64, tpu.core_type = #tpu.core_type<tc>} {
    %c0 = arith.constant 0 : index
    %c0_0 = arith.constant 0 : index
    %0 = vector.load %arg0[%c0, %c0_0] : memref<8x32xf32, #tpu.memory_space<vmem>>, vector<8x32xf32>
    %c0_1 = arith.constant 0 : index
    %c0_2 = arith.constant 0 : index
    %1 = vector.load %arg5[%c0_1, %c0_2] : memref<32x64xf32, #tpu.memory_space<vmem>>, vector<32x64xf32>
    %cst = arith.constant dense<0.000000e+00> : vector<8x64xf32>
    %2 = tpu.matmul %0, %1, %cst {dimension_numbers = #tpu.dot_dimension_numbers<[1], [0], [0], [1], [0, 0, 1, 1], [], []>} : vector<8x32xf32>, vector<32x64xf32>, vector<8x64xf32> -> vector<8x64xf32>
    %c0_3 = arith.constant 0 : index
    %c0_4 = arith.constant 0 : index
    %3 = vector.load %arg1[%c0_3, %c0_4] : memref<8x32xf32, #tpu.memory_space<vmem>>, vector<8x32xf32>
    %c0_5 = arith.constant 0 : index
    %c0_6 = arith.constant 0 : index
    %4 = vector.load %arg6[%c0_5, %c0_6] : memref<32x64xf32, #tpu.memory_space<vmem>>, vector<32x64xf32>
    %cst_7 = arith.constant dense<0.000000e+00> : vector<8x64xf32>
    %5 = tpu.matmul %3, %4, %cst_7 {dimension_numbers = #tpu.dot_dimension_numbers<[1], [0], [0], [1], [0, 0, 1, 1], [], []>} : vector<8x32xf32>, vector<32x64xf32>, vector<8x64xf32> -> vector<8x64xf32>
    %6 = arith.addf %2, %5 : vector<8x64xf32>
    %c0_8 = arith.constant 0 : index
    %c0_9 = arith.constant 0 : index
    %7 = vector.load %arg7[%c0_8, %c0_9] : memref<1x64xf32, #tpu.memory_space<vmem>>, vector<1x64xf32>
    %8 = vector.broadcast %7 : vector<1x64xf32> to vector<8x64xf32>
    %9 = arith.addf %6, %8 : vector<8x64xf32>
    %cst_10 = arith.constant 0.000000e+00 : f32
    %10 = vector.broadcast %cst_10 : f32 to vector<8x64xf32>
    %11 = arith.maximumf %9, %10 : vector<8x64xf32>
    %c0_11 = arith.constant 0 : index
    %c0_12 = arith.constant 0 : index
    %12 = vector.load %arg8[%c0_11, %c0_12] : memref<64x32xf32, #tpu.memory_space<vmem>>, vector<64x32xf32>
    %cst_13 = arith.constant dense<0.000000e+00> : vector<8x32xf32>
    %13 = tpu.matmul %11, %12, %cst_13 {dimension_numbers = #tpu.dot_dimension_numbers<[1], [0], [0], [1], [0, 0, 1, 1], [], []>} : vector<8x64xf32>, vector<64x32xf32>, vector<8x32xf32> -> vector<8x32xf32>
    %c0_14 = arith.constant 0 : index
    %c0_15 = arith.constant 0 : index
    %14 = vector.load %arg9[%c0_14, %c0_15] : memref<1x32xf32, #tpu.memory_space<vmem>>, vector<1x32xf32>
    %15 = vector.broadcast %14 : vector<1x32xf32> to vector<8x32xf32>
    %16 = arith.addf %13, %15 : vector<8x32xf32>
    %cst_16 = arith.constant 0.000000e+00 : f32
    %17 = vector.broadcast %cst_16 : f32 to vector<8x32xf32>
    %18 = arith.maximumf %16, %17 : vector<8x32xf32>
    %c0_17 = arith.constant 0 : index
    %c0_18 = arith.constant 0 : index
    %19 = vector.load %arg2[%c0_17, %c0_18] : memref<8x32xf32, #tpu.memory_space<vmem>>, vector<8x32xf32>
    %20 = arith.addf %18, %19 : vector<8x32xf32>
    %cst_19 = arith.constant 0.000000e+00 : f32
    %21 = vector.broadcast %cst_19 : f32 to vector<8x32xf32>
    %c0_20 = arith.constant 0 : index
    %c0_21 = arith.constant 0 : index
    %22 = vector.load %arg10[%c0_20, %c0_21] : memref<2x32xf32, #tpu.memory_space<vmem>>, vector<1x32xf32>
    %c1 = arith.constant 1 : index
    %c0_22 = arith.constant 0 : index
    %23 = vector.load %arg10[%c1, %c0_22] : memref<2x32xf32, #tpu.memory_space<vmem>>, vector<1x32xf32>
    %c0_23 = arith.constant 0 : index
    %c0_24 = arith.constant 0 : index
    %24 = vector.load %arg11[%c0_23, %c0_24] : memref<1x32xf32, #tpu.memory_space<vmem>>, vector<1x32xf32>
    %c0_25 = arith.constant 0 : index
    %c0_26 = arith.constant 0 : index
    %25 = vector.load %arg12[%c0_25, %c0_26] : memref<1x32xf32, #tpu.memory_space<vmem>>, vector<1x32xf32>
    %c0_27 = arith.constant 0 : index
    %c0_28 = arith.constant 0 : index
    %26 = vector.load %arg13[%c0_27, %c0_28] : memref<32x16xf32, #tpu.memory_space<vmem>>, vector<32x16xf32>
    %c0_29 = arith.constant 0 : index
    %c0_30 = arith.constant 0 : index
    %27 = vector.load %arg14[%c0_29, %c0_30] : memref<1x16xf32, #tpu.memory_space<vmem>>, vector<1x16xf32>
    %c0_31 = arith.constant 0 : index
    %c0_32 = arith.constant 0 : index
    %28 = vector.load %arg15[%c0_31, %c0_32] : memref<16x128xf32, #tpu.memory_space<vmem>>, vector<16x128xf32>
    %c0_33 = arith.constant 0 : index
    %c0_34 = arith.constant 0 : index
    %29 = vector.load %arg16[%c0_33, %c0_34] : memref<32x128xf32, #tpu.memory_space<vmem>>, vector<32x128xf32>
    %c0_35 = arith.constant 0 : index
    %c0_36 = arith.constant 0 : index
    %30 = vector.load %arg17[%c0_35, %c0_36] : memref<1x128xf32, #tpu.memory_space<vmem>>, vector<1x128xf32>
    %c0_37 = arith.constant 0 : index
    %c0_38 = arith.constant 0 : index
    %31 = vector.load %arg18[%c0_37, %c0_38] : memref<32x2xf32, #tpu.memory_space<vmem>>, vector<32x2xf32>
    %c0_39 = arith.constant 0 : index
    %c0_40 = arith.constant 0 : index
    %32 = vector.load %arg19[%c0_39, %c0_40] : memref<1x2xf32, #tpu.memory_space<vmem>>, vector<1x2xf32>
    %c0_41 = arith.constant 0 : index
    %c0_42 = arith.constant 0 : index
    %33 = vector.load %arg3[%c0_41, %c0_42] : memref<8x2xf32, #tpu.memory_space<vmem>>, vector<8x2xf32>
    %c0_43 = arith.constant 0 : index
    %c0_44 = arith.constant 0 : index
    %c0_45 = arith.constant 0 : index
    %34 = vector.load %arg4[%c0_43, %c0_44, %c0_45] : memref<8x8x1xf32, #tpu.memory_space<vmem>>, vector<1x8x1xf32>
    %35 = vector.shape_cast %34 : vector<1x8x1xf32> to vector<8x1xf32>
    %36 = vector.extract_strided_slice %33 {offsets = [0, 0], sizes = [8, 1], strides = [1, 1]} : vector<8x2xf32> to vector<8x1xf32>
    %37 = vector.broadcast %36 : vector<8x1xf32> to vector<8x32xf32>
    %38 = vector.broadcast %22 : vector<1x32xf32> to vector<8x32xf32>
    %39 = arith.mulf %37, %38 : vector<8x32xf32>
    %40 = vector.extract_strided_slice %33 {offsets = [0, 1], sizes = [8, 1], strides = [1, 1]} : vector<8x2xf32> to vector<8x1xf32>
    %41 = vector.broadcast %40 : vector<8x1xf32> to vector<8x32xf32>
    %42 = vector.broadcast %23 : vector<1x32xf32> to vector<8x32xf32>
    %43 = arith.mulf %41, %42 : vector<8x32xf32>
    %44 = arith.addf %39, %43 : vector<8x32xf32>
    %45 = vector.broadcast %35 : vector<8x1xf32> to vector<8x32xf32>
    %46 = vector.broadcast %24 : vector<1x32xf32> to vector<8x32xf32>
    %47 = arith.mulf %45, %46 : vector<8x32xf32>
    %48 = arith.addf %44, %47 : vector<8x32xf32>
    %49 = vector.broadcast %25 : vector<1x32xf32> to vector<8x32xf32>
    %50 = arith.addf %48, %49 : vector<8x32xf32>
    %cst_46 = arith.constant 0.000000e+00 : f32
    %51 = vector.broadcast %cst_46 : f32 to vector<8x32xf32>
    %52 = arith.cmpf oge, %50, %51 : vector<8x32xf32>
    %cst_47 = arith.constant 0.00999999977 : f32
    %53 = vector.broadcast %cst_47 : f32 to vector<8x32xf32>
    %54 = arith.mulf %53, %50 : vector<8x32xf32>
    %55 = arith.select %52, %50, %54 : vector<8x32xi1>, vector<8x32xf32>
    %cst_48 = arith.constant dense<0.000000e+00> : vector<8x16xf32>
    %56 = tpu.matmul %55, %26, %cst_48 {dimension_numbers = #tpu.dot_dimension_numbers<[1], [0], [0], [1], [0, 0, 1, 1], [], []>} : vector<8x32xf32>, vector<32x16xf32>, vector<8x16xf32> -> vector<8x16xf32>
    %57 = vector.broadcast %27 : vector<1x16xf32> to vector<8x16xf32>
    %58 = arith.addf %56, %57 : vector<8x16xf32>
    %cst_49 = arith.constant dense<0.000000e+00> : vector<8x128xf32>
    %59 = tpu.matmul %58, %28, %cst_49 {dimension_numbers = #tpu.dot_dimension_numbers<[1], [0], [0], [1], [0, 0, 1, 1], [], []>} : vector<8x16xf32>, vector<16x128xf32>, vector<8x128xf32> -> vector<8x128xf32>
    %cst_50 = arith.constant dense<0.000000e+00> : vector<8x128xf32>
    %60 = tpu.matmul %20, %29, %cst_50 {dimension_numbers = #tpu.dot_dimension_numbers<[1], [0], [0], [1], [0, 0, 1, 1], [], []>} : vector<8x32xf32>, vector<32x128xf32>, vector<8x128xf32> -> vector<8x128xf32>
    %61 = arith.addf %59, %60 : vector<8x128xf32>
    %62 = vector.broadcast %30 : vector<1x128xf32> to vector<8x128xf32>
    %63 = arith.addf %61, %62 : vector<8x128xf32>
    %64 = arith.negf %63 : vector<8x128xf32>
    %65 = math.exp %64 : vector<8x128xf32>
    %cst_51 = arith.constant 1.000000e+00 : f32
    %66 = vector.broadcast %cst_51 : f32 to vector<8x128xf32>
    %67 = arith.addf %66, %65 : vector<8x128xf32>
    %68 = arith.divf %66, %67 : vector<8x128xf32>
    %69 = vector.extract_strided_slice %68 {offsets = [0, 0], sizes = [8, 32], strides = [1, 1]} : vector<8x128xf32> to vector<8x32xf32>
    %70 = vector.extract_strided_slice %68 {offsets = [0, 32], sizes = [8, 32], strides = [1, 1]} : vector<8x128xf32> to vector<8x32xf32>
    %71 = vector.extract_strided_slice %68 {offsets = [0, 64], sizes = [8, 32], strides = [1, 1]} : vector<8x128xf32> to vector<8x32xf32>
    %72 = vector.extract_strided_slice %63 {offsets = [0, 96], sizes = [8, 32], strides = [1, 1]} : vector<8x128xf32> to vector<8x32xf32>
    %73 = math.tanh %72 : vector<8x32xf32>
    %74 = arith.mulf %70, %21 : vector<8x32xf32>
    %75 = arith.mulf %69, %73 : vector<8x32xf32>
    %76 = arith.addf %74, %75 : vector<8x32xf32>
    %77 = math.tanh %76 : vector<8x32xf32>
    %78 = arith.mulf %71, %77 : vector<8x32xf32>
    %cst_52 = arith.constant dense<0.000000e+00> : vector<8x2xf32>
    %79 = tpu.matmul %78, %31, %cst_52 {dimension_numbers = #tpu.dot_dimension_numbers<[1], [0], [0], [1], [0, 0, 1, 1], [], []>} : vector<8x32xf32>, vector<32x2xf32>, vector<8x2xf32> -> vector<8x2xf32>
    %80 = vector.broadcast %32 : vector<1x2xf32> to vector<8x2xf32>
    %81 = arith.addf %79, %80 : vector<8x2xf32>
    %c1_53 = arith.constant 1 : index
    %c0_54 = arith.constant 0 : index
    %c0_55 = arith.constant 0 : index
    %82 = vector.load %arg4[%c1_53, %c0_54, %c0_55] : memref<8x8x1xf32, #tpu.memory_space<vmem>>, vector<1x8x1xf32>
    %83 = vector.shape_cast %82 : vector<1x8x1xf32> to vector<8x1xf32>
    %84 = vector.extract_strided_slice %81 {offsets = [0, 0], sizes = [8, 1], strides = [1, 1]} : vector<8x2xf32> to vector<8x1xf32>
    %85 = vector.broadcast %84 : vector<8x1xf32> to vector<8x32xf32>
    %86 = vector.broadcast %22 : vector<1x32xf32> to vector<8x32xf32>
    %87 = arith.mulf %85, %86 : vector<8x32xf32>
    %88 = vector.extract_strided_slice %81 {offsets = [0, 1], sizes = [8, 1], strides = [1, 1]} : vector<8x2xf32> to vector<8x1xf32>
    %89 = vector.broadcast %88 : vector<8x1xf32> to vector<8x32xf32>
    %90 = vector.broadcast %23 : vector<1x32xf32> to vector<8x32xf32>
    %91 = arith.mulf %89, %90 : vector<8x32xf32>
    %92 = arith.addf %87, %91 : vector<8x32xf32>
    %93 = vector.broadcast %83 : vector<8x1xf32> to vector<8x32xf32>
    %94 = vector.broadcast %24 : vector<1x32xf32> to vector<8x32xf32>
    %95 = arith.mulf %93, %94 : vector<8x32xf32>
    %96 = arith.addf %92, %95 : vector<8x32xf32>
    %97 = vector.broadcast %25 : vector<1x32xf32> to vector<8x32xf32>
    %98 = arith.addf %96, %97 : vector<8x32xf32>
    %cst_56 = arith.constant 0.000000e+00 : f32
    %99 = vector.broadcast %cst_56 : f32 to vector<8x32xf32>
    %100 = arith.cmpf oge, %98, %99 : vector<8x32xf32>
    %cst_57 = arith.constant 0.00999999977 : f32
    %101 = vector.broadcast %cst_57 : f32 to vector<8x32xf32>
    %102 = arith.mulf %101, %98 : vector<8x32xf32>
    %103 = arith.select %100, %98, %102 : vector<8x32xi1>, vector<8x32xf32>
    %cst_58 = arith.constant dense<0.000000e+00> : vector<8x16xf32>
    %104 = tpu.matmul %103, %26, %cst_58 {dimension_numbers = #tpu.dot_dimension_numbers<[1], [0], [0], [1], [0, 0, 1, 1], [], []>} : vector<8x32xf32>, vector<32x16xf32>, vector<8x16xf32> -> vector<8x16xf32>
    %105 = vector.broadcast %27 : vector<1x16xf32> to vector<8x16xf32>
    %106 = arith.addf %104, %105 : vector<8x16xf32>
    %cst_59 = arith.constant dense<0.000000e+00> : vector<8x128xf32>
    %107 = tpu.matmul %106, %28, %cst_59 {dimension_numbers = #tpu.dot_dimension_numbers<[1], [0], [0], [1], [0, 0, 1, 1], [], []>} : vector<8x16xf32>, vector<16x128xf32>, vector<8x128xf32> -> vector<8x128xf32>
    %cst_60 = arith.constant dense<0.000000e+00> : vector<8x128xf32>
    %108 = tpu.matmul %78, %29, %cst_60 {dimension_numbers = #tpu.dot_dimension_numbers<[1], [0], [0], [1], [0, 0, 1, 1], [], []>} : vector<8x32xf32>, vector<32x128xf32>, vector<8x128xf32> -> vector<8x128xf32>
    %109 = arith.addf %107, %108 : vector<8x128xf32>
    %110 = vector.broadcast %30 : vector<1x128xf32> to vector<8x128xf32>
    %111 = arith.addf %109, %110 : vector<8x128xf32>
    %112 = arith.negf %111 : vector<8x128xf32>
    %113 = math.exp %112 : vector<8x128xf32>
    %cst_61 = arith.constant 1.000000e+00 : f32
    %114 = vector.broadcast %cst_61 : f32 to vector<8x128xf32>
    %115 = arith.addf %114, %113 : vector<8x128xf32>
    %116 = arith.divf %114, %115 : vector<8x128xf32>
    %117 = vector.extract_strided_slice %116 {offsets = [0, 0], sizes = [8, 32], strides = [1, 1]} : vector<8x128xf32> to vector<8x32xf32>
    %118 = vector.extract_strided_slice %116 {offsets = [0, 32], sizes = [8, 32], strides = [1, 1]} : vector<8x128xf32> to vector<8x32xf32>
    %119 = vector.extract_strided_slice %116 {offsets = [0, 64], sizes = [8, 32], strides = [1, 1]} : vector<8x128xf32> to vector<8x32xf32>
    %120 = vector.extract_strided_slice %111 {offsets = [0, 96], sizes = [8, 32], strides = [1, 1]} : vector<8x128xf32> to vector<8x32xf32>
    %121 = math.tanh %120 : vector<8x32xf32>
    %122 = arith.mulf %118, %76 : vector<8x32xf32>
    %123 = arith.mulf %117, %121 : vector<8x32xf32>
    %124 = arith.addf %122, %123 : vector<8x32xf32>
    %125 = math.tanh %124 : vector<8x32xf32>
    %126 = arith.mulf %119, %125 : vector<8x32xf32>
    %cst_62 = arith.constant dense<0.000000e+00> : vector<8x2xf32>
    %127 = tpu.matmul %126, %31, %cst_62 {dimension_numbers = #tpu.dot_dimension_numbers<[1], [0], [0], [1], [0, 0, 1, 1], [], []>} : vector<8x32xf32>, vector<32x2xf32>, vector<8x2xf32> -> vector<8x2xf32>
    %128 = vector.broadcast %32 : vector<1x2xf32> to vector<8x2xf32>
    %129 = arith.addf %127, %128 : vector<8x2xf32>
    %c2 = arith.constant 2 : index
    %c0_63 = arith.constant 0 : index
    %c0_64 = arith.constant 0 : index
    %130 = vector.load %arg4[%c2, %c0_63, %c0_64] : memref<8x8x1xf32, #tpu.memory_space<vmem>>, vector<1x8x1xf32>
    %131 = vector.shape_cast %130 : vector<1x8x1xf32> to vector<8x1xf32>
    %132 = vector.extract_strided_slice %129 {offsets = [0, 0], sizes = [8, 1], strides = [1, 1]} : vector<8x2xf32> to vector<8x1xf32>
    %133 = vector.broadcast %132 : vector<8x1xf32> to vector<8x32xf32>
    %134 = vector.broadcast %22 : vector<1x32xf32> to vector<8x32xf32>
    %135 = arith.mulf %133, %134 : vector<8x32xf32>
    %136 = vector.extract_strided_slice %129 {offsets = [0, 1], sizes = [8, 1], strides = [1, 1]} : vector<8x2xf32> to vector<8x1xf32>
    %137 = vector.broadcast %136 : vector<8x1xf32> to vector<8x32xf32>
    %138 = vector.broadcast %23 : vector<1x32xf32> to vector<8x32xf32>
    %139 = arith.mulf %137, %138 : vector<8x32xf32>
    %140 = arith.addf %135, %139 : vector<8x32xf32>
    %141 = vector.broadcast %131 : vector<8x1xf32> to vector<8x32xf32>
    %142 = vector.broadcast %24 : vector<1x32xf32> to vector<8x32xf32>
    %143 = arith.mulf %141, %142 : vector<8x32xf32>
    %144 = arith.addf %140, %143 : vector<8x32xf32>
    %145 = vector.broadcast %25 : vector<1x32xf32> to vector<8x32xf32>
    %146 = arith.addf %144, %145 : vector<8x32xf32>
    %cst_65 = arith.constant 0.000000e+00 : f32
    %147 = vector.broadcast %cst_65 : f32 to vector<8x32xf32>
    %148 = arith.cmpf oge, %146, %147 : vector<8x32xf32>
    %cst_66 = arith.constant 0.00999999977 : f32
    %149 = vector.broadcast %cst_66 : f32 to vector<8x32xf32>
    %150 = arith.mulf %149, %146 : vector<8x32xf32>
    %151 = arith.select %148, %146, %150 : vector<8x32xi1>, vector<8x32xf32>
    %cst_67 = arith.constant dense<0.000000e+00> : vector<8x16xf32>
    %152 = tpu.matmul %151, %26, %cst_67 {dimension_numbers = #tpu.dot_dimension_numbers<[1], [0], [0], [1], [0, 0, 1, 1], [], []>} : vector<8x32xf32>, vector<32x16xf32>, vector<8x16xf32> -> vector<8x16xf32>
    %153 = vector.broadcast %27 : vector<1x16xf32> to vector<8x16xf32>
    %154 = arith.addf %152, %153 : vector<8x16xf32>
    %cst_68 = arith.constant dense<0.000000e+00> : vector<8x128xf32>
    %155 = tpu.matmul %154, %28, %cst_68 {dimension_numbers = #tpu.dot_dimension_numbers<[1], [0], [0], [1], [0, 0, 1, 1], [], []>} : vector<8x16xf32>, vector<16x128xf32>, vector<8x128xf32> -> vector<8x128xf32>
    %cst_69 = arith.constant dense<0.000000e+00> : vector<8x128xf32>
    %156 = tpu.matmul %126, %29, %cst_69 {dimension_numbers = #tpu.dot_dimension_numbers<[1], [0], [0], [1], [0, 0, 1, 1], [], []>} : vector<8x32xf32>, vector<32x128xf32>, vector<8x128xf32> -> vector<8x128xf32>
    %157 = arith.addf %155, %156 : vector<8x128xf32>
    %158 = vector.broadcast %30 : vector<1x128xf32> to vector<8x128xf32>
    %159 = arith.addf %157, %158 : vector<8x128xf32>
    %160 = arith.negf %159 : vector<8x128xf32>
    %161 = math.exp %160 : vector<8x128xf32>
    %cst_70 = arith.constant 1.000000e+00 : f32
    %162 = vector.broadcast %cst_70 : f32 to vector<8x128xf32>
    %163 = arith.addf %162, %161 : vector<8x128xf32>
    %164 = arith.divf %162, %163 : vector<8x128xf32>
    %165 = vector.extract_strided_slice %164 {offsets = [0, 0], sizes = [8, 32], strides = [1, 1]} : vector<8x128xf32> to vector<8x32xf32>
    %166 = vector.extract_strided_slice %164 {offsets = [0, 32], sizes = [8, 32], strides = [1, 1]} : vector<8x128xf32> to vector<8x32xf32>
    %167 = vector.extract_strided_slice %164 {offsets = [0, 64], sizes = [8, 32], strides = [1, 1]} : vector<8x128xf32> to vector<8x32xf32>
    %168 = vector.extract_strided_slice %159 {offsets = [0, 96], sizes = [8, 32], strides = [1, 1]} : vector<8x128xf32> to vector<8x32xf32>
    %169 = math.tanh %168 : vector<8x32xf32>
    %170 = arith.mulf %166, %124 : vector<8x32xf32>
    %171 = arith.mulf %165, %169 : vector<8x32xf32>
    %172 = arith.addf %170, %171 : vector<8x32xf32>
    %173 = math.tanh %172 : vector<8x32xf32>
    %174 = arith.mulf %167, %173 : vector<8x32xf32>
    %cst_71 = arith.constant dense<0.000000e+00> : vector<8x2xf32>
    %175 = tpu.matmul %174, %31, %cst_71 {dimension_numbers = #tpu.dot_dimension_numbers<[1], [0], [0], [1], [0, 0, 1, 1], [], []>} : vector<8x32xf32>, vector<32x2xf32>, vector<8x2xf32> -> vector<8x2xf32>
    %176 = vector.broadcast %32 : vector<1x2xf32> to vector<8x2xf32>
    %177 = arith.addf %175, %176 : vector<8x2xf32>
    %c3 = arith.constant 3 : index
    %c0_72 = arith.constant 0 : index
    %c0_73 = arith.constant 0 : index
    %178 = vector.load %arg4[%c3, %c0_72, %c0_73] : memref<8x8x1xf32, #tpu.memory_space<vmem>>, vector<1x8x1xf32>
    %179 = vector.shape_cast %178 : vector<1x8x1xf32> to vector<8x1xf32>
    %180 = vector.extract_strided_slice %177 {offsets = [0, 0], sizes = [8, 1], strides = [1, 1]} : vector<8x2xf32> to vector<8x1xf32>
    %181 = vector.broadcast %180 : vector<8x1xf32> to vector<8x32xf32>
    %182 = vector.broadcast %22 : vector<1x32xf32> to vector<8x32xf32>
    %183 = arith.mulf %181, %182 : vector<8x32xf32>
    %184 = vector.extract_strided_slice %177 {offsets = [0, 1], sizes = [8, 1], strides = [1, 1]} : vector<8x2xf32> to vector<8x1xf32>
    %185 = vector.broadcast %184 : vector<8x1xf32> to vector<8x32xf32>
    %186 = vector.broadcast %23 : vector<1x32xf32> to vector<8x32xf32>
    %187 = arith.mulf %185, %186 : vector<8x32xf32>
    %188 = arith.addf %183, %187 : vector<8x32xf32>
    %189 = vector.broadcast %179 : vector<8x1xf32> to vector<8x32xf32>
    %190 = vector.broadcast %24 : vector<1x32xf32> to vector<8x32xf32>
    %191 = arith.mulf %189, %190 : vector<8x32xf32>
    %192 = arith.addf %188, %191 : vector<8x32xf32>
    %193 = vector.broadcast %25 : vector<1x32xf32> to vector<8x32xf32>
    %194 = arith.addf %192, %193 : vector<8x32xf32>
    %cst_74 = arith.constant 0.000000e+00 : f32
    %195 = vector.broadcast %cst_74 : f32 to vector<8x32xf32>
    %196 = arith.cmpf oge, %194, %195 : vector<8x32xf32>
    %cst_75 = arith.constant 0.00999999977 : f32
    %197 = vector.broadcast %cst_75 : f32 to vector<8x32xf32>
    %198 = arith.mulf %197, %194 : vector<8x32xf32>
    %199 = arith.select %196, %194, %198 : vector<8x32xi1>, vector<8x32xf32>
    %cst_76 = arith.constant dense<0.000000e+00> : vector<8x16xf32>
    %200 = tpu.matmul %199, %26, %cst_76 {dimension_numbers = #tpu.dot_dimension_numbers<[1], [0], [0], [1], [0, 0, 1, 1], [], []>} : vector<8x32xf32>, vector<32x16xf32>, vector<8x16xf32> -> vector<8x16xf32>
    %201 = vector.broadcast %27 : vector<1x16xf32> to vector<8x16xf32>
    %202 = arith.addf %200, %201 : vector<8x16xf32>
    %cst_77 = arith.constant dense<0.000000e+00> : vector<8x128xf32>
    %203 = tpu.matmul %202, %28, %cst_77 {dimension_numbers = #tpu.dot_dimension_numbers<[1], [0], [0], [1], [0, 0, 1, 1], [], []>} : vector<8x16xf32>, vector<16x128xf32>, vector<8x128xf32> -> vector<8x128xf32>
    %cst_78 = arith.constant dense<0.000000e+00> : vector<8x128xf32>
    %204 = tpu.matmul %174, %29, %cst_78 {dimension_numbers = #tpu.dot_dimension_numbers<[1], [0], [0], [1], [0, 0, 1, 1], [], []>} : vector<8x32xf32>, vector<32x128xf32>, vector<8x128xf32> -> vector<8x128xf32>
    %205 = arith.addf %203, %204 : vector<8x128xf32>
    %206 = vector.broadcast %30 : vector<1x128xf32> to vector<8x128xf32>
    %207 = arith.addf %205, %206 : vector<8x128xf32>
    %208 = arith.negf %207 : vector<8x128xf32>
    %209 = math.exp %208 : vector<8x128xf32>
    %cst_79 = arith.constant 1.000000e+00 : f32
    %210 = vector.broadcast %cst_79 : f32 to vector<8x128xf32>
    %211 = arith.addf %210, %209 : vector<8x128xf32>
    %212 = arith.divf %210, %211 : vector<8x128xf32>
    %213 = vector.extract_strided_slice %212 {offsets = [0, 0], sizes = [8, 32], strides = [1, 1]} : vector<8x128xf32> to vector<8x32xf32>
    %214 = vector.extract_strided_slice %212 {offsets = [0, 32], sizes = [8, 32], strides = [1, 1]} : vector<8x128xf32> to vector<8x32xf32>
    %215 = vector.extract_strided_slice %212 {offsets = [0, 64], sizes = [8, 32], strides = [1, 1]} : vector<8x128xf32> to vector<8x32xf32>
    %216 = vector.extract_strided_slice %207 {offsets = [0, 96], sizes = [8, 32], strides = [1, 1]} : vector<8x128xf32> to vector<8x32xf32>
    %217 = math.tanh %216 : vector<8x32xf32>
    %218 = arith.mulf %214, %172 : vector<8x32xf32>
    %219 = arith.mulf %213, %217 : vector<8x32xf32>
    %220 = arith.addf %218, %219 : vector<8x32xf32>
    %221 = math.tanh %220 : vector<8x32xf32>
    %222 = arith.mulf %215, %221 : vector<8x32xf32>
    %cst_80 = arith.constant dense<0.000000e+00> : vector<8x2xf32>
    %223 = tpu.matmul %222, %31, %cst_80 {dimension_numbers = #tpu.dot_dimension_numbers<[1], [0], [0], [1], [0, 0, 1, 1], [], []>} : vector<8x32xf32>, vector<32x2xf32>, vector<8x2xf32> -> vector<8x2xf32>
    %224 = vector.broadcast %32 : vector<1x2xf32> to vector<8x2xf32>
    %225 = arith.addf %223, %224 : vector<8x2xf32>
    %c4 = arith.constant 4 : index
    %c0_81 = arith.constant 0 : index
    %c0_82 = arith.constant 0 : index
    %226 = vector.load %arg4[%c4, %c0_81, %c0_82] : memref<8x8x1xf32, #tpu.memory_space<vmem>>, vector<1x8x1xf32>
    %227 = vector.shape_cast %226 : vector<1x8x1xf32> to vector<8x1xf32>
    %228 = vector.extract_strided_slice %225 {offsets = [0, 0], sizes = [8, 1], strides = [1, 1]} : vector<8x2xf32> to vector<8x1xf32>
    %229 = vector.broadcast %228 : vector<8x1xf32> to vector<8x32xf32>
    %230 = vector.broadcast %22 : vector<1x32xf32> to vector<8x32xf32>
    %231 = arith.mulf %229, %230 : vector<8x32xf32>
    %232 = vector.extract_strided_slice %225 {offsets = [0, 1], sizes = [8, 1], strides = [1, 1]} : vector<8x2xf32> to vector<8x1xf32>
    %233 = vector.broadcast %232 : vector<8x1xf32> to vector<8x32xf32>
    %234 = vector.broadcast %23 : vector<1x32xf32> to vector<8x32xf32>
    %235 = arith.mulf %233, %234 : vector<8x32xf32>
    %236 = arith.addf %231, %235 : vector<8x32xf32>
    %237 = vector.broadcast %227 : vector<8x1xf32> to vector<8x32xf32>
    %238 = vector.broadcast %24 : vector<1x32xf32> to vector<8x32xf32>
    %239 = arith.mulf %237, %238 : vector<8x32xf32>
    %240 = arith.addf %236, %239 : vector<8x32xf32>
    %241 = vector.broadcast %25 : vector<1x32xf32> to vector<8x32xf32>
    %242 = arith.addf %240, %241 : vector<8x32xf32>
    %cst_83 = arith.constant 0.000000e+00 : f32
    %243 = vector.broadcast %cst_83 : f32 to vector<8x32xf32>
    %244 = arith.cmpf oge, %242, %243 : vector<8x32xf32>
    %cst_84 = arith.constant 0.00999999977 : f32
    %245 = vector.broadcast %cst_84 : f32 to vector<8x32xf32>
    %246 = arith.mulf %245, %242 : vector<8x32xf32>
    %247 = arith.select %244, %242, %246 : vector<8x32xi1>, vector<8x32xf32>
    %cst_85 = arith.constant dense<0.000000e+00> : vector<8x16xf32>
    %248 = tpu.matmul %247, %26, %cst_85 {dimension_numbers = #tpu.dot_dimension_numbers<[1], [0], [0], [1], [0, 0, 1, 1], [], []>} : vector<8x32xf32>, vector<32x16xf32>, vector<8x16xf32> -> vector<8x16xf32>
    %249 = vector.broadcast %27 : vector<1x16xf32> to vector<8x16xf32>
    %250 = arith.addf %248, %249 : vector<8x16xf32>
    %cst_86 = arith.constant dense<0.000000e+00> : vector<8x128xf32>
    %251 = tpu.matmul %250, %28, %cst_86 {dimension_numbers = #tpu.dot_dimension_numbers<[1], [0], [0], [1], [0, 0, 1, 1], [], []>} : vector<8x16xf32>, vector<16x128xf32>, vector<8x128xf32> -> vector<8x128xf32>
    %cst_87 = arith.constant dense<0.000000e+00> : vector<8x128xf32>
    %252 = tpu.matmul %222, %29, %cst_87 {dimension_numbers = #tpu.dot_dimension_numbers<[1], [0], [0], [1], [0, 0, 1, 1], [], []>} : vector<8x32xf32>, vector<32x128xf32>, vector<8x128xf32> -> vector<8x128xf32>
    %253 = arith.addf %251, %252 : vector<8x128xf32>
    %254 = vector.broadcast %30 : vector<1x128xf32> to vector<8x128xf32>
    %255 = arith.addf %253, %254 : vector<8x128xf32>
    %256 = arith.negf %255 : vector<8x128xf32>
    %257 = math.exp %256 : vector<8x128xf32>
    %cst_88 = arith.constant 1.000000e+00 : f32
    %258 = vector.broadcast %cst_88 : f32 to vector<8x128xf32>
    %259 = arith.addf %258, %257 : vector<8x128xf32>
    %260 = arith.divf %258, %259 : vector<8x128xf32>
    %261 = vector.extract_strided_slice %260 {offsets = [0, 0], sizes = [8, 32], strides = [1, 1]} : vector<8x128xf32> to vector<8x32xf32>
    %262 = vector.extract_strided_slice %260 {offsets = [0, 32], sizes = [8, 32], strides = [1, 1]} : vector<8x128xf32> to vector<8x32xf32>
    %263 = vector.extract_strided_slice %260 {offsets = [0, 64], sizes = [8, 32], strides = [1, 1]} : vector<8x128xf32> to vector<8x32xf32>
    %264 = vector.extract_strided_slice %255 {offsets = [0, 96], sizes = [8, 32], strides = [1, 1]} : vector<8x128xf32> to vector<8x32xf32>
    %265 = math.tanh %264 : vector<8x32xf32>
    %266 = arith.mulf %262, %220 : vector<8x32xf32>
    %267 = arith.mulf %261, %265 : vector<8x32xf32>
    %268 = arith.addf %266, %267 : vector<8x32xf32>
    %269 = math.tanh %268 : vector<8x32xf32>
    %270 = arith.mulf %263, %269 : vector<8x32xf32>
    %cst_89 = arith.constant dense<0.000000e+00> : vector<8x2xf32>
    %271 = tpu.matmul %270, %31, %cst_89 {dimension_numbers = #tpu.dot_dimension_numbers<[1], [0], [0], [1], [0, 0, 1, 1], [], []>} : vector<8x32xf32>, vector<32x2xf32>, vector<8x2xf32> -> vector<8x2xf32>
    %272 = vector.broadcast %32 : vector<1x2xf32> to vector<8x2xf32>
    %273 = arith.addf %271, %272 : vector<8x2xf32>
    %c5 = arith.constant 5 : index
    %c0_90 = arith.constant 0 : index
    %c0_91 = arith.constant 0 : index
    %274 = vector.load %arg4[%c5, %c0_90, %c0_91] : memref<8x8x1xf32, #tpu.memory_space<vmem>>, vector<1x8x1xf32>
    %275 = vector.shape_cast %274 : vector<1x8x1xf32> to vector<8x1xf32>
    %276 = vector.extract_strided_slice %273 {offsets = [0, 0], sizes = [8, 1], strides = [1, 1]} : vector<8x2xf32> to vector<8x1xf32>
    %277 = vector.broadcast %276 : vector<8x1xf32> to vector<8x32xf32>
    %278 = vector.broadcast %22 : vector<1x32xf32> to vector<8x32xf32>
    %279 = arith.mulf %277, %278 : vector<8x32xf32>
    %280 = vector.extract_strided_slice %273 {offsets = [0, 1], sizes = [8, 1], strides = [1, 1]} : vector<8x2xf32> to vector<8x1xf32>
    %281 = vector.broadcast %280 : vector<8x1xf32> to vector<8x32xf32>
    %282 = vector.broadcast %23 : vector<1x32xf32> to vector<8x32xf32>
    %283 = arith.mulf %281, %282 : vector<8x32xf32>
    %284 = arith.addf %279, %283 : vector<8x32xf32>
    %285 = vector.broadcast %275 : vector<8x1xf32> to vector<8x32xf32>
    %286 = vector.broadcast %24 : vector<1x32xf32> to vector<8x32xf32>
    %287 = arith.mulf %285, %286 : vector<8x32xf32>
    %288 = arith.addf %284, %287 : vector<8x32xf32>
    %289 = vector.broadcast %25 : vector<1x32xf32> to vector<8x32xf32>
    %290 = arith.addf %288, %289 : vector<8x32xf32>
    %cst_92 = arith.constant 0.000000e+00 : f32
    %291 = vector.broadcast %cst_92 : f32 to vector<8x32xf32>
    %292 = arith.cmpf oge, %290, %291 : vector<8x32xf32>
    %cst_93 = arith.constant 0.00999999977 : f32
    %293 = vector.broadcast %cst_93 : f32 to vector<8x32xf32>
    %294 = arith.mulf %293, %290 : vector<8x32xf32>
    %295 = arith.select %292, %290, %294 : vector<8x32xi1>, vector<8x32xf32>
    %cst_94 = arith.constant dense<0.000000e+00> : vector<8x16xf32>
    %296 = tpu.matmul %295, %26, %cst_94 {dimension_numbers = #tpu.dot_dimension_numbers<[1], [0], [0], [1], [0, 0, 1, 1], [], []>} : vector<8x32xf32>, vector<32x16xf32>, vector<8x16xf32> -> vector<8x16xf32>
    %297 = vector.broadcast %27 : vector<1x16xf32> to vector<8x16xf32>
    %298 = arith.addf %296, %297 : vector<8x16xf32>
    %cst_95 = arith.constant dense<0.000000e+00> : vector<8x128xf32>
    %299 = tpu.matmul %298, %28, %cst_95 {dimension_numbers = #tpu.dot_dimension_numbers<[1], [0], [0], [1], [0, 0, 1, 1], [], []>} : vector<8x16xf32>, vector<16x128xf32>, vector<8x128xf32> -> vector<8x128xf32>
    %cst_96 = arith.constant dense<0.000000e+00> : vector<8x128xf32>
    %300 = tpu.matmul %270, %29, %cst_96 {dimension_numbers = #tpu.dot_dimension_numbers<[1], [0], [0], [1], [0, 0, 1, 1], [], []>} : vector<8x32xf32>, vector<32x128xf32>, vector<8x128xf32> -> vector<8x128xf32>
    %301 = arith.addf %299, %300 : vector<8x128xf32>
    %302 = vector.broadcast %30 : vector<1x128xf32> to vector<8x128xf32>
    %303 = arith.addf %301, %302 : vector<8x128xf32>
    %304 = arith.negf %303 : vector<8x128xf32>
    %305 = math.exp %304 : vector<8x128xf32>
    %cst_97 = arith.constant 1.000000e+00 : f32
    %306 = vector.broadcast %cst_97 : f32 to vector<8x128xf32>
    %307 = arith.addf %306, %305 : vector<8x128xf32>
    %308 = arith.divf %306, %307 : vector<8x128xf32>
    %309 = vector.extract_strided_slice %308 {offsets = [0, 0], sizes = [8, 32], strides = [1, 1]} : vector<8x128xf32> to vector<8x32xf32>
    %310 = vector.extract_strided_slice %308 {offsets = [0, 32], sizes = [8, 32], strides = [1, 1]} : vector<8x128xf32> to vector<8x32xf32>
    %311 = vector.extract_strided_slice %308 {offsets = [0, 64], sizes = [8, 32], strides = [1, 1]} : vector<8x128xf32> to vector<8x32xf32>
    %312 = vector.extract_strided_slice %303 {offsets = [0, 96], sizes = [8, 32], strides = [1, 1]} : vector<8x128xf32> to vector<8x32xf32>
    %313 = math.tanh %312 : vector<8x32xf32>
    %314 = arith.mulf %310, %268 : vector<8x32xf32>
    %315 = arith.mulf %309, %313 : vector<8x32xf32>
    %316 = arith.addf %314, %315 : vector<8x32xf32>
    %317 = math.tanh %316 : vector<8x32xf32>
    %318 = arith.mulf %311, %317 : vector<8x32xf32>
    %cst_98 = arith.constant dense<0.000000e+00> : vector<8x2xf32>
    %319 = tpu.matmul %318, %31, %cst_98 {dimension_numbers = #tpu.dot_dimension_numbers<[1], [0], [0], [1], [0, 0, 1, 1], [], []>} : vector<8x32xf32>, vector<32x2xf32>, vector<8x2xf32> -> vector<8x2xf32>
    %320 = vector.broadcast %32 : vector<1x2xf32> to vector<8x2xf32>
    %321 = arith.addf %319, %320 : vector<8x2xf32>
    %c6 = arith.constant 6 : index
    %c0_99 = arith.constant 0 : index
    %c0_100 = arith.constant 0 : index
    %322 = vector.load %arg4[%c6, %c0_99, %c0_100] : memref<8x8x1xf32, #tpu.memory_space<vmem>>, vector<1x8x1xf32>
    %323 = vector.shape_cast %322 : vector<1x8x1xf32> to vector<8x1xf32>
    %324 = vector.extract_strided_slice %321 {offsets = [0, 0], sizes = [8, 1], strides = [1, 1]} : vector<8x2xf32> to vector<8x1xf32>
    %325 = vector.broadcast %324 : vector<8x1xf32> to vector<8x32xf32>
    %326 = vector.broadcast %22 : vector<1x32xf32> to vector<8x32xf32>
    %327 = arith.mulf %325, %326 : vector<8x32xf32>
    %328 = vector.extract_strided_slice %321 {offsets = [0, 1], sizes = [8, 1], strides = [1, 1]} : vector<8x2xf32> to vector<8x1xf32>
    %329 = vector.broadcast %328 : vector<8x1xf32> to vector<8x32xf32>
    %330 = vector.broadcast %23 : vector<1x32xf32> to vector<8x32xf32>
    %331 = arith.mulf %329, %330 : vector<8x32xf32>
    %332 = arith.addf %327, %331 : vector<8x32xf32>
    %333 = vector.broadcast %323 : vector<8x1xf32> to vector<8x32xf32>
    %334 = vector.broadcast %24 : vector<1x32xf32> to vector<8x32xf32>
    %335 = arith.mulf %333, %334 : vector<8x32xf32>
    %336 = arith.addf %332, %335 : vector<8x32xf32>
    %337 = vector.broadcast %25 : vector<1x32xf32> to vector<8x32xf32>
    %338 = arith.addf %336, %337 : vector<8x32xf32>
    %cst_101 = arith.constant 0.000000e+00 : f32
    %339 = vector.broadcast %cst_101 : f32 to vector<8x32xf32>
    %340 = arith.cmpf oge, %338, %339 : vector<8x32xf32>
    %cst_102 = arith.constant 0.00999999977 : f32
    %341 = vector.broadcast %cst_102 : f32 to vector<8x32xf32>
    %342 = arith.mulf %341, %338 : vector<8x32xf32>
    %343 = arith.select %340, %338, %342 : vector<8x32xi1>, vector<8x32xf32>
    %cst_103 = arith.constant dense<0.000000e+00> : vector<8x16xf32>
    %344 = tpu.matmul %343, %26, %cst_103 {dimension_numbers = #tpu.dot_dimension_numbers<[1], [0], [0], [1], [0, 0, 1, 1], [], []>} : vector<8x32xf32>, vector<32x16xf32>, vector<8x16xf32> -> vector<8x16xf32>
    %345 = vector.broadcast %27 : vector<1x16xf32> to vector<8x16xf32>
    %346 = arith.addf %344, %345 : vector<8x16xf32>
    %cst_104 = arith.constant dense<0.000000e+00> : vector<8x128xf32>
    %347 = tpu.matmul %346, %28, %cst_104 {dimension_numbers = #tpu.dot_dimension_numbers<[1], [0], [0], [1], [0, 0, 1, 1], [], []>} : vector<8x16xf32>, vector<16x128xf32>, vector<8x128xf32> -> vector<8x128xf32>
    %cst_105 = arith.constant dense<0.000000e+00> : vector<8x128xf32>
    %348 = tpu.matmul %318, %29, %cst_105 {dimension_numbers = #tpu.dot_dimension_numbers<[1], [0], [0], [1], [0, 0, 1, 1], [], []>} : vector<8x32xf32>, vector<32x128xf32>, vector<8x128xf32> -> vector<8x128xf32>
    %349 = arith.addf %347, %348 : vector<8x128xf32>
    %350 = vector.broadcast %30 : vector<1x128xf32> to vector<8x128xf32>
    %351 = arith.addf %349, %350 : vector<8x128xf32>
    %352 = arith.negf %351 : vector<8x128xf32>
    %353 = math.exp %352 : vector<8x128xf32>
    %cst_106 = arith.constant 1.000000e+00 : f32
    %354 = vector.broadcast %cst_106 : f32 to vector<8x128xf32>
    %355 = arith.addf %354, %353 : vector<8x128xf32>
    %356 = arith.divf %354, %355 : vector<8x128xf32>
    %357 = vector.extract_strided_slice %356 {offsets = [0, 0], sizes = [8, 32], strides = [1, 1]} : vector<8x128xf32> to vector<8x32xf32>
    %358 = vector.extract_strided_slice %356 {offsets = [0, 32], sizes = [8, 32], strides = [1, 1]} : vector<8x128xf32> to vector<8x32xf32>
    %359 = vector.extract_strided_slice %356 {offsets = [0, 64], sizes = [8, 32], strides = [1, 1]} : vector<8x128xf32> to vector<8x32xf32>
    %360 = vector.extract_strided_slice %351 {offsets = [0, 96], sizes = [8, 32], strides = [1, 1]} : vector<8x128xf32> to vector<8x32xf32>
    %361 = math.tanh %360 : vector<8x32xf32>
    %362 = arith.mulf %358, %316 : vector<8x32xf32>
    %363 = arith.mulf %357, %361 : vector<8x32xf32>
    %364 = arith.addf %362, %363 : vector<8x32xf32>
    %365 = math.tanh %364 : vector<8x32xf32>
    %366 = arith.mulf %359, %365 : vector<8x32xf32>
    %cst_107 = arith.constant dense<0.000000e+00> : vector<8x2xf32>
    %367 = tpu.matmul %366, %31, %cst_107 {dimension_numbers = #tpu.dot_dimension_numbers<[1], [0], [0], [1], [0, 0, 1, 1], [], []>} : vector<8x32xf32>, vector<32x2xf32>, vector<8x2xf32> -> vector<8x2xf32>
    %368 = vector.broadcast %32 : vector<1x2xf32> to vector<8x2xf32>
    %369 = arith.addf %367, %368 : vector<8x2xf32>
    %c7 = arith.constant 7 : index
    %c0_108 = arith.constant 0 : index
    %c0_109 = arith.constant 0 : index
    %370 = vector.load %arg4[%c7, %c0_108, %c0_109] : memref<8x8x1xf32, #tpu.memory_space<vmem>>, vector<1x8x1xf32>
    %371 = vector.shape_cast %370 : vector<1x8x1xf32> to vector<8x1xf32>
    %372 = vector.extract_strided_slice %369 {offsets = [0, 0], sizes = [8, 1], strides = [1, 1]} : vector<8x2xf32> to vector<8x1xf32>
    %373 = vector.broadcast %372 : vector<8x1xf32> to vector<8x32xf32>
    %374 = vector.broadcast %22 : vector<1x32xf32> to vector<8x32xf32>
    %375 = arith.mulf %373, %374 : vector<8x32xf32>
    %376 = vector.extract_strided_slice %369 {offsets = [0, 1], sizes = [8, 1], strides = [1, 1]} : vector<8x2xf32> to vector<8x1xf32>
    %377 = vector.broadcast %376 : vector<8x1xf32> to vector<8x32xf32>
    %378 = vector.broadcast %23 : vector<1x32xf32> to vector<8x32xf32>
    %379 = arith.mulf %377, %378 : vector<8x32xf32>
    %380 = arith.addf %375, %379 : vector<8x32xf32>
    %381 = vector.broadcast %371 : vector<8x1xf32> to vector<8x32xf32>
    %382 = vector.broadcast %24 : vector<1x32xf32> to vector<8x32xf32>
    %383 = arith.mulf %381, %382 : vector<8x32xf32>
    %384 = arith.addf %380, %383 : vector<8x32xf32>
    %385 = vector.broadcast %25 : vector<1x32xf32> to vector<8x32xf32>
    %386 = arith.addf %384, %385 : vector<8x32xf32>
    %cst_110 = arith.constant 0.000000e+00 : f32
    %387 = vector.broadcast %cst_110 : f32 to vector<8x32xf32>
    %388 = arith.cmpf oge, %386, %387 : vector<8x32xf32>
    %cst_111 = arith.constant 0.00999999977 : f32
    %389 = vector.broadcast %cst_111 : f32 to vector<8x32xf32>
    %390 = arith.mulf %389, %386 : vector<8x32xf32>
    %391 = arith.select %388, %386, %390 : vector<8x32xi1>, vector<8x32xf32>
    %cst_112 = arith.constant dense<0.000000e+00> : vector<8x16xf32>
    %392 = tpu.matmul %391, %26, %cst_112 {dimension_numbers = #tpu.dot_dimension_numbers<[1], [0], [0], [1], [0, 0, 1, 1], [], []>} : vector<8x32xf32>, vector<32x16xf32>, vector<8x16xf32> -> vector<8x16xf32>
    %393 = vector.broadcast %27 : vector<1x16xf32> to vector<8x16xf32>
    %394 = arith.addf %392, %393 : vector<8x16xf32>
    %cst_113 = arith.constant dense<0.000000e+00> : vector<8x128xf32>
    %395 = tpu.matmul %394, %28, %cst_113 {dimension_numbers = #tpu.dot_dimension_numbers<[1], [0], [0], [1], [0, 0, 1, 1], [], []>} : vector<8x16xf32>, vector<16x128xf32>, vector<8x128xf32> -> vector<8x128xf32>
    %cst_114 = arith.constant dense<0.000000e+00> : vector<8x128xf32>
    %396 = tpu.matmul %366, %29, %cst_114 {dimension_numbers = #tpu.dot_dimension_numbers<[1], [0], [0], [1], [0, 0, 1, 1], [], []>} : vector<8x32xf32>, vector<32x128xf32>, vector<8x128xf32> -> vector<8x128xf32>
    %397 = arith.addf %395, %396 : vector<8x128xf32>
    %398 = vector.broadcast %30 : vector<1x128xf32> to vector<8x128xf32>
    %399 = arith.addf %397, %398 : vector<8x128xf32>
    %400 = arith.negf %399 : vector<8x128xf32>
    %401 = math.exp %400 : vector<8x128xf32>
    %cst_115 = arith.constant 1.000000e+00 : f32
    %402 = vector.broadcast %cst_115 : f32 to vector<8x128xf32>
    %403 = arith.addf %402, %401 : vector<8x128xf32>
    %404 = arith.divf %402, %403 : vector<8x128xf32>
    %405 = vector.extract_strided_slice %404 {offsets = [0, 0], sizes = [8, 32], strides = [1, 1]} : vector<8x128xf32> to vector<8x32xf32>
    %406 = vector.extract_strided_slice %404 {offsets = [0, 32], sizes = [8, 32], strides = [1, 1]} : vector<8x128xf32> to vector<8x32xf32>
    %407 = vector.extract_strided_slice %404 {offsets = [0, 64], sizes = [8, 32], strides = [1, 1]} : vector<8x128xf32> to vector<8x32xf32>
    %408 = vector.extract_strided_slice %399 {offsets = [0, 96], sizes = [8, 32], strides = [1, 1]} : vector<8x128xf32> to vector<8x32xf32>
    %409 = math.tanh %408 : vector<8x32xf32>
    %410 = arith.mulf %406, %364 : vector<8x32xf32>
    %411 = arith.mulf %405, %409 : vector<8x32xf32>
    %412 = arith.addf %410, %411 : vector<8x32xf32>
    %413 = math.tanh %412 : vector<8x32xf32>
    %414 = arith.mulf %407, %413 : vector<8x32xf32>
    %cst_116 = arith.constant dense<0.000000e+00> : vector<8x2xf32>
    %415 = tpu.matmul %414, %31, %cst_116 {dimension_numbers = #tpu.dot_dimension_numbers<[1], [0], [0], [1], [0, 0, 1, 1], [], []>} : vector<8x32xf32>, vector<32x2xf32>, vector<8x2xf32> -> vector<8x2xf32>
    %416 = vector.broadcast %32 : vector<1x2xf32> to vector<8x2xf32>
    %417 = arith.addf %415, %416 : vector<8x2xf32>
    %418 = vector.shape_cast %81 : vector<8x2xf32> to vector<1x8x2xf32>
    %419 = vector.shape_cast %129 : vector<8x2xf32> to vector<1x8x2xf32>
    %420 = vector.shape_cast %177 : vector<8x2xf32> to vector<1x8x2xf32>
    %421 = vector.shape_cast %225 : vector<8x2xf32> to vector<1x8x2xf32>
    %422 = vector.shape_cast %273 : vector<8x2xf32> to vector<1x8x2xf32>
    %423 = vector.shape_cast %321 : vector<8x2xf32> to vector<1x8x2xf32>
    %424 = vector.shape_cast %369 : vector<8x2xf32> to vector<1x8x2xf32>
    %425 = vector.shape_cast %417 : vector<8x2xf32> to vector<1x8x2xf32>
    %426 = tpu.concatenate %418, %419, %420, %421, %422, %423, %424, %425 in 0 : vector<1x8x2xf32>, vector<1x8x2xf32>, vector<1x8x2xf32>, vector<1x8x2xf32>, vector<1x8x2xf32>, vector<1x8x2xf32>, vector<1x8x2xf32>, vector<1x8x2xf32> -> vector<8x8x2xf32>
    %c0_117 = arith.constant 0 : index
    %c0_118 = arith.constant 0 : index
    %c0_119 = arith.constant 0 : index
    %427 = vector.load %arg20[%c0_117, %c0_118, %c0_119] : memref<8x8x2xf32, #tpu.memory_space<vmem>>, vector<8x8x2xf32>
    tpu.vector_store %arg20[%c0_117, %c0_118, %c0_119], %426 {strides = array<i32>} : memref<8x8x2xf32, #tpu.memory_space<vmem>>, vector<8x8x2xf32>,
    return
  }
}

</mosaic_0001>

<bundles_post_ra>
// kernel: _lambda_.3
= control target key start
LH: loop header
LB: loop body
LE: loop exit
PB: predicated region body
PF: predicated region fallthrough
CT: control target
= control target key end

     0   :  { %v1654_v0 = vmov 1   ;;  %v1655_v1 = vmov 0   ;;  %vm270_vm1 = vcmask 261120   ;;  %vm1657_vm9 = vmmov 0   ;;  %s1659_s27 = smov 64   ;;  %s2017_s0 = inlined_call_operand.vmem [shape: f32[64,2], index: 0, kind: input, shape index: {}]   ;;  %s2018_s1 = inlined_call_operand.vmem [shape: f32[64,1], index: 1, kind: input, shape index: {}]   ;;  %s2019_s5 = inlined_call_operand.vmem [shape: f32[32,16], index: 5, kind: input, shape index: {}]   ;;  %s2020_s2 = inlined_call_operand.vmem [shape: f32[2,32], index: 2, kind: input, shape index: {}]   ;;  %s2021_s3 = inlined_call_operand.vmem [shape: f32[1,32], index: 3, kind: input, shape index: {}]   ;;  %s2022_s4 = inlined_call_operand.vmem [shape: f32[1,32], index: 4, kind: input, shape index: {}]   ;;  %s2023_s7 = inlined_call_operand.vmem [shape: f32[16,128], index: 7, kind: input, shape index: {}]   ;;  %s2024_s8 = inlined_call_operand.vmem [shape: f32[32,128], index: 8, kind: input, shape index: {}]   ;;  %s2025_s6 = inlined_call_operand.vmem [shape: f32[1,16], index: 6, kind: input, shape index: {}]   ;;  %s2026_s9 = inlined_call_operand.vmem [shape: f32[1,128], index: 9, kind: input, shape index: {}]   ;;  %s2027_s10 = inlined_call_operand.vmem [shape: f32[8,32], index: 10, kind: output, shape index: {}]  }
   0x1   :  { %1579 = vset.pattern.permute.xlu0 %v1654_v0  ;;  %1581 = vset.pattern.permute.xlu1 %v1655_v1  ;;  %v36_v2 = vld [vmem:[%s2017_s0 + $0x8] sm:$0xff]  ;;  %v35_v3 = vld [vmem:[%s2017_s0] sm:$0xff]  ;;  %v262_v6 = vld [vmem:[%s2019_s5 + $0x18] sm:$0xff]  ;;  %vm409_vm10 = vcmask 130048  }
   0x2   :  { %59 = vperm.xlu1 %1581, %v36_v2   ;;  %106 = vperm.xlu0 %1579, %v35_v3   ;;  %v44_v4 = vld [vmem:[%s2018_s1 + $0x8] sm:$0xff]  ;;  %v43_v5 = vld [vmem:[%s2018_s1] sm:$0xff]  ;;  %v261_v7 = vld [vmem:[%s2019_s5 + $0x10] sm:$0xff] }
   0x3   :  { %1449 = vmatprep.subr.mxu0 %v262_v6  ;;  %v38_v8 = vld [vmem:[%s2017_s0 + $0x18] sm:$0xff]  ;;  %v260_v9 = vld [vmem:[%s2019_s5 + $0x8] sm:$0xff]  ;;  %v37_v10 = vld [vmem:[%s2017_s0 + $0x10] sm:$0xff] }
   0x4   :  { %1450 = vmatpush3.msra.mxu0 %v262_v6  ;;  %v259_v11 = vld [vmem:[%s2019_s5] sm:$0xff]  ;;  %v45_v12 = vld [vmem:[%s2018_s1 + $0x10] sm:$0xff]  ;;  %v40_v14 = vld [vmem:[%s2017_s0 + $0x28] sm:$0xff] }
   0x5   :  { %1451 = vmatprep.subr.mxu0 %v261_v7  ;;  %v39_v13 = vld [vmem:[%s2017_s0 + $0x20] sm:$0xff]  ;;  %v46_v15 = vld [vmem:[%s2018_s1 + $0x18] sm:$0xff]  ;;  %v41_v17 = vld [vmem:[%s2017_s0 + $0x30] sm:$0xff] }
   0x6   :  { %1582 = vset.pattern.permute.xlu1 %v1654_v0  ;;  %1580 = vset.pattern.permute.xlu0 %v1655_v1  ;;  %v47_v16 = vld [vmem:[%s2018_s1 + $0x20] sm:$0xff]  ;;  %v42_v18 = vld [vmem:[%s2017_s0 + $0x38] sm:$0xff]  ;;  %v49_v19 = vld [vmem:[%s2018_s1 + $0x30] sm:$0xff] }
   0x7   :  { %110 = vperm.xlu1 %1582, %v36_v2   ;;  %54 = vperm.xlu0 %1580, %v35_v3   ;;  %v48_v20 = vld [vmem:[%s2018_s1 + $0x28] sm:$0xff]  ;;  %v50_v21 = vld [vmem:[%s2018_s1 + $0x38] sm:$0xff]  ;;  %v1778_v24 = vld [vmem:[%s2020_s2 + $0x1] ss:$0 sm:$0xff] }
   0x8   :  { %1452 = vmatpush3.msra.mxu0 %v261_v7  ;;  %v1783_v25 = vld [vmem:[%s2020_s2] ss:$0 sm:$0xff] }
   0x9   :  { %1453 = vmatprep.subr.mxu0 %v260_v9  ;;  %v1791_v31 = vld [vmem:[%s2021_s3] ss:$0 sm:$0xff] }
   0xa   :  { %1454 = vmatpush3.msra.mxu0 %v260_v9  ;;  %v1798_v38 = vld [vmem:[%s2022_s4] ss:$0 sm:$0xff] }
   0xb   :  { %1583 = vset.pattern.permute.xlu1 %v1655_v1  ;;  %165 = vperm.xlu0 %1580, %v44_v4  }
   0xc   :  { %160 = vperm.xlu1 %1583, %v43_v5   ;;  %1455 = vmatprep.subr.mxu0 %v259_v11 }
   0xd   :  { %1456 = vmatpush3.msra.mxu0 %v259_v11 }
   0xf   :  { %69 = vperm.xlu0 %1580, %v38_v8  }
  0x10   :  { %64 = vperm.xlu1 %1583, %v37_v10  }
  0x13   :  { %170 = vperm.xlu0 %1580, %v45_v12  }
  0x14   :  { %1584 = vset.pattern.permute.xlu1 %v1654_v0 }
  0x15   :  { %114 = vperm.xlu1 %1584, %v37_v10  }
  0x17   :  { %74 = vperm.xlu0 %1580, %v39_v13  }
  0x19   :  { %118 = vperm.xlu1 %1584, %v38_v8  }
  0x1b   :  { %79 = vperm.xlu0 %1580, %v40_v14  }
  0x1d   :  { %1585 = vset.pattern.permute.xlu1 %v1655_v1 }
  0x1e   :  { %175 = vperm.xlu1 %1585, %v46_v15  }
  0x1f   :  { %180 = vperm.xlu0 %1580, %v47_v16  }
  0x22   :  { %1586 = vset.pattern.permute.xlu1 %v1654_v0 }
  0x23   :  { %122 = vperm.xlu1 %1586, %v39_v13   ;;  %84 = vperm.xlu0 %1580, %v41_v17  }
  0x27   :  { %126 = vperm.xlu1 %1586, %v40_v14   ;;  %89 = vperm.xlu0 %1580, %v42_v18  }
  0x2b   :  { %1587 = vset.pattern.permute.xlu1 %v1655_v1  ;;  %190 = vperm.xlu0 %1580, %v49_v19  }
  0x2c   :  { %185 = vperm.xlu1 %1587, %v48_v20  }
  0x30   :  { %1588 = vset.pattern.permute.xlu1 %v1654_v0 }
  0x31   :  { %130 = vperm.xlu1 %1588, %v41_v17  }
  0x35   :  { %134 = vperm.xlu1 %1588, %v42_v18  }
  0x39   :  { %1589 = vset.pattern.permute.xlu1 %v1655_v1 }
  0x3a   :  { %195 = vperm.xlu1 %1589, %v50_v21  }
  0x7d   :  { %v60_v22 = vpop.permute.xlu1 %59  ;;  %v107_v23 = vpop.permute.xlu0 %106 }
  0x7e   :  { %v141_v26 = vmul.f32 %v1778_v24, %v107_v23  ;;  %v97_v32 = vmul.f32 %v1783_v25, %v60_v22 }
  0x82   :  { %v111_v27 = vpop.permute.xlu1 %110  ;;  %v55_v28 = vpop.permute.xlu0 %54 }
  0x83   :  { %v142_v29 = vmul.f32 %v1778_v24, %v111_v27  ;;  %v96_v30 = vmul.f32 %v1783_v25, %v55_v28 }
  0x85   :  { %v149_v33 = vadd.f32 %v141_v26, %v96_v30  ;;  %v150_v35 = vadd.f32 %v142_v29, %v97_v32 }
  0x86   :  { %v166_v34 = vpop.permute.xlu0 %165 }
  0x87   :  { %v205_v36 = vmul.f32 %v1791_v31, %v166_v34  ;;  %v161_v37 = vpop.permute.xlu1 %160 }
  0x88   :  { %v204_v39 = vmul.f32 %v1791_v31, %v161_v37 }
  0x89   :  { %v213_v40 = vadd.f32 %v205_v36, %v150_v35 }
  0x8a   :  { %v212_v41 = vadd.f32 %v204_v39, %v149_v33  ;;  %v70_v42 = vpop.permute.xlu0 %69 }
  0x8b   :  { %v228_v43 = vadd.f32 %v1798_v38, %v213_v40  ;;  %v65_v44 = vpop.permute.xlu1 %64  ;;  %v99_v62 = vmul.f32 %v1783_v25, %v70_v42 }
  0x8c   :  { %v227_v45 = vadd.f32 %v1798_v38, %v212_v41  ;;  %v98_v51 = vmul.f32 %v1783_v25, %v65_v44 }
  0x8d   :  { %v244_v46 = vmul.f32 0.01, %v228_v43  ;;  %vm236_vm2 = vcmp.ge.f32.partialorder %v228_v43, 0.0 }
  0x8e   :  { %v171_v47 = vpop.permute.xlu0 %170  ;;  %vm235_vm0 = vcmp.ge.f32.partialorder %v227_v45, 0.0  ;;  %v243_v48 = vmul.f32 0.01, %v227_v45 }
  0x8f   :  { %v252_v53 = vsel %vm236_vm2, %v228_v43, %v244_v46  ;;  %v206_v55 = vmul.f32 %v1791_v31, %v171_v47 }
  0x90   :  { %v115_v49 = vpop.permute.xlu1 %114  ;;  %v251_v50 = vsel %vm235_vm0, %v227_v45, %v243_v48 }
  0x91   :  { %v143_v52 = vmul.f32 %v1778_v24, %v115_v49  ;;  %1457 = vmatprep.mubr.msk.f32.mxu0 %vm270_vm1, %v251_v50 }
  0x92   :  { %1458 = vmatmul.mubr.msk.f32.vlgmr.msra.gmra.mxu0 %vm270_vm1, %v252_v53  ;;  %v75_v54 = vpop.permute.xlu0 %74 }
  0x93   :  { %v151_v56 = vadd.f32 %v143_v52, %v98_v51  ;;  %v100_v8 = vmul.f32 %v1783_v25, %v75_v54  ;;  %v1852_v54 = vld [vmem:[%s2024_s8 + $0x10] sm:$0xff] }
  0x94   :  { %v119_v57 = vpop.permute.xlu1 %118 }
  0x95   :  { %v214_v58 = vadd.f32 %v206_v55, %v151_v56  ;;  %v144_v59 = vmul.f32 %v1778_v24, %v119_v57  ;;  %v1860_v55 = vld [vmem:[%s2024_s8 + $0x8] sm:$0xff]  ;;  %v1867_v56 = vld [vmem:[%s2024_s8] sm:$0xff] }
  0x96   :  { %v80_v60 = vpop.permute.xlu0 %79 }
  0x97   :  { %v229_v61 = vadd.f32 %v1798_v38, %v214_v58  ;;  %v152_v1 = vadd.f32 %v144_v59, %v99_v62  ;;  %v101_v19 = vmul.f32 %v1783_v25, %v80_v60  ;;  %v1354_v58 = vld [vmem:[%s2025_s6] ss:$0 sm:$0xff] }
  0x99   :  { %v176_v63 = vpop.permute.xlu1 %175  ;;  %vm237_vm3 = vcmp.ge.f32.partialorder %v229_v61, 0.0  ;;  %v245_v0 = vmul.f32 0.01, %v229_v61 }
  0x9a   :  { %v207_v2 = vmul.f32 %v1791_v31, %v176_v63  ;;  %v181_v3 = vpop.permute.xlu0 %180 }
  0x9b   :  { %v253_v4 = vsel %vm237_vm3, %v229_v61, %v245_v0  ;;  %v208_v12 = vmul.f32 %v1791_v31, %v181_v3 }
  0x9c   :  { %v215_v5 = vadd.f32 %v207_v2, %v152_v1  ;;  %1460 = vmatprep.mubr.msk.f32.mxu0 %vm270_vm1, %v253_v4 }
  0x9e   :  { %v230_v6 = vadd.f32 %v1798_v38, %v215_v5  ;;  %v123_v7 = vpop.permute.xlu1 %122  ;;  %v85_v10 = vpop.permute.xlu0 %84 }
  0x9f   :  { %v145_v9 = vmul.f32 %v1778_v24, %v123_v7  ;;  %v102_v33 = vmul.f32 %v1783_v25, %v85_v10  ;;  %v1363_v10 = vld [vmem:[%s2026_s9] ss:$0 sm:$0xff]  ;;  %s1658_s9 = smov 32  }
  0xa0   :  { %vm238_vm4 = vcmp.ge.f32.partialorder %v230_v6, 0.0  ;;  %v246_v11 = vmul.f32 0.01, %v230_v6 }
  0xa1   :  { %v153_v13 = vadd.f32 %v145_v9, %v100_v8 }
  0xa2   :  { %v127_v14 = vpop.permute.xlu1 %126  ;;  %v254_v15 = vsel %vm238_vm4, %v230_v6, %v246_v11  ;;  %v90_v20 = vpop.permute.xlu0 %89 }
  0xa3   :  { %v216_v16 = vadd.f32 %v208_v12, %v153_v13  ;;  %1461 = vmatmul.mubr.msk.f32.gmra.mxu0 %vm270_vm1, %v254_v15  ;;  %v146_v17 = vmul.f32 %v1778_v24, %v127_v14  ;;  %v103_v44 = vmul.f32 %v1783_v25, %v90_v20  ;;  %v400_v25 = vld [vmem:[%s2023_s7] sm:$0xff] }
  0xa5   :  { %v231_v18 = vadd.f32 %v1798_v38, %v216_v16  ;;  %v154_v23 = vadd.f32 %v146_v17, %v101_v19 }
  0xa6   :  { %v191_v29 = vpop.permute.xlu0 %190 }
  0xa7   :  { %v186_v21 = vpop.permute.xlu1 %185  ;;  %vm239_vm5 = vcmp.ge.f32.partialorder %v231_v18, 0.0  ;;  %v247_v22 = vmul.f32 0.01, %v231_v18  ;;  %v210_v36 = vmul.f32 %v1791_v31, %v191_v29 }
  0xa8   :  { %v209_v26 = vmul.f32 %v1791_v31, %v186_v21 }
  0xa9   :  { %v255_v27 = vsel %vm239_vm5, %v231_v18, %v247_v22 }
  0xaa   :  { %v217_v28 = vadd.f32 %v209_v26, %v154_v23  ;;  %1463 = vmatprep.mubr.msk.f32.mxu0 %vm270_vm1, %v255_v27 }
  0xac   :  { %v232_v30 = vadd.f32 %v1798_v38, %v217_v28  ;;  %v131_v32 = vpop.permute.xlu1 %130 }
  0xad   :  { %v147_v34 = vmul.f32 %v1778_v24, %v131_v32 }
  0xae   :  { %vm240_vm6 = vcmp.ge.f32.partialorder %v232_v30, 0.0  ;;  %v248_v35 = vmul.f32 0.01, %v232_v30 }
  0xaf   :  { %v155_v37 = vadd.f32 %v147_v34, %v102_v33 }
  0xb0   :  { %v135_v39 = vpop.permute.xlu1 %134  ;;  %v256_v40 = vsel %vm240_vm6, %v232_v30, %v248_v35 }
  0xb1   :  { %v218_v41 = vadd.f32 %v210_v36, %v155_v37  ;;  %1464 = vmatmul.mubr.msk.f32.gmra.mxu0 %vm270_vm1, %v256_v40  ;;  %v148_v42 = vmul.f32 %v1778_v24, %v135_v39  ;;  %v401_v24 = vld [vmem:[%s2023_s7 + $0x8] sm:$0xff] }
  0xb2   :  { %1469 = vmatprep.subr.mxu1 %v401_v24 }
  0xb3   :  { %v233_v43 = vadd.f32 %v1798_v38, %v218_v41  ;;  %v156_v47 = vadd.f32 %v148_v42, %v103_v44  ;;  %1470 = vmatpush3.msra.mxu1 %v401_v24 }
  0xb4   :  { %1471 = vmatprep.subr.mxu1 %v400_v25 }
  0xb5   :  { %v196_v45 = vpop.permute.xlu1 %195  ;;  %vm241_vm7 = vcmp.ge.f32.partialorder %v233_v43, 0.0  ;;  %v249_v46 = vmul.f32 0.01, %v233_v43  ;;  %1472 = vmatpush3.msra.mxu1 %v400_v25 }
  0xb6   :  { %v211_v48 = vmul.f32 %v1791_v31, %v196_v45  ;;  %v1656_v31 = vmov 0.0  }
  0xb7   :  { %v257_v49 = vsel %vm241_vm7, %v233_v43, %v249_v46  ;;  %1485 = vmatprep.subr.mxu1 %v1656_v31  ;;  %1496 = vmatprep.subr.mxu0 %v1656_v31 }
  0xb8   :  { %v219_v50 = vadd.f32 %v211_v48, %v156_v47  ;;  %1466 = vmatprep.mubr.msk.f32.mxu0 %vm270_vm1, %v257_v49 }
  0xba   :  { %v234_v51 = vadd.f32 %v1798_v38, %v219_v50  ;;  %v1845_v38 = vld [vmem:[%s2024_s8 + $0x18] sm:$0xff] }
  0xbb   :  { %1497 = vmatpush3.msra.mxu0 %v1845_v38 }
  0xbc   :  { %vm242_vm8 = vcmp.ge.f32.partialorder %v234_v51, 0.0  ;;  %v250_v52 = vmul.f32 0.01, %v234_v51  ;;  %1498 = vmatprep.subr.mxu0 %v1656_v31 }
  0xbd   :  { %1499 = vmatpush3.msra.mxu0 %v1852_v54 }
  0xbe   :  { %v258_v53 = vsel %vm242_vm8, %v234_v51, %v250_v52  ;;  %1500 = vmatprep.subr.mxu0 %v1656_v31 }
  0xbf   :  { %1467 = vmatmul.mubr.msk.f32.gmra.mxu0 %vm270_vm1, %v258_v53 }
  0xc0   :  { %1501 = vmatpush3.msra.mxu0 %v1860_v55  ;;  %1504 = vmatprep.mubr.msk.f32.mxu0 %vm1657_vm9, %v1656_v31 }
  0xc1   :  { %1502 = vmatprep.subr.mxu0 %v1656_v31 }
  0xc2   :  { %1503 = vmatpush3.msra.mxu0 %v1867_v56 }
  0xc3   :  { %1518 = vmatprep.subr.mxu0 %v1656_v31 }
 0x152   :  { %v1459_v57 = vpop.f32.mrf.mxu0 }
 0x153   :  { %v367_v61 = vadd.f32 %v1459_v57, %v1354_v58 }
 0x154   :  { %v361_v59 = vpop.f32.mrf.mxu0 }
 0x155   :  { %v362_v60 = vadd.f32 %v1354_v58, %v361_v59 }
 0x157   :  { %1473 = vmatprep.mubr.msk.f32.mxu1 %vm409_vm10, %v362_v60 }
 0x158   :  { %1474 = vmatmul.mubr.msk.f32.vlgmr.msra.gmra.mxu1 %vm409_vm10, %v367_v61 }
 0x159   :  { %1486 = vmatpush3.msra.mxu1 %v1845_v38 }
 0x15a   :  { %1487 = vmatprep.subr.mxu1 %v1656_v31 }
 0x15b   :  { %1488 = vmatpush3.msra.mxu1 %v1852_v54 }
 0x15c   :  { %1489 = vmatprep.subr.mxu1 %v1656_v31 }
 0x15d   :  { %1490 = vmatpush3.msra.mxu1 %v1860_v55 }
 0x15e   :  { %1491 = vmatprep.subr.mxu1 %v1656_v31 }
 0x15f   :  { %1492 = vmatpush3.msra.mxu1 %v1867_v56 }
 0x160   :  { %1507 = vmatprep.subr.mxu1 %v1656_v31 }
 0x163   :  { %v1462_v62 = vpop.f32.mrf.mxu0 }
 0x164   :  { %v377_v1 = vadd.f32 %v1462_v62, %v1354_v58 }
 0x165   :  { %v371_v63 = vpop.f32.mrf.mxu0 }
 0x166   :  { %v372_v0 = vadd.f32 %v1354_v58, %v371_v63 }
 0x168   :  { %1476 = vmatprep.mubr.msk.f32.mxu1 %vm409_vm10, %v372_v0 }
 0x169   :  { %1477 = vmatmul.mubr.msk.f32.gmra.mxu1 %vm409_vm10, %v377_v1 }
 0x171   :  { %v1465_v2 = vpop.f32.mrf.mxu0 }
 0x172   :  { %v387_v5 = vadd.f32 %v1465_v2, %v1354_v58 }
 0x173   :  { %v381_v3 = vpop.f32.mrf.mxu0 }
 0x174   :  { %v382_v4 = vadd.f32 %v1354_v58, %v381_v3 }
 0x176   :  { %1479 = vmatprep.mubr.msk.f32.mxu1 %vm409_vm10, %v382_v4 }
 0x177   :  { %1480 = vmatmul.mubr.msk.f32.gmra.mxu1 %vm409_vm10, %v387_v5 }
 0x17f   :  { %v1468_v6 = vpop.f32.mrf.mxu0 }
 0x180   :  { %v397_v9 = vadd.f32 %v1468_v6, %v1354_v58 }
 0x181   :  { %v391_v7 = vpop.f32.mrf.mxu0 }
 0x182   :  { %v392_v8 = vadd.f32 %v1354_v58, %v391_v7 }
 0x184   :  { %1482 = vmatprep.mubr.msk.f32.mxu1 %vm409_vm10, %v392_v8 }
 0x185   :  { %1483 = vmatmul.mubr.msk.f32.gmra.mxu1 %vm409_vm10, %v397_v9 }
 0x186   :  { %1493 = vmatprep.mubr.msk.f32.mxu1 %vm1657_vm9, %v1656_v31 }
 0x189   :  { %1494 = vmatmul.mubr.f32.vlgmr.msra.gmra.mxu1 %v1656_v31 }
 0x18a   :  { %1508 = vmatpush3.msra.mxu1 %v1845_v38  ;;  %1515 = vmatprep.mubr.msk.f32.mxu1 %vm1657_vm9, %v1656_v31 }
 0x18b   :  { %1509 = vmatprep.subr.mxu1 %v1656_v31 }
 0x18c   :  { %1510 = vmatpush3.msra.mxu1 %v1852_v54 }
 0x18d   :  { %1511 = vmatprep.subr.mxu1 %v1656_v31 }
 0x18e   :  { %1512 = vmatpush3.msra.mxu1 %v1860_v55 }
 0x18f   :  { %1513 = vmatprep.subr.mxu1 %v1656_v31 }
 0x190   :  { %1514 = vmatpush3.msra.mxu1 %v1867_v56 }
 0x191   :  { %1529 = vmatprep.subr.mxu1 %v1656_v31 }
 0x218   :  { %v1475_v11 = vpop.f32.mrf.mxu1 }
 0x219   :  { %v506_v12 = vadd.f32 %v1475_v11, %v1363_v10 }
 0x21a   :  { %v500_v13 = vpop.f32.mrf.mxu1 }
 0x21b   :  { %v501_v27 = vadd.f32 %v1363_v10, %v500_v13 }
 0x229   :  { %v1478_v14 = vpop.f32.mrf.mxu1 }
 0x22a   :  { %v1908_v15 = vadd.f32 %v1478_v14, %v1363_v10 }
 0x22b   :  { %v510_v16 = vpop.f32.mrf.mxu1 }
 0x22c   :  { %v1910_v17 = vadd.f32 %v1363_v10, %v510_v16 }
 0x237   :  { %v1481_v18 = vpop.f32.mrf.mxu1 }
 0x238   :  { %v1912_v19 = vadd.f32 %v1481_v18, %v1363_v10 }
 0x239   :  { %v520_v20 = vpop.f32.mrf.mxu1 }
 0x23a   :  { %v1914_v21 = vadd.f32 %v1363_v10, %v520_v20 }
 0x245   :  { %v1484_v22 = vpop.f32.mrf.mxu1 }
 0x246   :  { %v1916_v23 = vadd.f32 %v1484_v22, %v1363_v10 }
 0x247   :  { %v530_v26 = vpop.f32.mrf.mxu1 }
 0x248   :  { %v1918_v28 = vadd.f32 %v1363_v10, %v530_v26 }
 0x249   :  { %v612_v29 = vpop.f32.mrf.mxu1 }
 0x24a   :  { %v616_v30 = vadd.f32 %v612_v29, %v501_v27 }
 0x24b   :  { %v1495_v32 = vpop.f32.mrf.mxu1 }
 0x24c   :  { %1590 = vtanh.f32 %v616_v30  ;;  %v1372_v34 = vmul.f32 -1.442695, %v616_v30 }
 0x24e   :  { %1592 = vpow2.f32 %v1372_v34 }
 0x259   :  { %v1591_v33 = vpop.eup %1590 }
 0x25a   :  { %626 = vrot.lane.b32.xlu0 %v1591_v33, %s1658_s9 }
 0x25b   :  { %v1593_v35 = vpop.eup %1592 }
 0x25c   :  { %v620_v36 = vadd.f32 1.0, %v1593_v35 }
 0x25e   :  { %1594 = vrcp.f32 %v620_v36 }
 0x26b   :  { %v1595_v37 = vpop.eup %1594 }
 0x26c   :  { %v624_v41 = vmul.f32 0.0, %v1595_v37 }
 0x2cc   :  { %v627_v39 = vpop.permute.xlu0 %626 }
 0x2cd   :  { %v629_v40 = vmul.f32 %v1595_v37, %v627_v39 }
 0x2cf   :  { %631 = vrot.lane.b32.xlu1 %v629_v40, %s1658_s9 }
 0x341   :  { %v632_v42 = vpop.permute.xlu1 %631 }
 0x342   :  { %v634_v43 = vadd.f32 %v632_v42, %v624_v41 }
 0x344   :  { %1596 = vtanh.f32 %v634_v43 }
 0x351   :  { %v1597_v44 = vpop.eup %1596 }
 0x352   :  { %637 = vrot.lane.b32.xlu0 %v1597_v44, %s1658_s9 }
 0x3c4   :  { %v638_v45 = vpop.permute.xlu0 %637 }
 0x3c5   :  { %v640_v46 = vmul.f32 %v1595_v37, %v638_v45 }
 0x3c7   :  { %642 = vrot.lane.b32.xlu1 %v640_v46, %s1659_s27 }
 0x439   :  { %v643_v47 = vpop.permute.xlu1 %642 }
 0x43a   :  { %1505 = vmatmul.mubr.msk.f32.vlgmr.msra.gmra.mxu0 %vm270_vm1, %v643_v47 }
 0x43b   :  { %1519 = vmatpush3.msra.mxu0 %v1845_v38  ;;  %1526 = vmatprep.mubr.msk.f32.mxu0 %vm1657_vm9, %v1656_v31 }
 0x43c   :  { %1520 = vmatprep.subr.mxu0 %v1656_v31 }
 0x43d   :  { %1521 = vmatpush3.msra.mxu0 %v1852_v54 }
 0x43e   :  { %1522 = vmatprep.subr.mxu0 %v1656_v31 }
 0x43f   :  { %1523 = vmatpush3.msra.mxu0 %v1860_v55 }
 0x440   :  { %1524 = vmatprep.subr.mxu0 %v1656_v31 }
 0x441   :  { %1525 = vmatpush3.msra.mxu0 %v1867_v56 }
 0x442   :  { %1540 = vmatprep.subr.mxu0 %v1656_v31 }
 0x4fa   :  { %v712_v48 = vpop.f32.mrf.mxu0 }
 0x4fb   :  { %v716_v49 = vadd.f32 %v712_v48, %v506_v12 }
 0x4fc   :  { %v1506_v50 = vpop.f32.mrf.mxu0 }
 0x4fd   :  { %1598 = vtanh.f32 %v716_v49  ;;  %v1374_v52 = vmul.f32 -1.442695, %v716_v49 }
 0x4ff   :  { %1600 = vpow2.f32 %v1374_v52 }
 0x50a   :  { %v1599_v51 = vpop.eup %1598 }
 0x50b   :  { %726 = vrot.lane.b32.xlu0 %v1599_v51, %s1658_s9 }
 0x50c   :  { %v1601_v53 = vpop.eup %1600 }
 0x50d   :  { %v720_v24 = vadd.f32 1.0, %v1601_v53 }
 0x50f   :  { %1602 = vrcp.f32 %v720_v24 }
 0x51c   :  { %v1603_v25 = vpop.eup %1602 }
 0x51d   :  { %v724_v59 = vmul.f32 %v1603_v25, %v634_v43 }
 0x57d   :  { %v727_v57 = vpop.permute.xlu0 %726 }
 0x57e   :  { %v729_v58 = vmul.f32 %v1603_v25, %v727_v57 }
 0x580   :  { %731 = vrot.lane.b32.xlu1 %v729_v58, %s1658_s9 }
 0x5f2   :  { %v732_v60 = vpop.permute.xlu1 %731 }
 0x5f3   :  { %v734_v61 = vadd.f32 %v732_v60, %v724_v59 }
 0x5f5   :  { %1604 = vtanh.f32 %v734_v61 }
 0x602   :  { %v1605_v62 = vpop.eup %1604 }
 0x603   :  { %737 = vrot.lane.b32.xlu0 %v1605_v62, %s1658_s9 }
 0x675   :  { %v738_v63 = vpop.permute.xlu0 %737 }
 0x676   :  { %v740_v0 = vmul.f32 %v1603_v25, %v738_v63 }
 0x678   :  { %742 = vrot.lane.b32.xlu1 %v740_v0, %s1659_s27 }
 0x6ea   :  { %v743_v1 = vpop.permute.xlu1 %742 }
 0x6eb   :  { %1516 = vmatmul.mubr.msk.f32.vlgmr.msra.gmra.mxu1 %vm270_vm1, %v743_v1 }
 0x6ec   :  { %1530 = vmatpush3.msra.mxu1 %v1845_v38  ;;  %1537 = vmatprep.mubr.msk.f32.mxu1 %vm1657_vm9, %v1656_v31 }
 0x6ed   :  { %1531 = vmatprep.subr.mxu1 %v1656_v31 }
 0x6ee   :  { %1532 = vmatpush3.msra.mxu1 %v1852_v54 }
 0x6ef   :  { %1533 = vmatprep.subr.mxu1 %v1656_v31 }
 0x6f0   :  { %1534 = vmatpush3.msra.mxu1 %v1860_v55 }
 0x6f1   :  { %1535 = vmatprep.subr.mxu1 %v1656_v31 }
 0x6f2   :  { %1536 = vmatpush3.msra.mxu1 %v1867_v56 }
 0x6f3   :  { %1551 = vmatprep.subr.mxu1 %v1656_v31 }
 0x7ab   :  { %v812_v2 = vpop.f32.mrf.mxu1 }
 0x7ac   :  { %v816_v3 = vadd.f32 %v812_v2, %v1910_v17 }
 0x7ad   :  { %v1517_v4 = vpop.f32.mrf.mxu1 }
 0x7ae   :  { %1606 = vtanh.f32 %v816_v3  ;;  %v1376_v6 = vmul.f32 -1.442695, %v816_v3 }
 0x7b0   :  { %1608 = vpow2.f32 %v1376_v6 }
 0x7bb   :  { %v1607_v5 = vpop.eup %1606 }
 0x7bc   :  { %826 = vrot.lane.b32.xlu0 %v1607_v5, %s1658_s9 }
 0x7bd   :  { %v1609_v7 = vpop.eup %1608 }
 0x7be   :  { %v820_v8 = vadd.f32 1.0, %v1609_v7 }
 0x7c0   :  { %1610 = vrcp.f32 %v820_v8 }
 0x7cd   :  { %v1611_v9 = vpop.eup %1610 }
 0x7ce   :  { %v824_v12 = vmul.f32 %v1611_v9, %v734_v61 }
 0x82e   :  { %v827_v10 = vpop.permute.xlu0 %826 }
 0x82f   :  { %v829_v11 = vmul.f32 %v1611_v9, %v827_v10 }
 0x831   :  { %831 = vrot.lane.b32.xlu1 %v829_v11, %s1658_s9 }
 0x8a3   :  { %v832_v13 = vpop.permute.xlu1 %831 }
 0x8a4   :  { %v834_v14 = vadd.f32 %v832_v13, %v824_v12 }
 0x8a6   :  { %1612 = vtanh.f32 %v834_v14 }
 0x8b3   :  { %v1613_v16 = vpop.eup %1612 }
 0x8b4   :  { %837 = vrot.lane.b32.xlu0 %v1613_v16, %s1658_s9 }
 0x926   :  { %v838_v17 = vpop.permute.xlu0 %837 }
 0x927   :  { %v840_v18 = vmul.f32 %v1611_v9, %v838_v17 }
 0x929   :  { %842 = vrot.lane.b32.xlu1 %v840_v18, %s1659_s27 }
 0x99b   :  { %v843_v20 = vpop.permute.xlu1 %842 }
 0x99c   :  { %1527 = vmatmul.mubr.msk.f32.vlgmr.msra.gmra.mxu0 %vm270_vm1, %v843_v20 }
 0x99d   :  { %1541 = vmatpush3.msra.mxu0 %v1845_v38  ;;  %1548 = vmatprep.mubr.msk.f32.mxu0 %vm1657_vm9, %v1656_v31 }
 0x99e   :  { %1542 = vmatprep.subr.mxu0 %v1656_v31 }
 0x99f   :  { %1543 = vmatpush3.msra.mxu0 %v1852_v54 }
 0x9a0   :  { %1544 = vmatprep.subr.mxu0 %v1656_v31 }
 0x9a1   :  { %1545 = vmatpush3.msra.mxu0 %v1860_v55 }
 0x9a2   :  { %1546 = vmatprep.subr.mxu0 %v1656_v31 }
 0x9a3   :  { %1547 = vmatpush3.msra.mxu0 %v1867_v56 }
 0x9a4   :  { %1562 = vmatprep.subr.mxu0 %v1656_v31 }
 0xa5c   :  { %v912_v22 = vpop.f32.mrf.mxu0 }
 0xa5d   :  { %v916_v26 = vadd.f32 %v912_v22, %v1908_v15 }
 0xa5e   :  { %v1528_v27 = vpop.f32.mrf.mxu0 }
 0xa5f   :  { %1614 = vtanh.f32 %v916_v26  ;;  %v1378_v30 = vmul.f32 -1.442695, %v916_v26 }
 0xa61   :  { %1616 = vpow2.f32 %v1378_v30 }
 0xa6c   :  { %v1615_v29 = vpop.eup %1614 }
 0xa6d   :  { %926 = vrot.lane.b32.xlu0 %v1615_v29, %s1658_s9 }
 0xa6e   :  { %v1617_v32 = vpop.eup %1616 }
 0xa6f   :  { %v920_v33 = vadd.f32 1.0, %v1617_v32 }
 0xa71   :  { %1618 = vrcp.f32 %v920_v33 }
 0xa7e   :  { %v1619_v34 = vpop.eup %1618 }
 0xa7f   :  { %v924_v37 = vmul.f32 %v1619_v34, %v834_v14 }
 0xadf   :  { %v927_v35 = vpop.permute.xlu0 %926 }
 0xae0   :  { %v929_v36 = vmul.f32 %v1619_v34, %v927_v35 }
 0xae2   :  { %931 = vrot.lane.b32.xlu1 %v929_v36, %s1658_s9 }
 0xb54   :  { %v932_v39 = vpop.permute.xlu1 %931 }
 0xb55   :  { %v934_v40 = vadd.f32 %v932_v39, %v924_v37 }
 0xb57   :  { %1620 = vtanh.f32 %v934_v40 }
 0xb64   :  { %v1621_v15 = vpop.eup %1620 }
 0xb65   :  { %937 = vrot.lane.b32.xlu0 %v1621_v15, %s1658_s9 }
 0xbd7   :  { %v938_v41 = vpop.permute.xlu0 %937 }
 0xbd8   :  { %v940_v42 = vmul.f32 %v1619_v34, %v938_v41 }
 0xbda   :  { %942 = vrot.lane.b32.xlu1 %v940_v42, %s1659_s27 }
 0xc4c   :  { %v943_v43 = vpop.permute.xlu1 %942 }
 0xc4d   :  { %1538 = vmatmul.mubr.msk.f32.vlgmr.msra.gmra.mxu1 %vm270_vm1, %v943_v43 }
 0xc4e   :  { %1552 = vmatpush3.msra.mxu1 %v1845_v38  ;;  %1559 = vmatprep.mubr.msk.f32.mxu1 %vm1657_vm9, %v1656_v31 }
 0xc4f   :  { %1553 = vmatprep.subr.mxu1 %v1656_v31 }
 0xc50   :  { %1554 = vmatpush3.msra.mxu1 %v1852_v54 }
 0xc51   :  { %1555 = vmatprep.subr.mxu1 %v1656_v31 }
 0xc52   :  { %1556 = vmatpush3.msra.mxu1 %v1860_v55 }
 0xc53   :  { %1557 = vmatprep.subr.mxu1 %v1656_v31 }
 0xc54   :  { %1558 = vmatpush3.msra.mxu1 %v1867_v56 }
 0xd0d   :  { %v1012_v44 = vpop.f32.mrf.mxu1 }
 0xd0e   :  { %v1016_v45 = vadd.f32 %v1012_v44, %v1914_v21 }
 0xd0f   :  { %v1539_v46 = vpop.f32.mrf.mxu1 }
 0xd10   :  { %1622 = vtanh.f32 %v1016_v45  ;;  %v1380_v48 = vmul.f32 -1.442695, %v1016_v45 }
 0xd12   :  { %1624 = vpow2.f32 %v1380_v48 }
 0xd1d   :  { %v1623_v47 = vpop.eup %1622 }
 0xd1e   :  { %1026 = vrot.lane.b32.xlu0 %v1623_v47, %s1658_s9 }
 0xd1f   :  { %v1625_v49 = vpop.eup %1624 }
 0xd20   :  { %v1020_v50 = vadd.f32 1.0, %v1625_v49 }
 0xd22   :  { %1626 = vrcp.f32 %v1020_v50 }
 0xd2f   :  { %v1627_v51 = vpop.eup %1626 }
 0xd30   :  { %v1024_v24 = vmul.f32 %v1627_v51, %v934_v40 }
 0xd90   :  { %v1027_v52 = vpop.permute.xlu0 %1026 }
 0xd91   :  { %v1029_v53 = vmul.f32 %v1627_v51, %v1027_v52 }
 0xd93   :  { %1031 = vrot.lane.b32.xlu1 %v1029_v53, %s1658_s9 }
 0xe05   :  { %v1032_v25 = vpop.permute.xlu1 %1031 }
 0xe06   :  { %v1034_v57 = vadd.f32 %v1032_v25, %v1024_v24 }
 0xe08   :  { %1628 = vtanh.f32 %v1034_v57 }
 0xe15   :  { %v1629_v21 = vpop.eup %1628 }
 0xe16   :  { %1037 = vrot.lane.b32.xlu0 %v1629_v21, %s1658_s9 }
 0xe88   :  { %v1038_v58 = vpop.permute.xlu0 %1037 }
 0xe89   :  { %v1040_v59 = vmul.f32 %v1627_v51, %v1038_v58 }
 0xe8b   :  { %1042 = vrot.lane.b32.xlu1 %v1040_v59, %s1659_s27 }
 0xefd   :  { %v1043_v60 = vpop.permute.xlu1 %1042 }
 0xefe   :  { %1549 = vmatmul.mubr.msk.f32.vlgmr.msra.gmra.mxu0 %vm270_vm1, %v1043_v60 }
 0xeff   :  { %1563 = vmatpush3.msra.mxu0 %v1845_v38  ;;  %1570 = vmatprep.mubr.msk.f32.mxu0 %vm1657_vm9, %v1656_v31 }
 0xf00   :  { %1564 = vmatprep.subr.mxu0 %v1656_v31 }
 0xf01   :  { %1565 = vmatpush3.msra.mxu0 %v1852_v54 }
 0xf02   :  { %1566 = vmatprep.subr.mxu0 %v1656_v31 }
 0xf03   :  { %1567 = vmatpush3.msra.mxu0 %v1860_v55 }
 0xf04   :  { %1568 = vmatprep.subr.mxu0 %v1656_v31 }
 0xf05   :  { %1569 = vmatpush3.msra.mxu0 %v1867_v56 }
 0xfbe   :  { %v1112_v61 = vpop.f32.mrf.mxu0 }
 0xfbf   :  { %v1116_v62 = vadd.f32 %v1112_v61, %v1912_v19 }
 0xfc0   :  { %v1550_v63 = vpop.f32.mrf.mxu0 }
 0xfc1   :  { %1630 = vtanh.f32 %v1116_v62  ;;  %v1382_v0 = vmul.f32 -1.442695, %v1116_v62 }
 0xfc3   :  { %1632 = vpow2.f32 %v1382_v0 }
 0xfce   :  { %v1631_v38 = vpop.eup %1630 }
 0xfcf   :  { %1126 = vrot.lane.b32.xlu0 %v1631_v38, %s1658_s9 }
 0xfd0   :  { %v1633_v1 = vpop.eup %1632 }
 0xfd1   :  { %v1120_v54 = vadd.f32 1.0, %v1633_v1 }
 0xfd3   :  { %1634 = vrcp.f32 %v1120_v54 }
 0xfe0   :  { %v1635_v2 = vpop.eup %1634 }
 0xfe1   :  { %v1124_v31 = vmul.f32 %v1635_v2, %v1034_v57 }
0x1041   :  { %v1127_v3 = vpop.permute.xlu0 %1126 }
0x1042   :  { %v1129_v55 = vmul.f32 %v1635_v2, %v1127_v3 }
0x1044   :  { %1131 = vrot.lane.b32.xlu1 %v1129_v55, %s1658_s9 }
0x10b6   :  { %v1132_v56 = vpop.permute.xlu1 %1131 }
0x10b7   :  { %v1134_v4 = vadd.f32 %v1132_v56, %v1124_v31 }
0x10b9   :  { %1636 = vtanh.f32 %v1134_v4 }
0x10c6   :  { %v1637_v19 = vpop.eup %1636 }
0x10c7   :  { %1137 = vrot.lane.b32.xlu0 %v1637_v19, %s1658_s9 }
0x1139   :  { %v1138_v5 = vpop.permute.xlu0 %1137 }
0x113a   :  { %v1140_v6 = vmul.f32 %v1635_v2, %v1138_v5 }
0x113c   :  { %1142 = vrot.lane.b32.xlu1 %v1140_v6, %s1659_s27 }
0x11ae   :  { %v1143_v7 = vpop.permute.xlu1 %1142 }
0x11af   :  { %1560 = vmatmul.mubr.msk.f32.vlgmr.msra.gmra.mxu1 %vm270_vm1, %v1143_v7 }
0x126f   :  { %v1212_v8 = vpop.f32.mrf.mxu1 }
0x1270   :  { %v1216_v9 = vadd.f32 %v1212_v8, %v1918_v28 }
0x1271   :  { %v1561_v10 = vpop.f32.mrf.mxu1 }
0x1272   :  { %1638 = vtanh.f32 %v1216_v9  ;;  %v1384_v12 = vmul.f32 -1.442695, %v1216_v9 }
0x1274   :  { %1640 = vpow2.f32 %v1384_v12 }
0x127f   :  { %v1639_v11 = vpop.eup %1638 }
0x1280   :  { %1226 = vrot.lane.b32.xlu0 %v1639_v11, %s1658_s9 }
0x1281   :  { %v1641_v13 = vpop.eup %1640 }
0x1282   :  { %v1220_v14 = vadd.f32 1.0, %v1641_v13 }
0x1284   :  { %1642 = vrcp.f32 %v1220_v14 }
0x1291   :  { %v1643_v16 = vpop.eup %1642 }
0x1292   :  { %v1224_v20 = vmul.f32 %v1643_v16, %v1134_v4 }
0x12f2   :  { %v1227_v17 = vpop.permute.xlu0 %1226 }
0x12f3   :  { %v1229_v18 = vmul.f32 %v1643_v16, %v1227_v17 }
0x12f5   :  { %1231 = vrot.lane.b32.xlu1 %v1229_v18, %s1658_s9 }
0x1367   :  { %v1232_v22 = vpop.permute.xlu1 %1231 }
0x1368   :  { %v1234_v26 = vadd.f32 %v1232_v22, %v1224_v20 }
0x136a   :  { %1644 = vtanh.f32 %v1234_v26 }
0x1377   :  { %v1645_v28 = vpop.eup %1644 }
0x1378   :  { %1237 = vrot.lane.b32.xlu0 %v1645_v28, %s1658_s9 }
0x13ea   :  { %v1238_v27 = vpop.permute.xlu0 %1237 }
0x13eb   :  { %v1240_v29 = vmul.f32 %v1643_v16, %v1238_v27 }
0x13ed   :  { %1242 = vrot.lane.b32.xlu1 %v1240_v29, %s1659_s27 }
0x145f   :  { %v1243_v30 = vpop.permute.xlu1 %1242 }
0x1460   :  { %1571 = vmatmul.mubr.msk.f32.vlgmr.msra.gmra.mxu0 %vm270_vm1, %v1243_v30 }
0x1520   :  { %v1312_v32 = vpop.f32.mrf.mxu0 }
0x1521   :  { %v1316_v33 = vadd.f32 %v1312_v32, %v1916_v23 }
0x1522   :  { %v1572_v34 = vpop.f32.mrf.mxu0 }
0x1523   :  { %1646 = vtanh.f32 %v1316_v33  ;;  %v1386_v36 = vmul.f32 -1.442695, %v1316_v33 }
0x1525   :  { %1648 = vpow2.f32 %v1386_v36 }
0x1530   :  { %v1647_v35 = vpop.eup %1646 }
0x1531   :  { %1326 = vrot.lane.b32.xlu0 %v1647_v35, %s1658_s9 }
0x1532   :  { %v1649_v37 = vpop.eup %1648 }
0x1533   :  { %v1320_v39 = vadd.f32 1.0, %v1649_v37 }
0x1535   :  { %1650 = vrcp.f32 %v1320_v39 }
0x1542   :  { %v1651_v40 = vpop.eup %1650 }
0x1543   :  { %v1324_v42 = vmul.f32 %v1651_v40, %v1234_v26 }
0x15a3   :  { %v1327_v15 = vpop.permute.xlu0 %1326 }
0x15a4   :  { %v1329_v41 = vmul.f32 %v1651_v40, %v1327_v15 }
0x15a6   :  { %1331 = vrot.lane.b32.xlu1 %v1329_v41, %s1658_s9 }
0x1618   :  { %v1332_v43 = vpop.permute.xlu1 %1331 }
0x1619   :  { %v1334_v44 = vadd.f32 %v1332_v43, %v1324_v42 }
0x161b   :  { %1652 = vtanh.f32 %v1334_v44 }
0x1628   :  { %v1653_v23 = vpop.eup %1652 }
0x1629   :  { %1337 = vrot.lane.b32.xlu0 %v1653_v23, %s1658_s9 }
0x169b   :  { %v1338_v45 = vpop.permute.xlu0 %1337 }
0x169c   :  { %v1340_v46 = vmul.f32 %v1651_v40, %v1338_v45 }
0x169e   :  { %1342 = vrot.lane.b32.xlu1 %v1340_v46, %s1659_s27 }
0x1710   :  { %v1343_v47 = vpop.permute.xlu1 %1342 }
0x1711   :  { %1345 = vst.msk [vmem:[%s2027_s10] sm:$0xff] %vm270_vm1, %v1343_v47 }

// kernel: _lambda_.4
= control target key start
LH: loop header
LB: loop body
LE: loop exit
PB: predicated region body
PF: predicated region fallthrough
CT: control target
= control target key end

     0   :  { %s2211_s0 = inlined_call_operand.vmem [shape: s32[2], index: 0, kind: input, shape index: {}]   ;;  %s2212_s2 = inlined_call_operand.vmem [shape: f32[11,32], index: 2, kind: input, shape index: {}]   ;;  %s2213_s3 = inlined_call_operand.vmem [shape: f32[11,2], index: 3, kind: input, shape index: {}]   ;;  %s2214_s4 = inlined_call_operand.vmem [shape: f32[11,1], index: 4, kind: input, shape index: {}]   ;;  %s2215_s5 = inlined_call_operand.vmem [shape: f32[2,32], index: 5, kind: input, shape index: {}]   ;;  %s2216_s6 = inlined_call_operand.vmem [shape: f32[1,32], index: 6, kind: input, shape index: {}]   ;;  %s2217_s7 = inlined_call_operand.vmem [shape: f32[1,32], index: 7, kind: input, shape index: {}]   ;;  %s2218_s8 = inlined_call_operand.vmem [shape: f32[32,16], index: 8, kind: input, shape index: {}]   ;;  %s2219_s9 = inlined_call_operand.vmem [shape: f32[1,16], index: 9, kind: input, shape index: {}]   ;;  %s2220_s10 = inlined_call_operand.vmem [shape: bf16[32,512], index: 10, kind: input, shape index: {}]   ;;  %s2221_s11 = inlined_call_operand.vmem [shape: bf16[16,512], index: 11, kind: input, shape index: {}]   ;;  %s2222_s12 = inlined_call_operand.vmem [shape: f32[1,512], index: 12, kind: input, shape index: {}]   ;;  %s2223_s13 = inlined_call_operand.vmem [shape: bf16[512,32], index: 13, kind: input, shape index: {}]   ;;  %s2224_s14 = inlined_call_operand.vmem [shape: f32[1,32], index: 14, kind: input, shape index: {}]   ;;  %s2225_s15 = inlined_call_operand.vmem [shape: f32[2,3,32], index: 15, kind: output, shape index: {}]   ;;  %s2226_s1 = inlined_call_operand.vmem [shape: s32[2], index: 1, kind: input, shape index: {}]  }
   0x1   :  { %s20_s20 = sshll.u32 %s2211_s0, 4  ;;  %s24_s23 = sshll.u32 %s2226_s1, 4  ;;  %s21_s20 = int_to_ptr.vmem [resolvable:$true] %s20_s20  ;;  %s25_s23 = int_to_ptr.vmem [resolvable:$true] %s24_s23 }
   0x2   :  { %s1454_s24 = scalar_lea.vmem %s21_s20, 16  ;;  %p1459_p1 = scmp.lt.s32.totalorder %s21_s20, %s21_s20 }
   0x3   :  { %p1455_p0 = scmp.ne.s32.totalorder %s21_s20, %s1454_s24  ;;  %p1460_p2 = scmp.lt.s32.totalorder %s1454_s24, %s1454_s24 }
   0x5   :  { %p1461_p3 = por %p1460_p2, %p1459_p1 }
   0x7   :  { %p1462_p4 = pnand %p1461_p3, %p1455_p0 }
   0x9   :  { %1465 = shalt.err (!%p1462_p4)  }
   0xa   :  { %s1496_s25 = smov [#allocation3]   ;;  %s1466_s26 = scalar_lea.vmem %s25_s23, 16 }
   0xb   :  { %23 = dma.vmem_to_smem %s21_s20, 16, %s1496_s25, [#allocation2] }
   0xc   :  { %p1467_p5 = scmp.ne.s32.totalorder %s25_s23, %s1466_s26  ;;  %p1471_p6 = scmp.lt.s32.totalorder %s25_s23, %s25_s23 }
   0xd   :  { %p1472_p7 = scmp.lt.s32.totalorder %s1466_s26, %s1466_s26 }
   0xf   :  { %p1473_p8 = por %p1472_p7, %p1471_p6 }
  0x11   :  { %p1474_p9 = pnand %p1473_p8, %p1467_p5 }
  0x13   :  { %1477 = shalt.err (!%p1474_p9)  }
  0x14   :  { %s1497_s0 = smov [#allocation4]  }
  0x15   :  { %27 = dma.vmem_to_smem %s25_s23, 16, %s1497_s0, [#allocation2] }
  0x16   :  { %1486 = dma.done.wait [#allocation2], 32 }
  0x17   :  { %1487 = vsyncadd [#allocation2], 4294967264 }
  0x18   :  { %29 = sfence }
  0x19   :  { %s1591_s1 = smov 0  }
  0x1a LB: > { %s1302_s27 = sadd.s32 4294967295, %s1490_s1   ;;  %p1305_p10 = scmp.ge.s32.totalorder %s1490_s1, 1  ;;  %s1490_s1 = sphi %s1591_s1, %s35_s1  }
  0x1b   : > { %p389_p11 = scmp.lt.s32.totalorder %s1490_s1, 3 }
  0x1d   : > { %p390_p12 = pnand %p1305_p10, %p389_p11 }
  0x1f   : > { %393 = sbr.rel (%p390_p12) target bundleno = 956 (0x3bc), region = 72 }
  0x24   : > { %s1599_s28 = sld [smem:[#allocation3 + %s1302_s27]]  ;;  %v1498_v0 = vmov 0   ;;  %v449_v1 = vlaneseq  ;;  %v2244_v8 = vmov 0  ;;  %p427_p13 = scmp.lt.s32.totalorder %s1302_s27, 1  ;;  %v1499_v9 = vmov 1   ;;  %v1635_v11 = vld [vmem:[%s2220_s10] sm:$0xff] }
  0x25   : > { %1448 = vset.pattern.permute.xlu0 %v1498_v0  ;;  %1450 = vset.pattern.permute.xlu1 %v1498_v0  ;;  %s1601_s29 = sld [smem:[#allocation4 + %s1302_s27]]  ;;  %vm434_vm1 = vcmask 256000   ;;  %v1500_v10 = vmov 0.0   ;;  %2247 = vst [vmem:[#allocation9_spill] sm:$0xff] %v1635_v11  ;;  %v1640_v12 = vld [vmem:[%s2220_s10 + $0x8] sm:$0xff]  ;;  %v1645_v13 = vld [vmem:[%s2220_s10 + $0x10] sm:$0xff] }
  0x26   : > { %v1611_v2 = vshrl.u32 %v449_v1, 7  ;;  %s2355_s27 = smov (!%p427_p13, %s1302_s27), 1  ;;  %2248 = vst [vmem:[#allocation10_spill] sm:$0xff] %v1640_v12  ;;  %2249 = vst [vmem:[#allocation11_spill] sm:$0xff] %v1645_v13  ;;  %v1650_v14 = vld [vmem:[%s2220_s10 + $0x18] sm:$0xff]  ;;  %v1655_v15 = vld [vmem:[%s2220_s10 + $0x20] sm:$0xff] }
  0x27   : > { %s1306_s24 = sshll.u32 %s2355_s27, 2  ;;  %2250 = vst [vmem:[#allocation12_spill] sm:$0xff] %v1650_v14  ;;  %2251 = vst [vmem:[#allocation13_spill] sm:$0xff] %v1655_v15  ;;  %v1660_v16 = vld [vmem:[%s2220_s10 + $0x28] sm:$0xff]  ;;  %v1665_v17 = vld [vmem:[%s2220_s10 + $0x30] sm:$0xff] }
  0x28   : > { %2242 = vst [vmem:[#allocation6_spill] sm:$0xff] %v1611_v2  ;;  %s1628_s0 = scalar_lea.vmem %s2225_s15, %s1306_s24  ;;  %2252 = vst [vmem:[#allocation14_spill] sm:$0xff] %v1660_v16  ;;  %v1670_v18 = vld [vmem:[%s2220_s10 + $0x38] sm:$0xff]  ;;  %v1675_v19 = vld [vmem:[%s2218_s8] sm:$0xff] }
  0x29   : > { %435 = vst.msk [vmem:[%s1628_s0] sm:$0x7] %vm434_vm1, %v1500_v10  ;;  %2253 = vst [vmem:[#allocation15_spill] sm:$0xff] %v1665_v17  ;;  %v1680_v20 = vld [vmem:[%s2218_s8 + $0x8] sm:$0xff]  ;;  %v1685_v21 = vld [vmem:[%s2218_s8 + $0x10] sm:$0xff] }
  0x2a   : > { %s438_s17 = scalar_lea.vmem %s2213_s3, %s1599_s28  ;;  %s436_s20 = scalar_lea.vmem %s2212_s2, %s1599_s28  ;;  %2254 = vst [vmem:[#allocation16_spill] sm:$0xff] %v1670_v18  ;;  %2255 = vst [vmem:[#allocation17_spill] sm:$0xff] %v1675_v19  ;;  %v1690_v22 = vld [vmem:[%s2218_s8 + $0x18] sm:$0xff]  ;;  %v1695_v23 = vld [vmem:[%s2219_s9] ss:$0 sm:$0xff] }
  0x2b   : > { %v439_v3 = vld [vmem:[%s438_s17] sm:$0x7]  ;;  %s440_s23 = scalar_lea.vmem %s2214_s4, %s1599_s28  ;;  %v572_v5 = vstv %s1601_s29  ;;  %2256 = vst [vmem:[#allocation18_spill] sm:$0xff] %v1680_v20  ;;  %v1705_v25 = vld [vmem:[%s2221_s11 + $0x8] sm:$0xff]  ;;  %v1710_v26 = vld [vmem:[%s2221_s11 + $0x10] sm:$0xff]  ;;  %p1309_p0 = scmp.le.s32.totalorder %s1601_s29, 0 }
  0x2c   : > { %v437_v4 = vld [vmem:[%s436_s20] sm:$0x7]  ;;  %446 = vperm.xlu0 %1448, %v439_v3   ;;  %vm1621_vm0 = vcmp.lt.s32.totalorder %v1611_v2, %v572_v5  ;;  %v1715_v27 = vld [vmem:[%s2221_s11 + $0x18] sm:$0xff]  ;;  %v1730_v30 = vld [vmem:[%s2223_s13 + $0x4] sm:$0xf]  ;;  %s2073_s19 = smov (!%p1309_p0), 0  }
  0x2d   : > { %v1618_v6 = vpack.c.bf16 %v437_v4, %v437_v4  ;;  %v441_v7 = vld [vmem:[%s440_s23] sm:$0x7]  ;;  %v2245_v8 = vsel %vm1621_vm0, 4294967295, %v2244_v8  ;;  %2259 = vst [vmem:[#allocation21_spill] sm:$0xff] %v1730_v30  ;;  %v1735_v31 = vld [vmem:[%s2223_s13 + $0x8] sm:$0xf] }
  0x2e   : > { %2246 = vst [vmem:[#allocation8_spill] sm:$0xff] %v2245_v8  ;;  %467 = vperm.xlu1 %1450, %v441_v7   ;;  %v1700_v24 = vld [vmem:[%s2221_s11] sm:$0xff]  ;;  %2260 = vst [vmem:[#allocation22_spill] sm:$0xff] %v1735_v31  ;;  %v1740_v32 = vld [vmem:[%s2223_s13 + $0xc] sm:$0xf] }
  0x2f   : > { %2243 = vst [vmem:[#allocation7_spill] sm:$0xff] %v1618_v6  ;;  %v1720_v28 = vld [vmem:[%s2222_s12] sm:$0xf]  ;;  %2261 = vst [vmem:[#allocation23_spill] sm:$0xff] %v1740_v32  ;;  %v1745_v33 = vld [vmem:[%s2223_s13 + $0x10] sm:$0xf] }
  0x30   : > { %1449 = vset.pattern.permute.xlu0 %v1499_v9  ;;  %2257 = vst [vmem:[#allocation19_spill] sm:$0xff] %v1720_v28  ;;  %v1725_v29 = vld [vmem:[%s2223_s13] sm:$0xf]  ;;  %2262 = vst [vmem:[#allocation24_spill] sm:$0xff] %v1745_v33  ;;  %v1750_v34 = vld [vmem:[%s2223_s13 + $0x14] sm:$0xf] }
  0x31   : > { %455 = vperm.xlu0 %1449, %v439_v3   ;;  %2258 = vst [vmem:[#allocation20_spill] sm:$0xff] %v1725_v29  ;;  %2263 = vst [vmem:[#allocation25_spill] sm:$0xff] %v1750_v34  ;;  %v1755_v35 = vld [vmem:[%s2223_s13 + $0x18] sm:$0xf]  ;;  %v1760_v36 = vld [vmem:[%s2223_s13 + $0x1c] sm:$0xf] }
  0x32   : > { %2264 = vst [vmem:[#allocation26_spill] sm:$0xff] %v1755_v35  ;;  %2265 = vst [vmem:[#allocation27_spill] sm:$0xff] %v1760_v36  ;;  %v1765_v37 = vld [vmem:[%s2223_s13 + $0x20] sm:$0xf]  ;;  %v1770_v38 = vld [vmem:[%s2223_s13 + $0x24] sm:$0xf] }
  0x33   : > { %v1775_v39 = vld [vmem:[%s2223_s13 + $0x28] sm:$0xf]  ;;  %v1780_v40 = vld [vmem:[%s2223_s13 + $0x2c] sm:$0xf]  ;;  %v1785_v41 = vld [vmem:[%s2223_s13 + $0x30] sm:$0xf] }
  0x34   : > { %v1790_v42 = vld [vmem:[%s2223_s13 + $0x34] sm:$0xf]  ;;  %v1795_v43 = vld [vmem:[%s2223_s13 + $0x38] sm:$0xf]  ;;  %v1800_v44 = vld [vmem:[%s2223_s13 + $0x3c] sm:$0xf] }
  0x35   : > { %1451 = vset.pattern.permute.xlu0 %v1498_v0  ;;  %v1805_v45 = vld [vmem:[%s2223_s13 + $0x40] sm:$0xf]  ;;  %v1810_v46 = vld [vmem:[%s2223_s13 + $0x44] sm:$0xf]  ;;  %v1815_v47 = vld [vmem:[%s2223_s13 + $0x48] sm:$0xf] }
  0x36   : > { %2266 = vst [vmem:[#allocation28_spill] sm:$0xff] %v1805_v45  ;;  %2267 = vst [vmem:[#allocation29_spill] sm:$0xff] %v1810_v46  ;;  %v1820_v48 = vld [vmem:[%s2223_s13 + $0x4c] sm:$0xf]  ;;  %v1825_v49 = vld [vmem:[%s2223_s13 + $0x50] sm:$0xf] }
  0x37   : > { %2268 = vst [vmem:[#allocation30_spill] sm:$0xff] %v1815_v47  ;;  %2269 = vst [vmem:[#allocation31_spill] sm:$0xff] %v1820_v48  ;;  %v1830_v50 = vld [vmem:[%s2223_s13 + $0x54] sm:$0xf]  ;;  %v1835_v51 = vld [vmem:[%s2223_s13 + $0x58] sm:$0xf] }
  0x38   : > { %2270 = vst [vmem:[#allocation32_spill] sm:$0xff] %v1825_v49  ;;  %2271 = vst [vmem:[#allocation33_spill] sm:$0xff] %v1830_v50  ;;  %v1840_v52 = vld [vmem:[%s2223_s13 + $0x5c] sm:$0xf]  ;;  %v1845_v53 = vld [vmem:[%s2223_s13 + $0x60] sm:$0xf] }
  0x39   : > { %2272 = vst [vmem:[#allocation34_spill] sm:$0xff] %v1835_v51  ;;  %2273 = vst [vmem:[#allocation35_spill] sm:$0xff] %v1840_v52  ;;  %v1850_v54 = vld [vmem:[%s2223_s13 + $0x64] sm:$0xf]  ;;  %v1855_v55 = vld [vmem:[%s2223_s13 + $0x68] sm:$0xf] }
  0x3a   : > { %v1860_v56 = vld [vmem:[%s2223_s13 + $0x6c] sm:$0xf]  ;;  %v1865_v57 = vld [vmem:[%s2223_s13 + $0x70] sm:$0xf]  ;;  %v1870_v58 = vld [vmem:[%s2223_s13 + $0x74] sm:$0xf] }
  0x3b   : > { %v1875_v59 = vld [vmem:[%s2223_s13 + $0x78] sm:$0xf]  ;;  %v1880_v60 = vld [vmem:[%s2223_s13 + $0x7c] sm:$0xf]  ;;  %v1885_v61 = vld [vmem:[%s2223_s13 + $0x80] sm:$0xf] }
  0x3c   : > { %2274 = vst [vmem:[#allocation36_spill] sm:$0xff] %v1885_v61  ;;  %v1890_v62 = vld [vmem:[%s2223_s13 + $0x84] sm:$0xf]  ;;  %v1895_v63 = vld [vmem:[%s2223_s13 + $0x88] sm:$0xf] }
  0x3d   : > { %2275 = vst [vmem:[#allocation37_spill] sm:$0xff] %v1890_v62  ;;  %2276 = vst [vmem:[#allocation38_spill] sm:$0xff] %v1895_v63  ;;  %v1900_v0 = vld [vmem:[%s2223_s13 + $0x8c] sm:$0xf]  ;;  %v1905_v1 = vld [vmem:[%s2223_s13 + $0x90] sm:$0xf] }
  0x3e   : > { %2277 = vst [vmem:[#allocation39_spill] sm:$0xff] %v1900_v0  ;;  %2278 = vst [vmem:[#allocation40_spill] sm:$0xff] %v1905_v1  ;;  %v1910_v3 = vld [vmem:[%s2223_s13 + $0x94] sm:$0xf]  ;;  %v1915_v4 = vld [vmem:[%s2223_s13 + $0x98] sm:$0xf] }
  0x3f   : > { %2279 = vst [vmem:[#allocation41_spill] sm:$0xff] %v1910_v3  ;;  %2280 = vst [vmem:[#allocation42_spill] sm:$0xff] %v1915_v4  ;;  %v1920_v5 = vld [vmem:[%s2223_s13 + $0x9c] sm:$0xf]  ;;  %v1925_v7 = vld [vmem:[%s2223_s13 + $0xa0] sm:$0xf] }
  0x40   : > { %2281 = vst [vmem:[#allocation43_spill] sm:$0xff] %v1920_v5  ;;  %2282 = vst [vmem:[#allocation44_spill] sm:$0xff] %v1925_v7  ;;  %v1930_v9 = vld [vmem:[%s2223_s13 + $0xa4] sm:$0xf]  ;;  %v1935_v10 = vld [vmem:[%s2223_s13 + $0xa8] sm:$0xf] }
  0x41   : > { %2283 = vst [vmem:[#allocation45_spill] sm:$0xff] %v1930_v9  ;;  %2284 = vst [vmem:[#allocation46_spill] sm:$0xff] %v1935_v10  ;;  %v1940_v8 = vld [vmem:[%s2223_s13 + $0xac] sm:$0xf]  ;;  %v1945_v28 = vld [vmem:[%s2223_s13 + $0xb0] sm:$0xf] }
  0x42   : > { %2285 = vst [vmem:[#allocation47_spill] sm:$0xff] %v1940_v8  ;;  %v1950_v61 = vld [vmem:[%s2223_s13 + $0xb4] sm:$0xf]  ;;  %v1955_v62 = vld [vmem:[%s2223_s13 + $0xb8] sm:$0xf] }
  0x43   : > { %v1960_v29 = vld [vmem:[%s2223_s13 + $0xbc] sm:$0xf]  ;;  %v1965_v30 = vld [vmem:[%s2223_s13 + $0xc0] sm:$0xf]  ;;  %v1970_v45 = vld [vmem:[%s2223_s13 + $0xc4] sm:$0xf] }
  0x44   : > { %2286 = vst [vmem:[#allocation48_spill] sm:$0xff] %v1965_v30  ;;  %2287 = vst [vmem:[#allocation49_spill] sm:$0xff] %v1970_v45  ;;  %v1975_v46 = vld [vmem:[%s2223_s13 + $0xc8] sm:$0xf]  ;;  %v1980_v63 = vld [vmem:[%s2223_s13 + $0xcc] sm:$0xf] }
  0x45   : > { %2288 = vst [vmem:[#allocation50_spill] sm:$0xff] %v1975_v46  ;;  %2289 = vst [vmem:[#allocation51_spill] sm:$0xff] %v1980_v63  ;;  %v1985_v0 = vld [vmem:[%s2223_s13 + $0xd0] sm:$0xf]  ;;  %v1990_v30 = vld [vmem:[%s2223_s13 + $0xd4] sm:$0xf] }
  0x46   : > { %2290 = vst [vmem:[#allocation52_spill] sm:$0xff] %v1985_v0  ;;  %2291 = vst [vmem:[#allocation53_spill] sm:$0xff] %v1990_v30  ;;  %v1995_v45 = vld [vmem:[%s2223_s13 + $0xd8] sm:$0xf]  ;;  %v2000_v31 = vld [vmem:[%s2223_s13 + $0xdc] sm:$0xf] }
  0x47   : > { %2292 = vst [vmem:[#allocation54_spill] sm:$0xff] %v1995_v45  ;;  %2293 = vst [vmem:[#allocation55_spill] sm:$0xff] %v2000_v31  ;;  %v2005_v32 = vld [vmem:[%s2223_s13 + $0xe0] sm:$0xf]  ;;  %v2010_v46 = vld [vmem:[%s2223_s13 + $0xe4] sm:$0xf] }
  0x48   : > { %v2015_v63 = vld [vmem:[%s2223_s13 + $0xe8] sm:$0xf]  ;;  %v2020_v47 = vld [vmem:[%s2223_s13 + $0xec] sm:$0xf]  ;;  %v2025_v48 = vld [vmem:[%s2223_s13 + $0xf0] sm:$0xf] }
  0x49   : > { %v2030_v1 = vld [vmem:[%s2223_s13 + $0xf4] sm:$0xf]  ;;  %v2035_v3 = vld [vmem:[%s2223_s13 + $0xf8] sm:$0xf]  ;;  %v2040_v33 = vld [vmem:[%s2223_s13 + $0xfc] sm:$0xf] }
  0x4a   : > { %2294 = vst [vmem:[#allocation56_spill] sm:$0xff] %v2030_v1  ;;  %2295 = vst [vmem:[#allocation57_spill] sm:$0xff] %v2035_v3  ;;  %v2045_v34 = vld [vmem:[%s2224_s14] ss:$0 sm:$0xff]  ;;  %v2048_v0 = vsub.s32 0, %v1611_v2 }
  0x4b   : > { %2296 = vst [vmem:[#allocation58_spill] sm:$0xff] %v2045_v34  ;;  %v2053_v30 = vld [vmem:[%s2215_s5] sm:$0x1]  ;;  %v2058_v49 = vld [vmem:[%s2215_s5 + $0x1] sm:$0x1] }
  0x4c   : > { %2297 = vst [vmem:[#allocation59_spill] sm:$0xff] %v2048_v0  ;;  %v452_v4 = vrot.slane %v2053_v30, %v2048_v0  ;;  %v461_v34 = vrot.slane %v2058_v49, %v2048_v0  ;;  %v1307_v2 = vld [vmem:[%s2216_s6] ss:$0 sm:$0xff] }
  0x4d   : > { %v1308_v52 = vld [vmem:[%s2217_s7] ss:$0 sm:$0xff] }
  0xa7   : > { %v447_v50 = vpop.permute.xlu0 %446 }
  0xa8   : > { %v453_v36 = vmul.f32 %v452_v4, %v447_v50 }
  0xa9   : > { %v468_v5 = vpop.permute.xlu1 %467 }
  0xaa   : > { %v476_v31 = vmul.f32 %v1307_v2, %v468_v5 }
  0xac   : > { %v456_v35 = vpop.permute.xlu0 %455 }
  0xad   : > { %v462_v45 = vmul.f32 %v461_v34, %v456_v35 }
  0xaf   : > { %v463_v51 = vadd.f32 %v462_v45, %v453_v36 }
  0xb1   : > { %v477_v7 = vadd.f32 %v476_v31, %v463_v51  ;;  %1285 = sbr.rel (%p1309_p0) target bundleno = 956 (0x3bc), region = 105 }
  0xb3   : > { %v2070_v9 = vadd.f32 %v1308_v52, %v477_v7 }
  0xb5   : > { %2298 = vst [vmem:[#allocation60_spill] sm:$0xff] %v2070_v9 }
  0xb6 LB: >> { %v2299_v0 = vld [vmem:[#allocation59_spill] sm:$0xff]  ;;  %v2300_v18 = vld [vmem:[#allocation16_spill] sm:$0xff]  ;;  %v2302_v16 = vld [vmem:[#allocation14_spill] sm:$0xff]  ;;  %v1501_v2 = vmov 0   ;;  %s580_s20 = sadd.s32 %s1494_s19, %s1599_s28  ;;  %v1502_v34 = vmov 1   ;;  %v1503_v35 = vmov 0.0   ;;  %s1247_s24 = scalar_lea.vmem %s1628_s0, %s1494_s19  ;;  %s1494_s19 = sphi %s2073_s19, %s577_s19  }
  0xb7   : >> { %v2301_v17 = vld [vmem:[#allocation15_spill] sm:$0xff]  ;;  %v2303_v15 = vld [vmem:[#allocation13_spill] sm:$0xff]  ;;  %v2304_v14 = vld [vmem:[#allocation12_spill] sm:$0xff]  ;;  %1452 = vset.pattern.permute.xlu0 %v1501_v2  ;;  %740 = vmatprep.mubr.bf16.mxu1 %v1501_v2  ;;  %s581_s23 = scalar_lea.vmem %s2213_s3, %s580_s20  ;;  %vm1504_vm2 = vmmov 0   ;;  %vm609_vm4 = vcmask 261120   ;;  %vm704_vm5 = vcmask 130048  }
  0xb8   : >> { %v2305_v13 = vld [vmem:[#allocation11_spill] sm:$0xff]  ;;  %v2306_v12 = vld [vmem:[#allocation10_spill] sm:$0xff]  ;;  %v2307_v11 = vld [vmem:[#allocation9_spill] sm:$0xff]  ;;  %1412 = vmatprep.subr.mxu0 %v1503_v35  ;;  %1420 = vmatprep.mubr.msk.f32.mxu0 %vm1504_vm2, %v1503_v35  ;;  %vm1248_vm11 = vcmask 253952   ;;  %s577_s19 = sadd.s32 1, %s1494_s19  }
  0xb9   : >> { %v2308_v6 = vld [vmem:[#allocation7_spill] sm:$0xff]  ;;  %v582_v31 = vld [vmem:[%s581_s23] sm:$0x1]  ;;  %1413 = vmatpush3.msra.mxu0 %v1690_v22  ;;  %v2310_v19 = vld [vmem:[#allocation17_spill] sm:$0xff]  ;;  %p576_p1 = scmp.ge.s32.totalorder %s577_s19, %s1601_s29 }
  0xba   : >> { %585 = vperm.xlu0 %1452, %v582_v31   ;;  %1414 = vmatprep.subr.mxu0 %v1503_v35  ;;  %v2309_v20 = vld [vmem:[#allocation18_spill] sm:$0xff]  ;;  %v2312_v3 = vld [vmem:[#allocation57_spill] sm:$0xff]  ;;  %v2313_v1 = vld [vmem:[#allocation56_spill] sm:$0xff] }
  0xbb   : >> { %1415 = vmatpush3.msra.mxu0 %v1685_v21  ;;  %v2314_v8 = vld [vmem:[#allocation47_spill] sm:$0xff]  ;;  %v2315_v10 = vld [vmem:[#allocation46_spill] sm:$0xff] }
  0xbc   : >> { %1416 = vmatprep.subr.mxu0 %v1503_v35  ;;  %v2311_v9 = vld [vmem:[#allocation60_spill] sm:$0xff] }
  0xbd   : >> { %1417 = vmatpush3.msra.mxu0 %v2309_v20 }
  0xbe   : >> { %1453 = vset.pattern.permute.xlu0 %v1502_v34  ;;  %1418 = vmatprep.subr.mxu0 %v1503_v35  ;;  %v1313_v34 = vcombine.high %v1700_v24, %v1710_v26  ;;  %v1315_v35 = vcombine.high %v1705_v25, %v1715_v27 }
  0xbf   : >> { %590 = vperm.xlu0 %1453, %v582_v31   ;;  %1419 = vmatpush3.msra.mxu0 %v2310_v19 }
  0xc0   : >> { %722 = vmatprep.subr.bf16.mxu1 %v1313_v34  ;;  %763 = vmatprep.subr.bf16.mxu0 %v1315_v35  ;;  %v1319_v35 = vcombine.high %v2307_v11, %v2305_v13 }
 0x135   : >> { %v586_v36 = vpop.permute.xlu0 %585 }
 0x136   : >> { %v588_v50 = vmul.f32 %v586_v36, %v2053_v30  ;;  %v1312_v36 = vcombine.low %v1700_v24, %v1710_v26 }
 0x138   : >> { %723 = vmatpush1.bf16.msra.mxu1 %v1312_v36  ;;  %v1321_v36 = vcombine.high %v2306_v12, %v2304_v14 }
 0x13a   : >> { %v591_v45 = vpop.permute.xlu0 %590 }
 0x13b   : >> { %v593_v51 = vmul.f32 %v591_v45, %v2058_v49  ;;  %v1314_v45 = vcombine.low %v1705_v25, %v1715_v27 }
 0x13d   : >> { %v594_v52 = vadd.f32 %v593_v51, %v588_v50  ;;  %v1323_v50 = vcombine.high %v2303_v15, %v2301_v17  ;;  %v1325_v51 = vcombine.high %v2302_v16, %v2300_v18 }
 0x13f   : >> { %v598_v4 = vrot.slane %v594_v52, %v2299_v0  ;;  %845 = vmatprep.subr.bf16.mxu1 %v1323_v50  ;;  %v1320_v50 = vcombine.low %v2306_v12, %v2304_v14 }
 0x141   : >> { %v599_v5 = vsub.f32 %v2311_v9, %v598_v4  ;;  %v2325_v9 = vld [vmem:[#allocation42_spill] sm:$0xff] }
 0x143   : >> { %v601_v7 = vmul.f32 0.01, %v599_v5  ;;  %vm600_vm3 = vcmp.ge.f32.partialorder %v599_v5, 0.0 }
 0x145   : >> { %v602_v31 = vsel %vm600_vm3, %v599_v5, %v601_v7  ;;  %v1322_v7 = vcombine.low %v2303_v15, %v2301_v17 }
 0x146   : >> { %1421 = vmatmul.mubr.msk.f32.vlgmr.msra.gmra.mxu0 %vm609_vm4, %v602_v31  ;;  %v1324_v31 = vcombine.low %v2302_v16, %v2300_v18 }
 0x147   : >> { %781 = vmatprep.mubr.bf16.mxu0 %v1501_v2  ;;  %764 = vmatpush1.bf16.msra.mxu0 %v1314_v45  ;;  %v1318_v45 = vcombine.low %v2307_v11, %v2305_v13 }
 0x148   : >> { %886 = vmatprep.subr.bf16.mxu0 %v1325_v51  ;;  %v1344_v51 = vcombine.low %v1875_v59, %v1880_v60 }
 0x206   : >> { %v679_v52 = vpop.f32.mrf.mxu0 }
 0x207   : >> { %v680_v4 = vadd.f32 %v1695_v23, %v679_v52  ;;  %v1360_v52 = vcombine.low %v2312_v3, %v2040_v33  ;;  %v2323_v3 = vld [vmem:[#allocation26_spill] sm:$0xff] }
 0x208   : >> { %v1422_v5 = vpop.f32.mrf.mxu0 }
 0x209   : >> { %v683_v34 = vpack.c.bf16 %v680_v4, %v680_v4  ;;  %v1336_v4 = vcombine.low %v1795_v43, %v1800_v44  ;;  %v1352_v5 = vcombine.low %v1955_v62, %v1960_v29 }
 0x20b   : >> { %1316 = vmatmul.mubr.msk.bf16.vlgmr.msra.gmra.mxu1 %vm704_vm5, %v683_v34  ;;  %1317 = vmatmul.mubr.msk.bf16.vlgmr.msra.gmra.mxu0 %vm704_vm5, %v683_v34  ;;  %v1351_v34 = vcombine.low %v1945_v28, %v1950_v61 }
 0x20c   : >> { %846 = vmatpush1.bf16.msra.mxu1 %v1322_v7  ;;  %887 = vmatpush1.bf16.msra.mxu0 %v1324_v31  ;;  %v1343_v7 = vcombine.low %v1865_v57, %v1870_v58  ;;  %v1359_v31 = vcombine.low %v2025_v48, %v2313_v1  ;;  %v2322_v1 = vld [vmem:[#allocation27_spill] sm:$0xff] }
 0x20d   : >> { %847 = vmatprep.subr.bf16.mxu1 %v1319_v35  ;;  %888 = vmatprep.subr.bf16.mxu0 %v1321_v36  ;;  %v1342_v35 = vcombine.low %v1855_v55, %v1860_v56  ;;  %v1358_v36 = vcombine.low %v2015_v63, %v2020_v47 }
 0x20e   : >> { %865 = vmatprep.mubr.bf16.mxu1 %v1501_v2  ;;  %906 = vmatprep.mubr.bf16.mxu0 %v1501_v2  ;;  %v1335_v2 = vcombine.low %v1785_v41, %v1790_v42 }
 0x210   : >> { %848 = vmatpush1.bf16.msra.mxu1 %v1318_v45  ;;  %889 = vmatpush1.bf16.msra.mxu0 %v1320_v50  ;;  %v1334_v45 = vcombine.low %v1775_v39, %v1780_v40  ;;  %v1350_v50 = vcombine.low %v2315_v10, %v2314_v8  ;;  %v2324_v8 = vld [vmem:[#allocation43_spill] sm:$0xff] }
 0x211   : >> { %1368 = vmatprep.subr.bf16.mxu1 %v1344_v51  ;;  %1390 = vmatprep.subr.bf16.mxu0 %v1360_v52  ;;  %v1341_v51 = vcombine.low %v1845_v53, %v1850_v54  ;;  %v1357_v52 = vcombine.low %v2005_v32, %v2010_v46  ;;  %v1348_v10 = vcombine.low %v2325_v9, %v2324_v8  ;;  %v2334_v8 = vld [vmem:[#allocation31_spill] sm:$0xff]  ;;  %v2335_v9 = vld [vmem:[#allocation30_spill] sm:$0xff] }
 0x213   : >> { %1326 = vmatmul.mubr.msk.bf16.vlgmr.msra.gmra.mxu1 %vm609_vm4, %v2308_v6  ;;  %1327 = vmatmul.mubr.msk.bf16.vlgmr.msra.gmra.mxu0 %vm609_vm4, %v2308_v6  ;;  %v1332_v6 = vcombine.low %v2323_v3, %v2322_v1  ;;  %v2333_v1 = vld [vmem:[#allocation40_spill] sm:$0xff] }
 0x214   : >> { %1369 = vmatpush3.bf16.msra.mxu1 %v1336_v4  ;;  %1391 = vmatpush3.bf16.msra.mxu0 %v1352_v5  ;;  %v1333_v4 = vcombine.low %v1765_v37, %v1770_v38  ;;  %v2316_v5 = vld [vmem:[#allocation45_spill] sm:$0xff] }
 0x215   : >> { %1370 = vmatprep.subr.bf16.mxu1 %v1343_v7  ;;  %1392 = vmatprep.subr.bf16.mxu0 %v1359_v31  ;;  %v2317_v7 = vld [vmem:[#allocation44_spill] sm:$0xff] }
 0x216   : >> { %v1349_v31 = vcombine.low %v2317_v7, %v2316_v5  ;;  %v2328_v5 = vld [vmem:[#allocation53_spill] sm:$0xff]  ;;  %v2329_v7 = vld [vmem:[#allocation52_spill] sm:$0xff] }
 0x218   : >> { %1371 = vmatpush3.bf16.msra.mxu1 %v1335_v2  ;;  %1393 = vmatpush3.bf16.msra.mxu0 %v1351_v34  ;;  %v2318_v2 = vld [vmem:[#allocation35_spill] sm:$0xff]  ;;  %v2319_v34 = vld [vmem:[#allocation34_spill] sm:$0xff] }
 0x219   : >> { %1372 = vmatprep.subr.bf16.mxu1 %v1342_v35  ;;  %1394 = vmatprep.subr.bf16.mxu0 %v1358_v36  ;;  %v1340_v35 = vcombine.low %v2319_v34, %v2318_v2  ;;  %v2320_v36 = vld [vmem:[#allocation55_spill] sm:$0xff]  ;;  %v2330_v2 = vld [vmem:[#allocation25_spill] sm:$0xff]  ;;  %v2331_v34 = vld [vmem:[#allocation24_spill] sm:$0xff] }
 0x21c   : >> { %1373 = vmatpush3.bf16.msra.mxu1 %v1334_v45  ;;  %1395 = vmatpush3.bf16.msra.mxu0 %v1350_v50  ;;  %v2321_v45 = vld [vmem:[#allocation54_spill] sm:$0xff] }
 0x21d   : >> { %1374 = vmatprep.subr.bf16.mxu1 %v1341_v51  ;;  %1396 = vmatprep.subr.bf16.mxu0 %v1357_v52  ;;  %v1356_v50 = vcombine.low %v2321_v45, %v2320_v36  ;;  %v2326_v51 = vld [vmem:[#allocation33_spill] sm:$0xff]  ;;  %v2327_v52 = vld [vmem:[#allocation32_spill] sm:$0xff]  ;;  %v1331_v36 = vcombine.low %v2331_v34, %v2330_v2 }
 0x21e   : >> { %v2332_v45 = vld [vmem:[#allocation41_spill] sm:$0xff]  ;;  %v2343_v2 = vld [vmem:[#allocation28_spill] sm:$0xff] }
 0x21f   : >> { %v1347_v3 = vcombine.low %v2333_v1, %v2332_v45  ;;  %v2345_v45 = vld [vmem:[#allocation48_spill] sm:$0xff] }
 0x220   : >> { %1375 = vmatpush3.bf16.msra.mxu1 %v1333_v4  ;;  %1397 = vmatpush3.bf16.msra.mxu0 %v1349_v31  ;;  %v1339_v4 = vcombine.low %v2327_v52, %v2326_v51  ;;  %v1355_v31 = vcombine.low %v2329_v7, %v2328_v5  ;;  %v2338_v51 = vld [vmem:[#allocation23_spill] sm:$0xff]  ;;  %v2339_v52 = vld [vmem:[#allocation22_spill] sm:$0xff] }
 0x221   : >> { %1376 = vmatprep.subr.bf16.mxu1 %v1340_v35  ;;  %1398 = vmatprep.subr.bf16.mxu0 %v1356_v50  ;;  %v2337_v35 = vld [vmem:[#allocation50_spill] sm:$0xff]  ;;  %v1330_v11 = vcombine.low %v2339_v52, %v2338_v51  ;;  %v2340_v5 = vld [vmem:[#allocation39_spill] sm:$0xff] }
 0x222   : >> { %v2350_v52 = vld [vmem:[#allocation6_spill] sm:$0xff] }
 0x224   : >> { %1377 = vmatpush3.bf16.msra.mxu1 %v1332_v6  ;;  %1399 = vmatpush3.bf16.msra.mxu0 %v1348_v10  ;;  %v1338_v6 = vcombine.low %v2335_v9, %v2334_v8  ;;  %v2336_v10 = vld [vmem:[#allocation51_spill] sm:$0xff]  ;;  %v2347_v8 = vld [vmem:[#allocation20_spill] sm:$0xff] }
 0x225   : >> { %1378 = vmatprep.subr.bf16.mxu1 %v1339_v4  ;;  %1400 = vmatprep.subr.bf16.mxu0 %v1355_v31  ;;  %v1354_v50 = vcombine.low %v2337_v35, %v2336_v10  ;;  %v2341_v4 = vld [vmem:[#allocation38_spill] sm:$0xff]  ;;  %v2342_v31 = vld [vmem:[#allocation29_spill] sm:$0xff]  ;;  %v2349_v35 = vld [vmem:[#allocation36_spill] sm:$0xff] }
 0x226   : >> { %v1346_v7 = vcombine.low %v2341_v4, %v2340_v5  ;;  %v1337_v34 = vcombine.low %v2343_v2, %v2342_v31  ;;  %v2348_v10 = vld [vmem:[#allocation37_spill] sm:$0xff]  ;;  %v926_v5 = vsub.s32 2, %v2350_v52 }
 0x227   : >> { %v1345_v12 = vcombine.low %v2349_v35, %v2348_v10 }
 0x228   : >> { %1379 = vmatpush3.bf16.msra.mxu1 %v1331_v36  ;;  %1401 = vmatpush3.bf16.msra.mxu0 %v1347_v3  ;;  %v2344_v36 = vld [vmem:[#allocation49_spill] sm:$0xff] }
 0x229   : >> { %1380 = vmatprep.subr.bf16.mxu1 %v1338_v6  ;;  %1402 = vmatprep.subr.bf16.mxu0 %v1354_v50  ;;  %v1353_v1 = vcombine.low %v2345_v45, %v2344_v36  ;;  %v2346_v3 = vld [vmem:[#allocation21_spill] sm:$0xff]  ;;  %v922_v36 = vsub.s32 1, %v2350_v52  ;;  %v930_v45 = vsub.s32 3, %v2350_v52 }
 0x22a   : >> { %v1329_v9 = vcombine.low %v2347_v8, %v2346_v3  ;;  %v2351_v3 = vld [vmem:[#allocation19_spill] sm:$0xff] }
 0x22b   : >> { %v923_v13 = vrot.slane %v2351_v3, %v922_v36 }
 0x22c   : >> { %1381 = vmatpush3.bf16.msra.mxu1 %v1330_v11  ;;  %1403 = vmatpush3.bf16.msra.mxu0 %v1346_v7 }
 0x22d   : >> { %1382 = vmatprep.subr.bf16.mxu1 %v1337_v34  ;;  %1404 = vmatprep.subr.bf16.mxu0 %v1353_v1  ;;  %v919_v34 = vrot.slane %v2351_v3, %v2299_v0  ;;  %v927_v1 = vrot.slane %v2351_v3, %v926_v5 }
 0x230   : >> { %1383 = vmatpush3.bf16.msra.mxu1 %v1329_v9  ;;  %1405 = vmatpush3.bf16.msra.mxu0 %v1345_v12 }
 0x2cb   : >> { %v742_v6 = vpop.f32.mrf.mxu1  ;;  %v783_v50 = vpop.f32.mrf.mxu0 }
 0x2cd   : >> { %v744_v11 = vpop.f32.mrf.mxu1  ;;  %v785_v51 = vpop.f32.mrf.mxu0 }
 0x2cf   : >> { %v746_v4 = vpop.f32.mrf.mxu1  ;;  %v787_v7 = vpop.f32.mrf.mxu0 }
 0x2d0   : >> { %v931_v7 = vrot.slane %v2351_v3, %v930_v45 }
 0x2d1   : >> { %v747_v31 = vpop.f32.mrf.mxu1  ;;  %v788_v2 = vpop.f32.mrf.mxu0 }
 0x2d3   : >> { %v867_v12 = vpop.f32.mrf.mxu1  ;;  %v908_v8 = vpop.f32.mrf.mxu0 }
 0x2d4   : >> { %v868_v9 = vadd.f32 %v867_v12, %v742_v6  ;;  %v909_v10 = vadd.f32 %v908_v8, %v783_v50 }
 0x2d5   : >> { %v869_v35 = vpop.f32.mrf.mxu1  ;;  %v910_v4 = vpop.f32.mrf.mxu0 }
 0x2d6   : >> { %v936_v31 = vadd.f32 %v919_v34, %v868_v9  ;;  %v938_v2 = vadd.f32 %v927_v1, %v909_v10  ;;  %v870_v14 = vadd.f32 %v869_v35, %v744_v11  ;;  %v911_v15 = vadd.f32 %v910_v4, %v785_v51 }
 0x2d7   : >> { %v871_v16 = vpop.f32.mrf.mxu1  ;;  %v912_v17 = vpop.f32.mrf.mxu0 }
 0x2d8   : >> { %v944_v18 = vmul.f32 0.01, %v936_v31  ;;  %v946_v0 = vmul.f32 0.01, %v938_v2  ;;  %vm940_vm6 = vcmp.ge.f32.partialorder %v936_v31, 0.0  ;;  %vm942_vm7 = vcmp.ge.f32.partialorder %v938_v2, 0.0 }
 0x2d9   : >> { %v937_v5 = vadd.f32 %v923_v13, %v870_v14  ;;  %v939_v19 = vadd.f32 %v931_v7, %v911_v15  ;;  %v872_v6 = vpop.f32.mrf.mxu1  ;;  %v913_v50 = vpop.f32.mrf.mxu0 }
 0x2da   : >> { %v948_v36 = vsel %vm940_vm6, %v936_v31, %v944_v18  ;;  %v950_v20 = vsel %vm942_vm7, %v938_v2, %v946_v0  ;;  %v2352_v0 = vld [vmem:[#allocation58_spill] sm:$0xff] }
 0x2db   : >> { %v945_v12 = vmul.f32 0.01, %v937_v5  ;;  %v947_v8 = vmul.f32 0.01, %v939_v19  ;;  %vm941_vm8 = vcmp.ge.f32.partialorder %v937_v5, 0.0  ;;  %vm943_vm9 = vcmp.ge.f32.partialorder %v939_v19, 0.0 }
 0x2dc   : >> { %v952_v16 = vpack.c.bf16 %v948_v36, %v948_v36  ;;  %v954_v17 = vpack.c.bf16 %v950_v20, %v950_v20 }
 0x2dd   : >> { %v949_v45 = vsel %vm941_vm8, %v937_v5, %v945_v12  ;;  %v951_v34 = vsel %vm943_vm9, %v939_v19, %v947_v8 }
 0x2de   : >> { %v953_v11 = vpack.c.bf16 %v949_v45, %v949_v45  ;;  %v955_v51 = vpack.c.bf16 %v951_v34, %v951_v34 }
 0x2e0   : >> { %1186 = vmatprep.mubr.bf16.mxu1 %v953_v11  ;;  %1226 = vmatprep.mubr.bf16.mxu0 %v955_v51 }
 0x2e1   : >> { %1187 = vmatmul.mubr.bf16.vlgmr.msra.gmra.mxu1 %v952_v16  ;;  %1227 = vmatmul.mubr.bf16.vlgmr.msra.gmra.mxu0 %v954_v17 }
 0x3a1   : >> { %v1384_v13 = vpop.f32.mrf.mxu1  ;;  %v1406_v14 = vpop.f32.mrf.mxu0 }
 0x3a3   : >> { %v1385_v15 = vpop.f32.mrf.mxu1  ;;  %v1407_v1 = vpop.f32.mrf.mxu0 }
 0x3a4   : >> { %v1386_v9 = vadd.f32 %v1385_v15, %v1384_v13  ;;  %v1408_v19 = vadd.f32 %v1407_v1, %v1406_v14 }
 0x3a5   : >> { %v1387_v10 = vpop.f32.mrf.mxu1  ;;  %v1409_v18 = vpop.f32.mrf.mxu0 }
 0x3a6   : >> { %v1189_v35 = vadd.f32 %v1386_v9, %v2352_v0 }
 0x3a7   : >> { %v1388_v4 = vpop.f32.mrf.mxu1  ;;  %v1410_v7 = vpop.f32.mrf.mxu0 }
 0x3a8   : >> { %v1229_v31 = vadd.f32 %v1408_v19, %v1189_v35 }
 0x3aa   : >> { %vm1234_vm10 = vcmp.ge.f32.partialorder %v1229_v31, 0.0  ;;  %v1235_v20 = vmul.f32 0.01, %v1229_v31 }
 0x3ac   : >> { %v1236_v2 = vsel %vm1234_vm10, %v1229_v31, %v1235_v20 }
 0x3ad   : >> { %v1239_v6 = vsel %vm1621_vm0, %v1236_v2, -1e+30 }
 0x3ae   : >> { %v1240_v50 = vsel %vm434_vm1, %v1239_v6, -inf }
 0x3af   : >> { %v1241_v12 = vrot.slane %v1240_v50, 4 }
 0x3b1   : >> { %v1242_v8 = vmax.f32 %v1240_v50, %v1241_v12 }
 0x3b3   : >> { %v1243_v36 = vrot.slane %v1242_v8, 2 }
 0x3b5   : >> { %v1244_v45 = vmax.f32 %v1242_v8, %v1243_v36 }
 0x3b7   : >> { %v1245_v34 = vrot.slane %v1244_v45, 1  ;;  %579 = sbr.rel (!%p576_p1) target bundleno = 182 (0xb6), region = 111 }
 0x3b9   : >> { %v1246_v11 = vmax.f32 %v1244_v45, %v1245_v34 }
 0x3bb   : >> { %1249 = vst.msk [vmem:[%s1247_s24] sm:$0x1] %vm1248_vm11, %v1246_v11 }
 0x3bc PF: > { %s35_s1 = sadd.s32 1, %s1490_s1  }
 0x3bd   : > { %p32_p2 = scmp.ge.s32.totalorder %s35_s1, 4  }
 0x3bf   :  { %34 = sbr.rel (!%p32_p2) target bundleno = 26 (0x1a), region = 122 }

// kernel: _lambda_.5
= control target key start
LH: loop header
LB: loop body
LE: loop exit
PB: predicated region body
PF: predicated region fallthrough
CT: control target
= control target key end

     0   :  { %v3817_v0 = vmov 0.0   ;;  %vm75_vm0 = vcmask 261120   ;;  %vm3818_vm1 = vmmov 0   ;;  %v3819_v13 = vmov 0   ;;  %s3821_s24 = smov 32   ;;  %s4733_s6 = inlined_call_operand.vmem [shape: f32[32,64], index: 6, kind: input, shape index: {}]   ;;  %s4734_s5 = inlined_call_operand.vmem [shape: f32[32,64], index: 5, kind: input, shape index: {}]   ;;  %s4735_s1 = inlined_call_operand.vmem [shape: f32[8,32], index: 1, kind: input, shape index: {}]   ;;  %s4736_s0 = inlined_call_operand.vmem [shape: f32[8,32], index: 0, kind: input, shape index: {}]   ;;  %s4737_s3 = inlined_call_operand.vmem [shape: f32[8,2], index: 3, kind: input, shape index: {}]   ;;  %s4738_s4 = inlined_call_operand.vmem [shape: f32[8,8,1], index: 4, kind: input, shape index: {}]   ;;  %s4739_s8 = inlined_call_operand.vmem [shape: f32[64,32], index: 8, kind: input, shape index: {}]   ;;  %s4740_s13 = inlined_call_operand.vmem [shape: f32[32,16], index: 13, kind: input, shape index: {}]   ;;  %s4741_s10 = inlined_call_operand.vmem [shape: f32[2,32], index: 10, kind: input, shape index: {}]   ;;  %s4742_s11 = inlined_call_operand.vmem [shape: f32[1,32], index: 11, kind: input, shape index: {}]   ;;  %s4743_s12 = inlined_call_operand.vmem [shape: f32[1,32], index: 12, kind: input, shape index: {}]   ;;  %s4744_s7 = inlined_call_operand.vmem [shape: f32[1,64], index: 7, kind: input, shape index: {}]   ;;  %s4745_s16 = inlined_call_operand.vmem [shape: f32[32,128], index: 16, kind: input, shape index: {}]   ;;  %s4746_s9 = inlined_call_operand.vmem [shape: f32[1,32], index: 9, kind: input, shape index: {}]   ;;  %s4747_s2 = inlined_call_operand.vmem [shape: f32[8,32], index: 2, kind: input, shape index: {}]   ;;  %s4748_s15 = inlined_call_operand.vmem [shape: f32[16,128], index: 15, kind: input, shape index: {}]   ;;  %s4749_s14 = inlined_call_operand.vmem [shape: f32[1,16], index: 14, kind: input, shape index: {}]   ;;  %s4750_s17 = inlined_call_operand.vmem [shape: f32[1,128], index: 17, kind: input, shape index: {}]   ;;  %s4751_s18 = inlined_call_operand.vmem [shape: f32[32,2], index: 18, kind: input, shape index: {}]   ;;  %s4752_s19 = inlined_call_operand.vmem [shape: f32[1,2], index: 19, kind: input, shape index: {}]   ;;  %s4753_s20 = inlined_call_operand.vmem [shape: f32[8,8,2], index: 20, kind: output, shape index: {}]  }
   0x1   :  { %4756 = sst [smem:[#allocation2_spill]] %s4733_s6  ;;  %3349 = vmatprep.subr.mxu0 %v3817_v0  ;;  %3360 = vmatprep.subr.mxu1 %v3817_v0  ;;  %v345_v12 = vld [vmem:[%s4738_s4] sm:$0xff]  ;;  %v238_v14 = vld [vmem:[%s4739_s8 + $0x38] sm:$0xff]  ;;  %v237_v15 = vld [vmem:[%s4739_s8 + $0x30] sm:$0xff]  ;;  %v3820_v16 = vmov 1   ;;  %vm246_vm3 = vcmask 523264  }
   0x2   :  { %4757 = sst [smem:[#allocation3_spill]] %s4734_s5  ;;  %3357 = vmatprep.mubr.msk.f32.mxu0 %vm3818_vm1, %v3817_v0  ;;  %3368 = vmatprep.mubr.msk.f32.mxu1 %vm3818_vm1, %v3817_v0  ;;  %v236_v17 = vld [vmem:[%s4739_s8 + $0x28] sm:$0xff]  ;;  %v235_v18 = vld [vmem:[%s4739_s8 + $0x20] sm:$0xff]  ;;  %v4006_v19 = vld [vmem:[%s4740_s13 + $0x18] sm:$0xff]  ;;  %vm541_vm4 = vcmask 130048   ;;  %vm3114_vm5 = vcmask 15360  }
   0x3   :  { %4758 = sst [smem:[#allocation4_spill]] %s4735_s1  ;;  %3716 = vset.pattern.permute.xlu0 %v3819_v13  ;;  %3718 = vset.pattern.permute.xlu1 %v3819_v13  ;;  %v234_v20 = vld [vmem:[%s4739_s8 + $0x18] sm:$0xff]  ;;  %v4018_v21 = vld [vmem:[%s4740_s13 + $0x10] sm:$0xff]  ;;  %v4029_v23 = vld [vmem:[%s4740_s13 + $0x8] sm:$0xff] }
   0x4   :  { %4759 = sst [smem:[#allocation5_spill]] %s4736_s0  ;;  %368 = vperm.xlu1 %3718, %v345_v12   ;;  %v233_v22 = vld [vmem:[%s4739_s8 + $0x10] sm:$0xff]  ;;  %v232_v24 = vld [vmem:[%s4739_s8 + $0x8] sm:$0xff]  ;;  %v4040_v25 = vld [vmem:[%s4740_s13] sm:$0xff] }
   0x5   :  { %4760 = sst [smem:[#allocation6_spill]] %s4737_s3  ;;  %v231_v26 = vld [vmem:[%s4739_s8] sm:$0xff]  ;;  %v4092_v50 = vld [vmem:[%s4745_s16 + $0x18] sm:$0xff]  ;;  %v4099_v51 = vld [vmem:[%s4745_s16 + $0x10] sm:$0xff] }
   0x6   :  { %s4761_s23 = sld [smem:[#allocation2_spill]]  ;;  %v4052_v28 = vld [vmem:[%s4741_s10] ss:$0 sm:$0xff]  ;;  %v4057_v29 = vld [vmem:[%s4741_s10 + $0x1] ss:$0 sm:$0xff]  ;;  %v4106_v52 = vld [vmem:[%s4745_s16 + $0x8] sm:$0xff] }
   0x7   :  { %s4762_s25 = sld [smem:[#allocation3_spill]]  ;;  %v4062_v30 = vld [vmem:[%s4742_s11] ss:$0 sm:$0xff]  ;;  %v4126_v63 = vld [vmem:[%s4748_s15 + $0x8] sm:$0xff] }
   0x8   :  { %s4763_s26 = sld [smem:[#allocation4_spill]]  ;;  %3720 = vset.pattern.permute.xlu1 %v3820_v16  ;;  %v4070_v37 = vld [vmem:[%s4743_s12] ss:$0 sm:$0xff] }
   0x9   :  { %s4764_s3 = sld [smem:[#allocation5_spill]]  ;;  %v3129_v44 = vld [vmem:[%s4744_s7] ss:$0 sm:$0xff] }
   0xa   :  { %s4765_s29 = sld [smem:[#allocation6_spill]]  ;;  %v4113_v53 = vld [vmem:[%s4745_s16] sm:$0xff] }
   0xb   :  { %v3130_v56 = vld [vmem:[%s4746_s9] ss:$0 sm:$0xff] }
   0xc   :  { %v74_v1 = vld [vmem:[%s4761_s23 + $0x18] sm:$0xff]  ;;  %v73_v3 = vld [vmem:[%s4761_s23 + $0x10] sm:$0xff]  ;;  %v72_v5 = vld [vmem:[%s4761_s23 + $0x8] sm:$0xff] }
   0xd   :  { %v69_v2 = vld [vmem:[%s4762_s25 + $0x18] sm:$0xff]  ;;  %3350 = vmatpush3.msra.mxu0 %v74_v1  ;;  %v68_v4 = vld [vmem:[%s4762_s25 + $0x10] sm:$0xff]  ;;  %v67_v6 = vld [vmem:[%s4762_s25 + $0x8] sm:$0xff] }
   0xe   :  { %3361 = vmatpush3.msra.mxu1 %v69_v2  ;;  %3351 = vmatprep.subr.mxu0 %v3817_v0  ;;  %v71_v7 = vld [vmem:[%s4761_s23] sm:$0xff] }
   0xf   :  { %3362 = vmatprep.subr.mxu1 %v3817_v0  ;;  %3352 = vmatpush3.msra.mxu0 %v73_v3  ;;  %v66_v8 = vld [vmem:[%s4762_s25] sm:$0xff] }
  0x10   :  { %3363 = vmatpush3.msra.mxu1 %v68_v4  ;;  %3353 = vmatprep.subr.mxu0 %v3817_v0  ;;  %v70_v9 = vld [vmem:[%s4763_s26] sm:$0xff] }
  0x11   :  { %3364 = vmatprep.subr.mxu1 %v3817_v0  ;;  %3354 = vmatpush3.msra.mxu0 %v72_v5  ;;  %v65_v10 = vld [vmem:[%s4764_s3] sm:$0xff] }
  0x12   :  { %3365 = vmatpush3.msra.mxu1 %v67_v6  ;;  %3355 = vmatprep.subr.mxu0 %v3817_v0  ;;  %v344_v11 = vld [vmem:[%s4765_s29] sm:$0xff]  ;;  %s3822_s29 = smov 64  }
  0x13   :  { %3366 = vmatprep.subr.mxu1 %v3817_v0  ;;  %3356 = vmatpush3.msra.mxu0 %v71_v7  ;;  %v321_v59 = vld [vmem:[%s4747_s2] sm:$0xff] }
  0x14   :  { %3367 = vmatpush3.msra.mxu1 %v66_v8  ;;  %3358 = vmatmul.mubr.msk.f32.vlgmr.msra.gmra.mxu0 %vm75_vm0, %v70_v9  ;;  %v4131_v1 = vld [vmem:[%s4749_s14] ss:$0 sm:$0xff] }
  0x15   :  { %3369 = vmatmul.mubr.msk.f32.vlgmr.msra.gmra.mxu1 %vm75_vm0, %v65_v10  ;;  %348 = vperm.xlu0 %3716, %v344_v11   ;;  %v4137_v2 = vld [vmem:[%s4748_s15] sm:$0xff] }
  0x16   :  { %3371 = vmatprep.subr.mxu0 %v3817_v0  ;;  %3390 = vmatprep.subr.mxu1 %v3817_v0  ;;  %v4152_v6 = vld [vmem:[%s4750_s17] ss:$0 sm:$0xff] }
  0x17   :  { %3372 = vmatpush3.msra.mxu0 %v238_v14  ;;  %3398 = vmatprep.mubr.msk.f32.mxu1 %vm3818_vm1, %v3817_v0 }
  0x18   :  { %3373 = vmatprep.subr.mxu0 %v3817_v0  ;;  %3387 = vmatprep.mubr.msk.f32.mxu0 %vm3818_vm1, %v3817_v0 }
  0x19   :  { %3717 = vset.pattern.permute.xlu0 %v3820_v16  ;;  %3374 = vmatpush3.msra.mxu0 %v237_v15 }
  0x1a   :  { %357 = vperm.xlu0 %3717, %v344_v11   ;;  %3375 = vmatprep.subr.mxu0 %v3817_v0 }
  0x1b   :  { %3376 = vmatpush3.msra.mxu0 %v236_v17  ;;  %3391 = vmatpush3.msra.mxu1 %v4006_v19 }
  0x1c   :  { %3377 = vmatprep.subr.mxu0 %v3817_v0  ;;  %3392 = vmatprep.subr.mxu1 %v3817_v0 }
  0x1d   :  { %3378 = vmatpush3.msra.mxu0 %v235_v18  ;;  %3393 = vmatpush3.msra.mxu1 %v4018_v21 }
  0x1e   :  { %3719 = vset.pattern.permute.xlu0 %v3819_v13  ;;  %3379 = vmatprep.subr.mxu0 %v3817_v0 }
  0x1f   :  { %3380 = vmatpush3.msra.mxu0 %v234_v20  ;;  %3394 = vmatprep.subr.mxu1 %v3817_v0 }
  0x20   :  { %3381 = vmatprep.subr.mxu0 %v3817_v0  ;;  %3395 = vmatpush3.msra.mxu1 %v4029_v23 }
  0x21   :  { %3382 = vmatpush3.msra.mxu0 %v233_v22  ;;  %3396 = vmatprep.subr.mxu1 %v3817_v0 }
  0x22   :  { %3383 = vmatprep.subr.mxu0 %v3817_v0  ;;  %3397 = vmatpush3.msra.mxu1 %v4040_v25 }
  0x23   :  { %3384 = vmatpush3.msra.mxu0 %v232_v24  ;;  %3401 = vmatprep.subr.mxu1 %v3817_v0 }
  0x24   :  { %3385 = vmatprep.subr.mxu0 %v3817_v0 }
  0x25   :  { %3386 = vmatpush3.msra.mxu0 %v231_v26 }
  0x26   :  { %3430 = vmatprep.subr.mxu0 %v3817_v0 }
  0x7f   :  { %v369_v31 = vpop.permute.xlu1 %368 }
  0x80   :  { %v377_v35 = vmul.f32 %v4062_v30, %v369_v31  ;;  %v4168_v31 = vld [vmem:[%s4751_s18 + $0x10] sm:$0xff] }
  0x90   :  { %v349_v27 = vpop.permute.xlu0 %348 }
  0x91   :  { %v355_v32 = vmul.f32 %v4052_v28, %v349_v27  ;;  %v4163_v27 = vld [vmem:[%s4751_s18 + $0x18] sm:$0xff] }
  0x95   :  { %v358_v33 = vpop.permute.xlu0 %357 }
  0x96   :  { %v364_v34 = vmul.f32 %v4057_v29, %v358_v33  ;;  %v4182_v33 = vld [vmem:[%s4751_s18] sm:$0xff] }
  0x98   :  { %v365_v36 = vadd.f32 %v364_v34, %v355_v32  ;;  %v4175_v32 = vld [vmem:[%s4751_s18 + $0x8] sm:$0xff] }
  0x9a   :  { %v378_v38 = vadd.f32 %v377_v35, %v365_v36 }
  0x9c   :  { %v385_v39 = vadd.f32 %v4070_v37, %v378_v38 }
  0x9e   :  { %v387_v40 = vmul.f32 0.01, %v385_v39  ;;  %vm386_vm2 = vcmp.ge.f32.partialorder %v385_v39, 0.0 }
  0xa0   :  { %v388_v41 = vsel %vm386_vm2, %v385_v39, %v387_v40  ;;  %v4215_v39 = vld [vmem:[%s4752_s19] ss:$0 sm:$0xff] }
  0xa1   :  { %3399 = vmatmul.mubr.msk.f32.vlgmr.msra.gmra.mxu1 %vm75_vm0, %v388_v41 }
  0xa2   :  { %3409 = vmatprep.mubr.msk.f32.mxu1 %vm3818_vm1, %v3817_v0  ;;  %3402 = vmatpush3.msra.mxu1 %v4092_v50 }
  0xa3   :  { %3403 = vmatprep.subr.mxu1 %v3817_v0 }
  0xa4   :  { %3404 = vmatpush3.msra.mxu1 %v4099_v51 }
  0xa5   :  { %3405 = vmatprep.subr.mxu1 %v3817_v0 }
  0xa6   :  { %3406 = vmatpush3.msra.mxu1 %v4106_v52 }
  0xa7   :  { %3407 = vmatprep.subr.mxu1 %v3817_v0 }
  0xa8   :  { %3408 = vmatpush3.msra.mxu1 %v4113_v53 }
  0xa9   :  { %3412 = vmatprep.subr.mxu1 %v3817_v0 }
  0xd4   :  { %v145_v42 = vpop.f32.mrf.mxu0 }
  0xd5   :  { %v218_v43 = vpop.f32.mrf.mxu1 }
  0xd6   :  { %v219_v45 = vadd.f32 %v218_v43, %v145_v42  ;;  %v3359_v46 = vpop.f32.mrf.mxu0  ;;  %v3144_v43 = vld [vmem:[%s4738_s4 + $0x8] sm:$0xff] }
  0xd7   :  { %v3370_v47 = vpop.f32.mrf.mxu1 }
  0xd8   :  { %v229_v48 = vadd.f32 %v3129_v44, %v219_v45 }
  0xda   :  { %v230_v49 = vmax.f32 %v229_v48, 0.0 }
  0xdc   :  { %3388 = vmatmul.mubr.msk.f32.vlgmr.msra.gmra.mxu0 %vm246_vm3, %v230_v49 }
  0xdd   :  { %3431 = vmatpush3.msra.mxu0 %v4006_v19  ;;  %3438 = vmatprep.mubr.msk.f32.mxu0 %vm3818_vm1, %v3817_v0 }
  0xde   :  { %3432 = vmatprep.subr.mxu0 %v3817_v0 }
  0xdf   :  { %3433 = vmatpush3.msra.mxu0 %v4018_v21 }
  0xe0   :  { %3434 = vmatprep.subr.mxu0 %v3817_v0 }
  0xe1   :  { %3435 = vmatpush3.msra.mxu0 %v4029_v23 }
  0xe2   :  { %3436 = vmatprep.subr.mxu0 %v3817_v0 }
  0xe3   :  { %3437 = vmatpush3.msra.mxu0 %v4040_v25 }
  0xe4   :  { %3452 = vmatprep.subr.mxu0 %v3817_v0 }
 0x161   :  { %v464_v54 = vpop.f32.mrf.mxu1 }
 0x162   :  { %v465_v3 = vadd.f32 %v4131_v1, %v464_v54 }
 0x163   :  { %v3400_v55 = vpop.f32.mrf.mxu1 }
 0x19c   :  { %v316_v57 = vpop.f32.mrf.mxu0 }
 0x19d   :  { %v317_v58 = vadd.f32 %v3130_v56, %v316_v57 }
 0x19e   :  { %v3389_v60 = vpop.f32.mrf.mxu0 }
 0x19f   :  { %v320_v61 = vmax.f32 %v317_v58, 0.0 }
 0x1a1   :  { %v322_v62 = vadd.f32 %v321_v59, %v320_v61 }
 0x1a3   :  { %3410 = vmatmul.mubr.msk.f32.vlgmr.msra.gmra.mxu1 %vm75_vm0, %v322_v62 }
 0x1a4   :  { %3413 = vmatpush3.msra.mxu1 %v4126_v63  ;;  %3416 = vmatprep.mubr.msk.f32.mxu1 %vm3818_vm1, %v3817_v0 }
 0x1a5   :  { %3414 = vmatprep.subr.mxu1 %v3817_v0 }
 0x1a6   :  { %3415 = vmatpush3.msra.mxu1 %v4137_v2 }
 0x1a7   :  { %3417 = vmatmul.mubr.msk.f32.vlgmr.msra.gmra.mxu1 %vm541_vm4, %v465_v3  ;;  %3419 = vmatprep.subr.mxu1 %v3817_v0 }
 0x1a8   :  { %3427 = vmatprep.mubr.msk.f32.mxu1 %vm3818_vm1, %v3817_v0  ;;  %3420 = vmatpush3.msra.mxu1 %v4163_v27 }
 0x1a9   :  { %3421 = vmatprep.subr.mxu1 %v3817_v0 }
 0x1aa   :  { %3422 = vmatpush3.msra.mxu1 %v4168_v31 }
 0x1ab   :  { %3423 = vmatprep.subr.mxu1 %v3817_v0 }
 0x1ac   :  { %3424 = vmatpush3.msra.mxu1 %v4175_v32 }
 0x1ad   :  { %3425 = vmatprep.subr.mxu1 %v3817_v0 }
 0x1ae   :  { %3426 = vmatpush3.msra.mxu1 %v4182_v33 }
 0x1af   :  { %3441 = vmatprep.subr.mxu1 %v3817_v0 }
 0x263   :  { %v537_v4 = vpop.f32.mrf.mxu1 }
 0x265   :  { %v3411_v5 = vpop.f32.mrf.mxu1 }
 0x267   :  { %v611_v7 = vpop.f32.mrf.mxu1 }
 0x268   :  { %v612_v8 = vadd.f32 %v611_v7, %v537_v4 }
 0x269   :  { %v3418_v9 = vpop.f32.mrf.mxu1 }
 0x26a   :  { %v621_v10 = vadd.f32 %v4152_v6, %v612_v8 }
 0x26c   :  { %3732 = vtanh.f32 %v621_v10  ;;  %v3141_v12 = vmul.f32 -1.442695, %v621_v10 }
 0x26e   :  { %3734 = vpow2.f32 %v3141_v12 }
 0x279   :  { %v3733_v11 = vpop.eup %3732 }
 0x27a   :  { %631 = vrot.lane.b32.xlu1 %v3733_v11, %s3821_s24 }
 0x27b   :  { %v3735_v14 = vpop.eup %3734 }
 0x27c   :  { %v625_v15 = vadd.f32 1.0, %v3735_v14 }
 0x27e   :  { %3736 = vrcp.f32 %v625_v15 }
 0x28b   :  { %v3737_v17 = vpop.eup %3736 }
 0x28c   :  { %v629_v22 = vmul.f32 0.0, %v3737_v17 }
 0x2ec   :  { %v632_v18 = vpop.permute.xlu1 %631 }
 0x2ed   :  { %v634_v20 = vmul.f32 %v3737_v17, %v632_v18 }
 0x2ef   :  { %636 = vrot.lane.b32.xlu1 %v634_v20, %s3821_s24 }
 0x361   :  { %v637_v24 = vpop.permute.xlu1 %636 }
 0x362   :  { %v4157_v26 = vadd.f32 %v637_v24, %v629_v22 }
 0x364   :  { %3738 = vtanh.f32 %v4157_v26 }
 0x371   :  { %v3739_v34 = vpop.eup %3738 }
 0x372   :  { %642 = vrot.lane.b32.xlu0 %v3739_v34, %s3821_s24 }
 0x3e4   :  { %v643_v35 = vpop.permute.xlu0 %642 }
 0x3e5   :  { %v645_v36 = vmul.f32 %v3737_v17, %v643_v35 }
 0x3e7   :  { %653 = vrot.lane.b32.xlu1 %v645_v36, %s3822_s29 }
 0x459   :  { %v654_v38 = vpop.permute.xlu1 %653 }
 0x45a   :  { %3428 = vmatmul.mubr.msk.f32.vlgmr.msra.gmra.mxu1 %vm75_vm0, %v654_v38 }
 0x45b   :  { %3442 = vmatpush3.msra.mxu1 %v4092_v50  ;;  %3449 = vmatprep.mubr.msk.f32.mxu1 %vm3818_vm1, %v3817_v0 }
 0x45c   :  { %3443 = vmatprep.subr.mxu1 %v3817_v0 }
 0x45d   :  { %3444 = vmatpush3.msra.mxu1 %v4099_v51 }
 0x45e   :  { %3445 = vmatprep.subr.mxu1 %v3817_v0 }
 0x45f   :  { %3446 = vmatpush3.msra.mxu1 %v4106_v52 }
 0x460   :  { %3447 = vmatprep.subr.mxu1 %v3817_v0 }
 0x461   :  { %3448 = vmatpush3.msra.mxu1 %v4113_v53 }
 0x462   :  { %3450 = vmatmul.mubr.msk.f32.vlgmr.msra.gmra.mxu1 %vm75_vm0, %v654_v38  ;;  %3470 = vmatprep.subr.mxu1 %v3817_v0 }
 0x463   :  { %3471 = vmatpush3.msra.mxu1 %v4006_v19  ;;  %3478 = vmatprep.mubr.msk.f32.mxu1 %vm3818_vm1, %v3817_v0 }
 0x464   :  { %3472 = vmatprep.subr.mxu1 %v3817_v0 }
 0x465   :  { %3473 = vmatpush3.msra.mxu1 %v4018_v21 }
 0x466   :  { %3474 = vmatprep.subr.mxu1 %v3817_v0 }
 0x467   :  { %3475 = vmatpush3.msra.mxu1 %v4029_v23 }
 0x468   :  { %3476 = vmatprep.subr.mxu1 %v3817_v0 }
 0x469   :  { %3477 = vmatpush3.msra.mxu1 %v4040_v25 }
 0x46a   :  { %3492 = vmatprep.subr.mxu1 %v3817_v0 }
 0x51a   :  { %v723_v40 = vpop.f32.mrf.mxu1 }
 0x51b   :  { %v724_v41 = vadd.f32 %v4215_v39, %v723_v40 }
 0x51c   :  { %v3429_v42 = vpop.f32.mrf.mxu1 }
 0x51d   :  { %3115 = vst.msk [vmem:[%s4753_s20] sm:$0xff] %vm3114_vm5, %v724_v41  ;;  %736 = vperm.xlu1 %3720, %v724_v41   ;;  %731 = vperm.xlu0 %3719, %v724_v41   ;;  %v3150_v41 = vld [vmem:[%s4738_s4 + $0x10] sm:$0xff] }
 0x521   :  { %3721 = vset.pattern.permute.xlu1 %v3819_v13 }
 0x522   :  { %v891_v44 = vpop.f32.mrf.mxu1  ;;  %743 = vperm.xlu1 %3721, %v3144_v43  }
 0x524   :  { %v3451_v45 = vpop.f32.mrf.mxu1 }
 0x526   :  { %3722 = vset.pattern.permute.xlu1 %v3820_v16 }
 0x598   :  { %v737_v46 = vpop.permute.xlu1 %736  ;;  %v732_v47 = vpop.permute.xlu0 %731 }
 0x599   :  { %v739_v48 = vmul.f32 %v4057_v29, %v737_v46  ;;  %v734_v49 = vmul.f32 %v4052_v28, %v732_v47 }
 0x59b   :  { %v740_v55 = vadd.f32 %v739_v48, %v734_v49 }
 0x59d   :  { %v744_v54 = vpop.permute.xlu1 %743 }
 0x59e   :  { %v746_v56 = vmul.f32 %v4062_v30, %v744_v54 }
 0x5a0   :  { %v747_v57 = vadd.f32 %v746_v56, %v740_v55 }
 0x5a2   :  { %v748_v58 = vadd.f32 %v4070_v37, %v747_v57 }
 0x5a4   :  { %v750_v59 = vmul.f32 0.01, %v748_v58  ;;  %vm749_vm6 = vcmp.ge.f32.partialorder %v748_v58, 0.0 }
 0x5a6   :  { %v751_v60 = vsel %vm749_vm6, %v748_v58, %v750_v59 }
 0x5a7   :  { %3439 = vmatmul.mubr.msk.f32.vlgmr.msra.gmra.mxu0 %vm75_vm0, %v751_v60 }
 0x5a8   :  { %3453 = vmatpush3.msra.mxu0 %v4126_v63  ;;  %3456 = vmatprep.mubr.msk.f32.mxu0 %vm3818_vm1, %v3817_v0 }
 0x5a9   :  { %3454 = vmatprep.subr.mxu0 %v3817_v0 }
 0x5aa   :  { %3455 = vmatpush3.msra.mxu0 %v4137_v2 }
 0x5ab   :  { %3459 = vmatprep.subr.mxu0 %v3817_v0 }
 0x667   :  { %v821_v61 = vpop.f32.mrf.mxu0 }
 0x668   :  { %v822_v62 = vadd.f32 %v4131_v1, %v821_v61 }
 0x669   :  { %v3440_v3 = vpop.f32.mrf.mxu0 }
 0x66a   :  { %3457 = vmatmul.mubr.msk.f32.vlgmr.msra.gmra.mxu0 %vm541_vm4, %v822_v62 }
 0x66b   :  { %3460 = vmatpush3.msra.mxu0 %v4163_v27  ;;  %3467 = vmatprep.mubr.msk.f32.mxu0 %vm3818_vm1, %v3817_v0 }
 0x66c   :  { %3461 = vmatprep.subr.mxu0 %v3817_v0 }
 0x66d   :  { %3462 = vmatpush3.msra.mxu0 %v4168_v31 }
 0x66e   :  { %3463 = vmatprep.subr.mxu0 %v3817_v0 }
 0x66f   :  { %3464 = vmatpush3.msra.mxu0 %v4175_v32 }
 0x670   :  { %3465 = vmatprep.subr.mxu0 %v3817_v0 }
 0x671   :  { %3466 = vmatpush3.msra.mxu0 %v4182_v33 }
 0x672   :  { %3481 = vmatprep.subr.mxu0 %v3817_v0 }
 0x72a   :  { %v964_v4 = vpop.f32.mrf.mxu0 }
 0x72b   :  { %v965_v5 = vadd.f32 %v964_v4, %v891_v44 }
 0x72c   :  { %v3458_v7 = vpop.f32.mrf.mxu0 }
 0x72d   :  { %v968_v8 = vadd.f32 %v4152_v6, %v965_v5 }
 0x72f   :  { %3740 = vtanh.f32 %v968_v8  ;;  %v3148_v10 = vmul.f32 -1.442695, %v968_v8 }
 0x731   :  { %3742 = vpow2.f32 %v3148_v10 }
 0x73c   :  { %v3741_v9 = vpop.eup %3740 }
 0x73d   :  { %978 = vrot.lane.b32.xlu0 %v3741_v9, %s3821_s24 }
 0x73e   :  { %v3743_v11 = vpop.eup %3742 }
 0x73f   :  { %v972_v12 = vadd.f32 1.0, %v3743_v11 }
 0x741   :  { %3744 = vrcp.f32 %v972_v12 }
 0x74e   :  { %v3745_v14 = vpop.eup %3744 }
 0x74f   :  { %v976_v18 = vmul.f32 %v3745_v14, %v4157_v26 }
 0x7af   :  { %v979_v15 = vpop.permute.xlu0 %978 }
 0x7b0   :  { %v981_v17 = vmul.f32 %v3745_v14, %v979_v15 }
 0x7b2   :  { %983 = vrot.lane.b32.xlu1 %v981_v17, %s3821_s24 }
 0x824   :  { %v984_v20 = vpop.permute.xlu1 %983 }
 0x825   :  { %v4254_v22 = vadd.f32 %v984_v20, %v976_v18 }
 0x827   :  { %3746 = vtanh.f32 %v4254_v22 }
 0x834   :  { %v3747_v24 = vpop.eup %3746 }
 0x835   :  { %989 = vrot.lane.b32.xlu0 %v3747_v24, %s3821_s24 }
 0x8a7   :  { %v990_v34 = vpop.permute.xlu0 %989 }
 0x8a8   :  { %v992_v35 = vmul.f32 %v3745_v14, %v990_v34 }
 0x8aa   :  { %994 = vrot.lane.b32.xlu1 %v992_v35, %s3822_s29 }
 0x91c   :  { %v995_v36 = vpop.permute.xlu1 %994 }
 0x91d   :  { %3468 = vmatmul.mubr.msk.f32.vlgmr.msra.gmra.mxu0 %vm75_vm0, %v995_v36 }
 0x91e   :  { %3482 = vmatpush3.msra.mxu0 %v4092_v50  ;;  %3489 = vmatprep.mubr.msk.f32.mxu0 %vm3818_vm1, %v3817_v0 }
 0x91f   :  { %3483 = vmatprep.subr.mxu0 %v3817_v0 }
 0x920   :  { %3484 = vmatpush3.msra.mxu0 %v4099_v51 }
 0x921   :  { %3485 = vmatprep.subr.mxu0 %v3817_v0 }
 0x922   :  { %3486 = vmatpush3.msra.mxu0 %v4106_v52 }
 0x923   :  { %3487 = vmatprep.subr.mxu0 %v3817_v0 }
 0x924   :  { %3488 = vmatpush3.msra.mxu0 %v4113_v53 }
 0x925   :  { %3490 = vmatmul.mubr.msk.f32.vlgmr.msra.gmra.mxu0 %vm75_vm0, %v995_v36  ;;  %3510 = vmatprep.subr.mxu0 %v3817_v0 }
 0x926   :  { %3511 = vmatpush3.msra.mxu0 %v4006_v19  ;;  %3518 = vmatprep.mubr.msk.f32.mxu0 %vm3818_vm1, %v3817_v0 }
 0x927   :  { %3512 = vmatprep.subr.mxu0 %v3817_v0 }
 0x928   :  { %3513 = vmatpush3.msra.mxu0 %v4018_v21 }
 0x929   :  { %3514 = vmatprep.subr.mxu0 %v3817_v0 }
 0x92a   :  { %3515 = vmatpush3.msra.mxu0 %v4029_v23 }
 0x92b   :  { %3516 = vmatprep.subr.mxu0 %v3817_v0 }
 0x92c   :  { %3517 = vmatpush3.msra.mxu0 %v4040_v25 }
 0x92d   :  { %3532 = vmatprep.subr.mxu0 %v3817_v0 }
 0x9dd   :  { %v1064_v26 = vpop.f32.mrf.mxu0 }
 0x9de   :  { %v1065_v38 = vadd.f32 %v4215_v39, %v1064_v26 }
 0x9df   :  { %v3469_v40 = vpop.f32.mrf.mxu0 }
 0x9e0   :  { %3116 = vst.msk [vmem:[%s4753_s20 + $0x8] sm:$0xff] %vm3114_vm5, %v1065_v38  ;;  %1077 = vperm.xlu1 %3722, %v1065_v38   ;;  %1072 = vperm.xlu0 %3719, %v1065_v38   ;;  %v3156_v38 = vld [vmem:[%s4738_s4 + $0x18] sm:$0xff] }
 0x9e4   :  { %1084 = vperm.xlu0 %3719, %v3150_v41   ;;  %3723 = vset.pattern.permute.xlu1 %v3819_v13 }
 0x9e5   :  { %v1232_v42 = vpop.f32.mrf.mxu0 }
 0x9e7   :  { %v3491_v43 = vpop.f32.mrf.mxu0 }
 0x9e8   :  { %3724 = vset.pattern.permute.xlu0 %v3820_v16 }
 0xa5b   :  { %v1078_v44 = vpop.permute.xlu1 %1077  ;;  %v1073_v45 = vpop.permute.xlu0 %1072 }
 0xa5c   :  { %v1080_v46 = vmul.f32 %v4057_v29, %v1078_v44  ;;  %v1075_v47 = vmul.f32 %v4052_v28, %v1073_v45 }
 0xa5e   :  { %v1081_v49 = vadd.f32 %v1080_v46, %v1075_v47 }
 0xa5f   :  { %v1085_v48 = vpop.permute.xlu0 %1084 }
 0xa60   :  { %v1087_v54 = vmul.f32 %v4062_v30, %v1085_v48 }
 0xa62   :  { %v1088_v55 = vadd.f32 %v1087_v54, %v1081_v49 }
 0xa64   :  { %v1089_v56 = vadd.f32 %v4070_v37, %v1088_v55 }
 0xa66   :  { %v1091_v57 = vmul.f32 0.01, %v1089_v56  ;;  %vm1090_vm7 = vcmp.ge.f32.partialorder %v1089_v56, 0.0 }
 0xa68   :  { %v1092_v58 = vsel %vm1090_vm7, %v1089_v56, %v1091_v57 }
 0xa69   :  { %3479 = vmatmul.mubr.msk.f32.vlgmr.msra.gmra.mxu1 %vm75_vm0, %v1092_v58 }
 0xa6a   :  { %3493 = vmatpush3.msra.mxu1 %v4126_v63  ;;  %3496 = vmatprep.mubr.msk.f32.mxu1 %vm3818_vm1, %v3817_v0 }
 0xa6b   :  { %3494 = vmatprep.subr.mxu1 %v3817_v0 }
 0xa6c   :  { %3495 = vmatpush3.msra.mxu1 %v4137_v2 }
 0xa6d   :  { %3499 = vmatprep.subr.mxu1 %v3817_v0 }
 0xb29   :  { %v1162_v59 = vpop.f32.mrf.mxu1 }
 0xb2a   :  { %v1163_v60 = vadd.f32 %v4131_v1, %v1162_v59 }
 0xb2b   :  { %v3480_v61 = vpop.f32.mrf.mxu1 }
 0xb2c   :  { %3497 = vmatmul.mubr.msk.f32.vlgmr.msra.gmra.mxu1 %vm541_vm4, %v1163_v60 }
 0xb2d   :  { %3500 = vmatpush3.msra.mxu1 %v4163_v27  ;;  %3507 = vmatprep.mubr.msk.f32.mxu1 %vm3818_vm1, %v3817_v0 }
 0xb2e   :  { %3501 = vmatprep.subr.mxu1 %v3817_v0 }
 0xb2f   :  { %3502 = vmatpush3.msra.mxu1 %v4168_v31 }
 0xb30   :  { %3503 = vmatprep.subr.mxu1 %v3817_v0 }
 0xb31   :  { %3504 = vmatpush3.msra.mxu1 %v4175_v32 }
 0xb32   :  { %3505 = vmatprep.subr.mxu1 %v3817_v0 }
 0xb33   :  { %3506 = vmatpush3.msra.mxu1 %v4182_v33 }
 0xb34   :  { %3521 = vmatprep.subr.mxu1 %v3817_v0 }
 0xbec   :  { %v1305_v62 = vpop.f32.mrf.mxu1 }
 0xbed   :  { %v1306_v3 = vadd.f32 %v1305_v62, %v1232_v42 }
 0xbee   :  { %v3498_v4 = vpop.f32.mrf.mxu1 }
 0xbef   :  { %v1309_v5 = vadd.f32 %v4152_v6, %v1306_v3 }
 0xbf1   :  { %3748 = vtanh.f32 %v1309_v5  ;;  %v3154_v8 = vmul.f32 -1.442695, %v1309_v5 }
 0xbf3   :  { %3750 = vpow2.f32 %v3154_v8 }
 0xbfe   :  { %v3749_v7 = vpop.eup %3748 }
 0xbff   :  { %1319 = vrot.lane.b32.xlu1 %v3749_v7, %s3821_s24 }
 0xc00   :  { %v3751_v9 = vpop.eup %3750 }
 0xc01   :  { %v1313_v10 = vadd.f32 1.0, %v3751_v9 }
 0xc03   :  { %3752 = vrcp.f32 %v1313_v10 }
 0xc10   :  { %v3753_v11 = vpop.eup %3752 }
 0xc11   :  { %v1317_v15 = vmul.f32 %v3753_v11, %v4254_v22 }
 0xc71   :  { %v1320_v12 = vpop.permute.xlu1 %1319 }
 0xc72   :  { %v1322_v14 = vmul.f32 %v3753_v11, %v1320_v12 }
 0xc74   :  { %1324 = vrot.lane.b32.xlu0 %v1322_v14, %s3821_s24 }
 0xce6   :  { %v1325_v17 = vpop.permute.xlu0 %1324 }
 0xce7   :  { %v4318_v18 = vadd.f32 %v1325_v17, %v1317_v15 }
 0xce9   :  { %3754 = vtanh.f32 %v4318_v18 }
 0xcf6   :  { %v3755_v20 = vpop.eup %3754 }
 0xcf7   :  { %1330 = vrot.lane.b32.xlu1 %v3755_v20, %s3821_s24 }
 0xd69   :  { %v1331_v24 = vpop.permute.xlu1 %1330 }
 0xd6a   :  { %v1333_v34 = vmul.f32 %v3753_v11, %v1331_v24 }
 0xd6c   :  { %1335 = vrot.lane.b32.xlu0 %v1333_v34, %s3822_s29 }
 0xdde   :  { %v1336_v35 = vpop.permute.xlu0 %1335 }
 0xddf   :  { %3508 = vmatmul.mubr.msk.f32.vlgmr.msra.gmra.mxu1 %vm75_vm0, %v1336_v35 }
 0xde0   :  { %3522 = vmatpush3.msra.mxu1 %v4092_v50  ;;  %3529 = vmatprep.mubr.msk.f32.mxu1 %vm3818_vm1, %v3817_v0 }
 0xde1   :  { %3523 = vmatprep.subr.mxu1 %v3817_v0 }
 0xde2   :  { %3524 = vmatpush3.msra.mxu1 %v4099_v51 }
 0xde3   :  { %3525 = vmatprep.subr.mxu1 %v3817_v0 }
 0xde4   :  { %3526 = vmatpush3.msra.mxu1 %v4106_v52 }
 0xde5   :  { %3527 = vmatprep.subr.mxu1 %v3817_v0 }
 0xde6   :  { %3528 = vmatpush3.msra.mxu1 %v4113_v53 }
 0xde7   :  { %3530 = vmatmul.mubr.msk.f32.vlgmr.msra.gmra.mxu1 %vm75_vm0, %v1336_v35  ;;  %3550 = vmatprep.subr.mxu1 %v3817_v0 }
 0xde8   :  { %3551 = vmatpush3.msra.mxu1 %v4006_v19  ;;  %3558 = vmatprep.mubr.msk.f32.mxu1 %vm3818_vm1, %v3817_v0 }
 0xde9   :  { %3552 = vmatprep.subr.mxu1 %v3817_v0 }
 0xdea   :  { %3553 = vmatpush3.msra.mxu1 %v4018_v21 }
 0xdeb   :  { %3554 = vmatprep.subr.mxu1 %v3817_v0 }
 0xdec   :  { %3555 = vmatpush3.msra.mxu1 %v4029_v23 }
 0xded   :  { %3556 = vmatprep.subr.mxu1 %v3817_v0 }
 0xdee   :  { %3557 = vmatpush3.msra.mxu1 %v4040_v25 }
 0xdef   :  { %3572 = vmatprep.subr.mxu1 %v3817_v0 }
 0xe9f   :  { %v1405_v22 = vpop.f32.mrf.mxu1 }
 0xea0   :  { %v1406_v36 = vadd.f32 %v4215_v39, %v1405_v22 }
 0xea1   :  { %v3509_v26 = vpop.f32.mrf.mxu1 }
 0xea2   :  { %3117 = vst.msk [vmem:[%s4753_s20 + $0x10] sm:$0xff] %vm3114_vm5, %v1406_v36  ;;  %1418 = vperm.xlu0 %3724, %v1406_v36   ;;  %1413 = vperm.xlu1 %3723, %v1406_v36  }
 0xea6   :  { %1425 = vperm.xlu1 %3723, %v3156_v38  }
 0xea7   :  { %v1573_v40 = vpop.f32.mrf.mxu1 }
 0xea9   :  { %v3531_v41 = vpop.f32.mrf.mxu1 }
 0xf1d   :  { %v1419_v42 = vpop.permute.xlu0 %1418  ;;  %v1414_v43 = vpop.permute.xlu1 %1413 }
 0xf1e   :  { %v1421_v44 = vmul.f32 %v4057_v29, %v1419_v42  ;;  %v1416_v45 = vmul.f32 %v4052_v28, %v1414_v43 }
 0xf20   :  { %v1422_v47 = vadd.f32 %v1421_v44, %v1416_v45 }
 0xf21   :  { %v1426_v46 = vpop.permute.xlu1 %1425 }
 0xf22   :  { %v1428_v48 = vmul.f32 %v4062_v30, %v1426_v46 }
 0xf24   :  { %v1429_v49 = vadd.f32 %v1428_v48, %v1422_v47 }
 0xf26   :  { %v1430_v54 = vadd.f32 %v4070_v37, %v1429_v49 }
 0xf28   :  { %v1432_v55 = vmul.f32 0.01, %v1430_v54  ;;  %vm1431_vm8 = vcmp.ge.f32.partialorder %v1430_v54, 0.0 }
 0xf2a   :  { %v1433_v56 = vsel %vm1431_vm8, %v1430_v54, %v1432_v55 }
 0xf2b   :  { %3519 = vmatmul.mubr.msk.f32.vlgmr.msra.gmra.mxu0 %vm75_vm0, %v1433_v56 }
 0xf2c   :  { %3533 = vmatpush3.msra.mxu0 %v4126_v63  ;;  %3536 = vmatprep.mubr.msk.f32.mxu0 %vm3818_vm1, %v3817_v0 }
 0xf2d   :  { %3534 = vmatprep.subr.mxu0 %v3817_v0 }
 0xf2e   :  { %3535 = vmatpush3.msra.mxu0 %v4137_v2 }
 0xf2f   :  { %3539 = vmatprep.subr.mxu0 %v3817_v0 }
 0xfeb   :  { %v1503_v57 = vpop.f32.mrf.mxu0 }
 0xfec   :  { %v1504_v58 = vadd.f32 %v4131_v1, %v1503_v57 }
 0xfed   :  { %v3520_v59 = vpop.f32.mrf.mxu0 }
 0xfee   :  { %3537 = vmatmul.mubr.msk.f32.vlgmr.msra.gmra.mxu0 %vm541_vm4, %v1504_v58 }
 0xfef   :  { %3540 = vmatpush3.msra.mxu0 %v4163_v27  ;;  %3547 = vmatprep.mubr.msk.f32.mxu0 %vm3818_vm1, %v3817_v0 }
 0xff0   :  { %3541 = vmatprep.subr.mxu0 %v3817_v0 }
 0xff1   :  { %3542 = vmatpush3.msra.mxu0 %v4168_v31 }
 0xff2   :  { %3543 = vmatprep.subr.mxu0 %v3817_v0 }
 0xff3   :  { %3544 = vmatpush3.msra.mxu0 %v4175_v32 }
 0xff4   :  { %3545 = vmatprep.subr.mxu0 %v3817_v0 }
 0xff5   :  { %3546 = vmatpush3.msra.mxu0 %v4182_v33 }
 0xff6   :  { %3561 = vmatprep.subr.mxu0 %v3817_v0 }
0x10ae   :  { %v1646_v60 = vpop.f32.mrf.mxu0 }
0x10af   :  { %v1647_v61 = vadd.f32 %v1646_v60, %v1573_v40 }
0x10b0   :  { %v3538_v62 = vpop.f32.mrf.mxu0 }
0x10b1   :  { %v1650_v3 = vadd.f32 %v4152_v6, %v1647_v61 }
0x10b3   :  { %3756 = vtanh.f32 %v1650_v3  ;;  %v3160_v5 = vmul.f32 -1.442695, %v1650_v3 }
0x10b5   :  { %3758 = vpow2.f32 %v3160_v5 }
0x10c0   :  { %v3757_v4 = vpop.eup %3756 }
0x10c1   :  { %1660 = vrot.lane.b32.xlu1 %v3757_v4, %s3821_s24 }
0x10c2   :  { %v3759_v7 = vpop.eup %3758 }
0x10c3   :  { %v1654_v8 = vadd.f32 1.0, %v3759_v7 }
0x10c5   :  { %3760 = vrcp.f32 %v1654_v8 }
0x10d2   :  { %v3761_v9 = vpop.eup %3760 }
0x10d3   :  { %v1658_v12 = vmul.f32 %v3761_v9, %v4318_v18 }
0x1133   :  { %v1661_v10 = vpop.permute.xlu1 %1660 }
0x1134   :  { %v1663_v11 = vmul.f32 %v3761_v9, %v1661_v10 }
0x1136   :  { %1665 = vrot.lane.b32.xlu0 %v1663_v11, %s3821_s24 }
0x11a8   :  { %v1666_v14 = vpop.permute.xlu0 %1665 }
0x11a9   :  { %v4380_v15 = vadd.f32 %v1666_v14, %v1658_v12  ;;  %v3168_v14 = vld [vmem:[%s4738_s4 + $0x28] sm:$0xff] }
0x11ab   :  { %3762 = vtanh.f32 %v4380_v15 }
0x11b8   :  { %v3763_v17 = vpop.eup %3762 }
0x11b9   :  { %1671 = vrot.lane.b32.xlu1 %v3763_v17, %s3821_s24 }
0x122b   :  { %v1672_v20 = vpop.permute.xlu1 %1671 }
0x122c   :  { %v1674_v24 = vmul.f32 %v3761_v9, %v1672_v20 }
0x122e   :  { %1676 = vrot.lane.b32.xlu0 %v1674_v24, %s3822_s29  ;;  %v4499_v24 = vld [vmem:[%s4741_s10 + $0x1] ss:$0 sm:$0xff] }
0x12a0   :  { %v1677_v34 = vpop.permute.xlu0 %1676 }
0x12a1   :  { %3548 = vmatmul.mubr.msk.f32.vlgmr.msra.gmra.mxu0 %vm75_vm0, %v1677_v34 }
0x12a2   :  { %3562 = vmatpush3.msra.mxu0 %v4092_v50  ;;  %3569 = vmatprep.mubr.msk.f32.mxu0 %vm3818_vm1, %v3817_v0 }
0x12a3   :  { %3563 = vmatprep.subr.mxu0 %v3817_v0 }
0x12a4   :  { %3564 = vmatpush3.msra.mxu0 %v4099_v51 }
0x12a5   :  { %3565 = vmatprep.subr.mxu0 %v3817_v0 }
0x12a6   :  { %3566 = vmatpush3.msra.mxu0 %v4106_v52 }
0x12a7   :  { %3567 = vmatprep.subr.mxu0 %v3817_v0 }
0x12a8   :  { %3568 = vmatpush3.msra.mxu0 %v4113_v53 }
0x12a9   :  { %3570 = vmatmul.mubr.msk.f32.vlgmr.msra.gmra.mxu0 %vm75_vm0, %v1677_v34  ;;  %3590 = vmatprep.subr.mxu0 %v3817_v0 }
0x12aa   :  { %3591 = vmatpush3.msra.mxu0 %v4006_v19  ;;  %3598 = vmatprep.mubr.msk.f32.mxu0 %vm3818_vm1, %v3817_v0 }
0x12ab   :  { %3592 = vmatprep.subr.mxu0 %v3817_v0 }
0x12ac   :  { %3593 = vmatpush3.msra.mxu0 %v4018_v21  ;;  %v3162_v21 = vld [vmem:[%s4738_s4 + $0x20] sm:$0xff] }
0x12ad   :  { %3594 = vmatprep.subr.mxu0 %v3817_v0 }
0x12ae   :  { %3595 = vmatpush3.msra.mxu0 %v4029_v23 }
0x12af   :  { %3596 = vmatprep.subr.mxu0 %v3817_v0 }
0x12b0   :  { %3597 = vmatpush3.msra.mxu0 %v4040_v25 }
0x12b1   :  { %3612 = vmatprep.subr.mxu0 %v3817_v0 }
0x1361   :  { %v1746_v18 = vpop.f32.mrf.mxu0 }
0x1362   :  { %v1747_v19 = vadd.f32 %v4215_v39, %v1746_v18  ;;  %v4505_v18 = vld [vmem:[%s4741_s10] ss:$0 sm:$0xff] }
0x1363   :  { %v3549_v35 = vpop.f32.mrf.mxu0 }
0x1364   :  { %3118 = vst.msk [vmem:[%s4753_s20 + $0x18] sm:$0xff] %vm3114_vm5, %v1747_v19  ;;  %1759 = vperm.xlu0 %3724, %v1747_v19   ;;  %1754 = vperm.xlu1 %3723, %v1747_v19  }
0x1368   :  { %1766 = vperm.xlu1 %3723, %v3162_v21   ;;  %3725 = vset.pattern.permute.xlu0 %v3819_v13 }
0x1369   :  { %v1914_v23 = vpop.f32.mrf.mxu0 }
0x136b   :  { %v3571_v22 = vpop.f32.mrf.mxu0 }
0x136c   :  { %3726 = vset.pattern.permute.xlu1 %v3820_v16 }
0x13df   :  { %v1760_v36 = vpop.permute.xlu0 %1759  ;;  %v1755_v26 = vpop.permute.xlu1 %1754 }
0x13e0   :  { %v1762_v38 = vmul.f32 %v4057_v29, %v1760_v36  ;;  %v1757_v40 = vmul.f32 %v4052_v28, %v1755_v26 }
0x13e2   :  { %v1763_v42 = vadd.f32 %v1762_v38, %v1757_v40 }
0x13e3   :  { %v1767_v41 = vpop.permute.xlu1 %1766 }
0x13e4   :  { %v1769_v43 = vmul.f32 %v4062_v30, %v1767_v41 }
0x13e6   :  { %v1770_v44 = vadd.f32 %v1769_v43, %v1763_v42 }
0x13e8   :  { %v1771_v45 = vadd.f32 %v4070_v37, %v1770_v44 }
0x13ea   :  { %v1773_v46 = vmul.f32 0.01, %v1771_v45  ;;  %vm1772_vm9 = vcmp.ge.f32.partialorder %v1771_v45, 0.0 }
0x13ec   :  { %v1774_v47 = vsel %vm1772_vm9, %v1771_v45, %v1773_v46 }
0x13ed   :  { %3559 = vmatmul.mubr.msk.f32.vlgmr.msra.gmra.mxu1 %vm75_vm0, %v1774_v47 }
0x13ee   :  { %3573 = vmatpush3.msra.mxu1 %v4126_v63  ;;  %3576 = vmatprep.mubr.msk.f32.mxu1 %vm3818_vm1, %v3817_v0 }
0x13ef   :  { %3574 = vmatprep.subr.mxu1 %v3817_v0 }
0x13f0   :  { %3575 = vmatpush3.msra.mxu1 %v4137_v2 }
0x13f1   :  { %3579 = vmatprep.subr.mxu1 %v3817_v0 }
0x14ad   :  { %v1844_v28 = vpop.f32.mrf.mxu1 }
0x14ae   :  { %v1845_v29 = vadd.f32 %v4131_v1, %v1844_v28 }
0x14af   :  { %v3560_v30 = vpop.f32.mrf.mxu1 }
0x14b0   :  { %3577 = vmatmul.mubr.msk.f32.vlgmr.msra.gmra.mxu1 %vm541_vm4, %v1845_v29 }
0x14b1   :  { %3580 = vmatpush3.msra.mxu1 %v4163_v27  ;;  %3587 = vmatprep.mubr.msk.f32.mxu1 %vm3818_vm1, %v3817_v0 }
0x14b2   :  { %3581 = vmatprep.subr.mxu1 %v3817_v0 }
0x14b3   :  { %3582 = vmatpush3.msra.mxu1 %v4168_v31 }
0x14b4   :  { %3583 = vmatprep.subr.mxu1 %v3817_v0 }
0x14b5   :  { %3584 = vmatpush3.msra.mxu1 %v4175_v32 }
0x14b6   :  { %3585 = vmatprep.subr.mxu1 %v3817_v0 }
0x14b7   :  { %3586 = vmatpush3.msra.mxu1 %v4182_v33 }
0x14b8   :  { %3601 = vmatprep.subr.mxu1 %v3817_v0 }
0x1570   :  { %v1987_v48 = vpop.f32.mrf.mxu1 }
0x1571   :  { %v1988_v49 = vadd.f32 %v1987_v48, %v1914_v23  ;;  %v4511_v23 = vld [vmem:[%s4742_s11] ss:$0 sm:$0xff] }
0x1572   :  { %v3578_v54 = vpop.f32.mrf.mxu1 }
0x1573   :  { %v1991_v55 = vadd.f32 %v4152_v6, %v1988_v49  ;;  %v4547_v54 = vld [vmem:[%s4745_s16 + $0x18] sm:$0xff] }
0x1575   :  { %3764 = vtanh.f32 %v1991_v55  ;;  %v3166_v57 = vmul.f32 -1.442695, %v1991_v55  ;;  %v4556_v55 = vld [vmem:[%s4745_s16 + $0x10] sm:$0xff] }
0x1577   :  { %3766 = vpow2.f32 %v3166_v57  ;;  %v4570_v57 = vld [vmem:[%s4745_s16] sm:$0xff] }
0x1582   :  { %v3765_v56 = vpop.eup %3764 }
0x1583   :  { %2001 = vrot.lane.b32.xlu0 %v3765_v56, %s3821_s24  ;;  %v4563_v56 = vld [vmem:[%s4745_s16 + $0x8] sm:$0xff] }
0x1584   :  { %v3767_v58 = vpop.eup %3766 }
0x1585   :  { %v1995_v59 = vadd.f32 1.0, %v3767_v58  ;;  %v3806_v58 = vld [vmem:[%s4740_s13] sm:$0xff] }
0x1587   :  { %3768 = vrcp.f32 %v1995_v59 }
0x1594   :  { %v3769_v60 = vpop.eup %3768 }
0x1595   :  { %v1999_v3 = vmul.f32 %v3769_v60, %v4380_v15 }
0x15f5   :  { %v2002_v61 = vpop.permute.xlu0 %2001 }
0x15f6   :  { %v2004_v62 = vmul.f32 %v3769_v60, %v2002_v61 }
0x15f8   :  { %2006 = vrot.lane.b32.xlu1 %v2004_v62, %s3821_s24  ;;  %v3174_v62 = vld [vmem:[%s4738_s4 + $0x30] sm:$0xff] }
0x166a   :  { %v2007_v4 = vpop.permute.xlu1 %2006 }
0x166b   :  { %v4444_v5 = vadd.f32 %v2007_v4, %v1999_v3 }
0x166d   :  { %3770 = vtanh.f32 %v4444_v5 }
0x167a   :  { %v3771_v7 = vpop.eup %3770 }
0x167b   :  { %2012 = vrot.lane.b32.xlu0 %v3771_v7, %s3821_s24 }
0x16ed   :  { %v2013_v8 = vpop.permute.xlu0 %2012 }
0x16ee   :  { %v2015_v9 = vmul.f32 %v3769_v60, %v2013_v8 }
0x16f0   :  { %2017 = vrot.lane.b32.xlu1 %v2015_v9, %s3822_s29 }
0x1762   :  { %v2018_v10 = vpop.permute.xlu1 %2017 }
0x1763   :  { %3588 = vmatmul.mubr.msk.f32.vlgmr.msra.gmra.mxu1 %vm75_vm0, %v2018_v10 }
0x1764   :  { %3602 = vmatpush3.msra.mxu1 %v4092_v50  ;;  %3609 = vmatprep.mubr.msk.f32.mxu1 %vm3818_vm1, %v3817_v0  ;;  %v4464_v50 = vld [vmem:[%s4740_s13 + $0x18] sm:$0xff] }
0x1765   :  { %3603 = vmatprep.subr.mxu1 %v3817_v0 }
0x1766   :  { %3604 = vmatpush3.msra.mxu1 %v4099_v51  ;;  %v4473_v51 = vld [vmem:[%s4740_s13 + $0x10] sm:$0xff] }
0x1767   :  { %3605 = vmatprep.subr.mxu1 %v3817_v0 }
0x1768   :  { %3606 = vmatpush3.msra.mxu1 %v4106_v52  ;;  %v4480_v52 = vld [vmem:[%s4740_s13 + $0x8] sm:$0xff] }
0x1769   :  { %3607 = vmatprep.subr.mxu1 %v3817_v0 }
0x176a   :  { %3608 = vmatpush3.msra.mxu1 %v4113_v53 }
0x176b   :  { %3610 = vmatmul.mubr.msk.f32.vlgmr.msra.gmra.mxu1 %vm75_vm0, %v2018_v10  ;;  %3630 = vmatprep.subr.mxu1 %v3817_v0 }
0x176c   :  { %3631 = vmatpush3.msra.mxu1 %v4464_v50  ;;  %3638 = vmatprep.mubr.msk.f32.mxu1 %vm3818_vm1, %v3817_v0 }
0x176d   :  { %3632 = vmatprep.subr.mxu1 %v3817_v0 }
0x176e   :  { %3633 = vmatpush3.msra.mxu1 %v4473_v51 }
0x176f   :  { %3634 = vmatprep.subr.mxu1 %v3817_v0 }
0x1770   :  { %3635 = vmatpush3.msra.mxu1 %v4480_v52 }
0x1771   :  { %3636 = vmatprep.subr.mxu1 %v3817_v0 }
0x1772   :  { %3637 = vmatpush3.msra.mxu1 %v4040_v25 }
0x1773   :  { %3652 = vmatprep.subr.mxu1 %v3817_v0 }
0x1823   :  { %v2087_v53 = vpop.f32.mrf.mxu1 }
0x1824   :  { %v2088_v11 = vadd.f32 %v4215_v39, %v2087_v53 }
0x1825   :  { %v3589_v12 = vpop.f32.mrf.mxu1 }
0x1826   :  { %3119 = vst.msk [vmem:[%s4753_s20 + $0x20] sm:$0xff] %vm3114_vm5, %v2088_v11  ;;  %2100 = vperm.xlu1 %3726, %v2088_v11   ;;  %2095 = vperm.xlu0 %3725, %v2088_v11   ;;  %v4610_v12 = vld [vmem:[%s4748_s15 + $0x8] sm:$0xff] }
0x182a   :  { %3727 = vset.pattern.permute.xlu1 %v3819_v13 }
0x182b   :  { %v2255_v25 = vpop.f32.mrf.mxu1  ;;  %2107 = vperm.xlu1 %3727, %v3168_v14   ;;  %v4619_v14 = vld [vmem:[%s4748_s15] sm:$0xff] }
0x182d   :  { %v3611_v15 = vpop.f32.mrf.mxu1 }
0x182e   :  { %v4626_v15 = vld [vmem:[%s4749_s14] ss:$0 sm:$0xff] }
0x182f   :  { %3728 = vset.pattern.permute.xlu1 %v3820_v16 }
0x18a1   :  { %v2101_v17 = vpop.permute.xlu1 %2100  ;;  %v2096_v20 = vpop.permute.xlu0 %2095 }
0x18a2   :  { %v2103_v34 = vmul.f32 %v4499_v24, %v2101_v17  ;;  %v2098_v19 = vmul.f32 %v4505_v18, %v2096_v20 }
0x18a4   :  { %v2104_v21 = vadd.f32 %v2103_v34, %v2098_v19  ;;  %v4633_v34 = vld [vmem:[%s4751_s18 + $0x18] sm:$0xff]  ;;  %v4642_v19 = vld [vmem:[%s4751_s18 + $0x10] sm:$0xff] }
0x18a6   :  { %v2108_v35 = vpop.permute.xlu1 %2107 }
0x18a7   :  { %v2110_v22 = vmul.f32 %v4511_v23, %v2108_v35  ;;  %v4649_v35 = vld [vmem:[%s4751_s18 + $0x8] sm:$0xff] }
0x18a9   :  { %v2111_v36 = vadd.f32 %v2110_v22, %v2104_v21  ;;  %v4656_v21 = vld [vmem:[%s4751_s18] sm:$0xff] }
0x18ab   :  { %v2112_v26 = vadd.f32 %v4070_v37, %v2111_v36 }
0x18ad   :  { %v2114_v38 = vmul.f32 0.01, %v2112_v26  ;;  %vm2113_vm10 = vcmp.ge.f32.partialorder %v2112_v26, 0.0 }
0x18af   :  { %v2115_v40 = vsel %vm2113_vm10, %v2112_v26, %v2114_v38  ;;  %v4663_v38 = vld [vmem:[%s4750_s17] ss:$0 sm:$0xff] }
0x18b0   :  { %3599 = vmatmul.mubr.msk.f32.vlgmr.msra.gmra.mxu0 %vm75_vm0, %v2115_v40 }
0x18b1   :  { %3613 = vmatpush3.msra.mxu0 %v4126_v63  ;;  %3616 = vmatprep.mubr.msk.f32.mxu0 %vm3818_vm1, %v3817_v0 }
0x18b2   :  { %3614 = vmatprep.subr.mxu0 %v3817_v0 }
0x18b3   :  { %3615 = vmatpush3.msra.mxu0 %v4137_v2 }
0x18b4   :  { %3619 = vmatprep.subr.mxu0 %v3817_v0 }
0x1970   :  { %v2185_v41 = vpop.f32.mrf.mxu0 }
0x1971   :  { %v2186_v42 = vadd.f32 %v4131_v1, %v2185_v41 }
0x1972   :  { %v3600_v37 = vpop.f32.mrf.mxu0 }
0x1973   :  { %3617 = vmatmul.mubr.msk.f32.vlgmr.msra.gmra.mxu0 %vm541_vm4, %v2186_v42 }
0x1974   :  { %3620 = vmatpush3.msra.mxu0 %v4163_v27  ;;  %3627 = vmatprep.mubr.msk.f32.mxu0 %vm3818_vm1, %v3817_v0 }
0x1975   :  { %3621 = vmatprep.subr.mxu0 %v3817_v0 }
0x1976   :  { %3622 = vmatpush3.msra.mxu0 %v4168_v31 }
0x1977   :  { %3623 = vmatprep.subr.mxu0 %v3817_v0 }
0x1978   :  { %3624 = vmatpush3.msra.mxu0 %v4175_v32 }
0x1979   :  { %3625 = vmatprep.subr.mxu0 %v3817_v0 }
0x197a   :  { %3626 = vmatpush3.msra.mxu0 %v4182_v33 }
0x197b   :  { %3641 = vmatprep.subr.mxu0 %v3817_v0 }
0x1a33   :  { %v2328_v63 = vpop.f32.mrf.mxu0 }
0x1a34   :  { %v2329_v1 = vadd.f32 %v2328_v63, %v2255_v25 }
0x1a35   :  { %v3618_v2 = vpop.f32.mrf.mxu0 }
0x1a36   :  { %v2332_v27 = vadd.f32 %v4152_v6, %v2329_v1 }
0x1a38   :  { %3772 = vtanh.f32 %v2332_v27  ;;  %v3172_v31 = vmul.f32 -1.442695, %v2332_v27 }
0x1a3a   :  { %3774 = vpow2.f32 %v3172_v31 }
0x1a45   :  { %v3773_v43 = vpop.eup %3772 }
0x1a46   :  { %2342 = vrot.lane.b32.xlu0 %v3773_v43, %s3821_s24 }
0x1a47   :  { %v3775_v44 = vpop.eup %3774 }
0x1a48   :  { %v2336_v45 = vadd.f32 1.0, %v3775_v44 }
0x1a4a   :  { %3776 = vrcp.f32 %v2336_v45 }
0x1a57   :  { %v3777_v32 = vpop.eup %3776 }
0x1a58   :  { %v2340_v33 = vmul.f32 %v3777_v32, %v4444_v5 }
0x1ab8   :  { %v2343_v46 = vpop.permute.xlu0 %2342 }
0x1ab9   :  { %v2345_v47 = vmul.f32 %v3777_v32, %v2343_v46 }
0x1abb   :  { %2347 = vrot.lane.b32.xlu1 %v2345_v47, %s3821_s24 }
0x1b2d   :  { %v2348_v28 = vpop.permute.xlu1 %2347 }
0x1b2e   :  { %v4538_v29 = vadd.f32 %v2348_v28, %v2340_v33  ;;  %v4688_v28 = vld [vmem:[%s4752_s19] ss:$0 sm:$0xff] }
0x1b30   :  { %3778 = vtanh.f32 %v4538_v29 }
0x1b3d   :  { %v3779_v6 = vpop.eup %3778 }
0x1b3e   :  { %2353 = vrot.lane.b32.xlu0 %v3779_v6, %s3821_s24 }
0x1bb0   :  { %v2354_v30 = vpop.permute.xlu0 %2353 }
0x1bb1   :  { %v2356_v48 = vmul.f32 %v3777_v32, %v2354_v30  ;;  %v3180_v30 = vld [vmem:[%s4738_s4 + $0x38] sm:$0xff] }
0x1bb3   :  { %2358 = vrot.lane.b32.xlu1 %v2356_v48, %s3822_s29 }
0x1c25   :  { %v2359_v49 = vpop.permute.xlu1 %2358 }
0x1c26   :  { %3628 = vmatmul.mubr.msk.f32.vlgmr.msra.gmra.mxu0 %vm75_vm0, %v2359_v49 }
0x1c27   :  { %3642 = vmatpush3.msra.mxu0 %v4547_v54  ;;  %3649 = vmatprep.mubr.msk.f32.mxu0 %vm3818_vm1, %v3817_v0 }
0x1c28   :  { %3643 = vmatprep.subr.mxu0 %v3817_v0 }
0x1c29   :  { %3644 = vmatpush3.msra.mxu0 %v4556_v55 }
0x1c2a   :  { %3645 = vmatprep.subr.mxu0 %v3817_v0 }
0x1c2b   :  { %3646 = vmatpush3.msra.mxu0 %v4563_v56 }
0x1c2c   :  { %3647 = vmatprep.subr.mxu0 %v3817_v0 }
0x1c2d   :  { %3648 = vmatpush3.msra.mxu0 %v4570_v57 }
0x1c2e   :  { %3650 = vmatmul.mubr.msk.f32.vlgmr.msra.gmra.mxu0 %vm75_vm0, %v2359_v49  ;;  %3670 = vmatprep.subr.mxu0 %v3817_v0 }
0x1c2f   :  { %3671 = vmatpush3.msra.mxu0 %v4464_v50  ;;  %3678 = vmatprep.mubr.msk.f32.mxu0 %vm3818_vm1, %v3817_v0 }
0x1c30   :  { %3672 = vmatprep.subr.mxu0 %v3817_v0 }
0x1c31   :  { %3673 = vmatpush3.msra.mxu0 %v4473_v51 }
0x1c32   :  { %3674 = vmatprep.subr.mxu0 %v3817_v0 }
0x1c33   :  { %3675 = vmatpush3.msra.mxu0 %v4480_v52  ;;  %v4603_v52 = vld [vmem:[%s4743_s12] ss:$0 sm:$0xff] }
0x1c34   :  { %3676 = vmatprep.subr.mxu0 %v3817_v0 }
0x1c35   :  { %3677 = vmatpush3.msra.mxu0 %v3806_v58 }
0x1c36   :  { %3692 = vmatprep.subr.mxu0 %v3817_v0 }
0x1ce6   :  { %v2428_v59 = vpop.f32.mrf.mxu0 }
0x1ce7   :  { %v2429_v60 = vadd.f32 %v4215_v39, %v2428_v59 }
0x1ce8   :  { %v3629_v61 = vpop.f32.mrf.mxu0 }
0x1ce9   :  { %3120 = vst.msk [vmem:[%s4753_s20 + $0x28] sm:$0xff] %vm3114_vm5, %v2429_v60  ;;  %2441 = vperm.xlu1 %3728, %v2429_v60   ;;  %2436 = vperm.xlu0 %3725, %v2429_v60  }
0x1ced   :  { %2448 = vperm.xlu0 %3725, %v3174_v62   ;;  %3729 = vset.pattern.permute.xlu1 %v3819_v13 }
0x1cee   :  { %v2596_v3 = vpop.f32.mrf.mxu0 }
0x1cf0   :  { %v3651_v4 = vpop.f32.mrf.mxu0 }
0x1cf1   :  { %3730 = vset.pattern.permute.xlu0 %v3820_v16 }
0x1d64   :  { %v2442_v39 = vpop.permute.xlu1 %2441  ;;  %v2437_v5 = vpop.permute.xlu0 %2436 }
0x1d65   :  { %v2444_v7 = vmul.f32 %v4499_v24, %v2442_v39  ;;  %v2439_v8 = vmul.f32 %v4505_v18, %v2437_v5 }
0x1d67   :  { %v2445_v10 = vadd.f32 %v2444_v7, %v2439_v8 }
0x1d68   :  { %v2449_v9 = vpop.permute.xlu0 %2448 }
0x1d69   :  { %v2451_v50 = vmul.f32 %v4511_v23, %v2449_v9 }
0x1d6b   :  { %v2452_v51 = vadd.f32 %v2451_v50, %v2445_v10 }
0x1d6d   :  { %v2453_v53 = vadd.f32 %v4603_v52, %v2452_v51 }
0x1d6f   :  { %v2455_v11 = vmul.f32 0.01, %v2453_v53  ;;  %vm2454_vm11 = vcmp.ge.f32.partialorder %v2453_v53, 0.0 }
0x1d71   :  { %v2456_v16 = vsel %vm2454_vm11, %v2453_v53, %v2455_v11 }
0x1d72   :  { %3639 = vmatmul.mubr.msk.f32.vlgmr.msra.gmra.mxu1 %vm75_vm0, %v2456_v16 }
0x1d73   :  { %3653 = vmatpush3.msra.mxu1 %v4610_v12  ;;  %3656 = vmatprep.mubr.msk.f32.mxu1 %vm3818_vm1, %v3817_v0 }
0x1d74   :  { %3654 = vmatprep.subr.mxu1 %v3817_v0 }
0x1d75   :  { %3655 = vmatpush3.msra.mxu1 %v4619_v14 }
0x1d76   :  { %3659 = vmatprep.subr.mxu1 %v3817_v0 }
0x1e32   :  { %v2526_v25 = vpop.f32.mrf.mxu1 }
0x1e33   :  { %v2527_v17 = vadd.f32 %v4626_v15, %v2526_v25 }
0x1e34   :  { %v3640_v20 = vpop.f32.mrf.mxu1 }
0x1e35   :  { %3657 = vmatmul.mubr.msk.f32.vlgmr.msra.gmra.mxu1 %vm541_vm4, %v2527_v17 }
0x1e36   :  { %3660 = vmatpush3.msra.mxu1 %v4633_v34  ;;  %3667 = vmatprep.mubr.msk.f32.mxu1 %vm3818_vm1, %v3817_v0 }
0x1e37   :  { %3661 = vmatprep.subr.mxu1 %v3817_v0 }
0x1e38   :  { %3662 = vmatpush3.msra.mxu1 %v4642_v19 }
0x1e39   :  { %3663 = vmatprep.subr.mxu1 %v3817_v0 }
0x1e3a   :  { %3664 = vmatpush3.msra.mxu1 %v4649_v35 }
0x1e3b   :  { %3665 = vmatprep.subr.mxu1 %v3817_v0 }
0x1e3c   :  { %3666 = vmatpush3.msra.mxu1 %v4656_v21 }
0x1e3d   :  { %3681 = vmatprep.subr.mxu1 %v3817_v0 }
0x1ef5   :  { %v2669_v22 = vpop.f32.mrf.mxu1 }
0x1ef6   :  { %v2670_v36 = vadd.f32 %v2669_v22, %v2596_v3 }
0x1ef7   :  { %v3658_v26 = vpop.f32.mrf.mxu1 }
0x1ef8   :  { %v2673_v40 = vadd.f32 %v4663_v38, %v2670_v36 }
0x1efa   :  { %3780 = vtanh.f32 %v2673_v40  ;;  %v3178_v42 = vmul.f32 -1.442695, %v2673_v40 }
0x1efc   :  { %3782 = vpow2.f32 %v3178_v42 }
0x1f07   :  { %v3781_v41 = vpop.eup %3780 }
0x1f08   :  { %2683 = vrot.lane.b32.xlu1 %v3781_v41, %s3821_s24 }
0x1f09   :  { %v3783_v37 = vpop.eup %3782 }
0x1f0a   :  { %v2677_v63 = vadd.f32 1.0, %v3783_v37 }
0x1f0c   :  { %3784 = vrcp.f32 %v2677_v63 }
0x1f19   :  { %v3785_v1 = vpop.eup %3784 }
0x1f1a   :  { %v2681_v43 = vmul.f32 %v3785_v1, %v4538_v29 }
0x1f7a   :  { %v2684_v2 = vpop.permute.xlu1 %2683 }
0x1f7b   :  { %v2686_v27 = vmul.f32 %v3785_v1, %v2684_v2 }
0x1f7d   :  { %2688 = vrot.lane.b32.xlu0 %v2686_v27, %s3821_s24 }
0x1fef   :  { %v2689_v31 = vpop.permute.xlu0 %2688 }
0x1ff0   :  { %v4669_v44 = vadd.f32 %v2689_v31, %v2681_v43 }
0x1ff2   :  { %3786 = vtanh.f32 %v4669_v44 }
0x1fff   :  { %v3787_v45 = vpop.eup %3786 }
0x2000   :  { %2694 = vrot.lane.b32.xlu1 %v3787_v45, %s3821_s24 }
0x2072   :  { %v2695_v32 = vpop.permute.xlu1 %2694 }
0x2073   :  { %v2697_v46 = vmul.f32 %v3785_v1, %v2695_v32 }
0x2075   :  { %2699 = vrot.lane.b32.xlu0 %v2697_v46, %s3822_s29 }
0x20e7   :  { %v2700_v47 = vpop.permute.xlu0 %2699 }
0x20e8   :  { %3668 = vmatmul.mubr.msk.f32.vlgmr.msra.gmra.mxu1 %vm75_vm0, %v2700_v47 }
0x20e9   :  { %3682 = vmatpush3.msra.mxu1 %v4547_v54  ;;  %3689 = vmatprep.mubr.msk.f32.mxu1 %vm3818_vm1, %v3817_v0 }
0x20ea   :  { %3683 = vmatprep.subr.mxu1 %v3817_v0 }
0x20eb   :  { %3684 = vmatpush3.msra.mxu1 %v4556_v55 }
0x20ec   :  { %3685 = vmatprep.subr.mxu1 %v3817_v0 }
0x20ed   :  { %3686 = vmatpush3.msra.mxu1 %v4563_v56 }
0x20ee   :  { %3687 = vmatprep.subr.mxu1 %v3817_v0 }
0x20ef   :  { %3688 = vmatpush3.msra.mxu1 %v4570_v57 }
0x20f0   :  { %3690 = vmatmul.mubr.msk.f32.vlgmr.msra.gmra.mxu1 %vm75_vm0, %v2700_v47 }
0x21a8   :  { %v2769_v33 = vpop.f32.mrf.mxu1 }
0x21a9   :  { %v2770_v29 = vadd.f32 %v4688_v28, %v2769_v33 }
0x21aa   :  { %v3669_v6 = vpop.f32.mrf.mxu1 }
0x21ab   :  { %3121 = vst.msk [vmem:[%s4753_s20 + $0x30] sm:$0xff] %vm3114_vm5, %v2770_v29  ;;  %2782 = vperm.xlu0 %3730, %v2770_v29   ;;  %2777 = vperm.xlu1 %3729, %v2770_v29  }
0x21af   :  { %2789 = vperm.xlu1 %3729, %v3180_v30   ;;  %3731 = vset.pattern.permute.xlu0 %v3819_v13 }
0x21b0   :  { %v2937_v48 = vpop.f32.mrf.mxu1 }
0x21b2   :  { %v3691_v49 = vpop.f32.mrf.mxu1 }
0x2226   :  { %v2783_v54 = vpop.permute.xlu0 %2782  ;;  %v2778_v55 = vpop.permute.xlu1 %2777 }
0x2227   :  { %v2785_v56 = vmul.f32 %v4499_v24, %v2783_v54  ;;  %v2780_v57 = vmul.f32 %v4505_v18, %v2778_v55 }
0x2229   :  { %v2786_v59 = vadd.f32 %v2785_v56, %v2780_v57 }
0x222a   :  { %v2790_v58 = vpop.permute.xlu1 %2789 }
0x222b   :  { %v2792_v60 = vmul.f32 %v4511_v23, %v2790_v58 }
0x222d   :  { %v2793_v61 = vadd.f32 %v2792_v60, %v2786_v59 }
0x222f   :  { %v2794_v62 = vadd.f32 %v4603_v52, %v2793_v61 }
0x2231   :  { %v2796_v3 = vmul.f32 0.01, %v2794_v62  ;;  %vm2795_vm12 = vcmp.ge.f32.partialorder %v2794_v62, 0.0 }
0x2233   :  { %v2797_v4 = vsel %vm2795_vm12, %v2794_v62, %v2796_v3 }
0x2234   :  { %3679 = vmatmul.mubr.msk.f32.vlgmr.msra.gmra.mxu0 %vm75_vm0, %v2797_v4 }
0x2235   :  { %3693 = vmatpush3.msra.mxu0 %v4610_v12  ;;  %3696 = vmatprep.mubr.msk.f32.mxu0 %vm3818_vm1, %v3817_v0 }
0x2236   :  { %3694 = vmatprep.subr.mxu0 %v3817_v0 }
0x2237   :  { %3695 = vmatpush3.msra.mxu0 %v4619_v14 }
0x2238   :  { %3699 = vmatprep.subr.mxu0 %v3817_v0 }
0x22f4   :  { %v2867_v13 = vpop.f32.mrf.mxu0 }
0x22f5   :  { %v2868_v24 = vadd.f32 %v4626_v15, %v2867_v13 }
0x22f6   :  { %v3680_v18 = vpop.f32.mrf.mxu0 }
0x22f7   :  { %3697 = vmatmul.mubr.msk.f32.vlgmr.msra.gmra.mxu0 %vm541_vm4, %v2868_v24 }
0x22f8   :  { %3700 = vmatpush3.msra.mxu0 %v4633_v34  ;;  %3707 = vmatprep.mubr.msk.f32.mxu0 %vm3818_vm1, %v3817_v0 }
0x22f9   :  { %3701 = vmatprep.subr.mxu0 %v3817_v0 }
0x22fa   :  { %3702 = vmatpush3.msra.mxu0 %v4642_v19 }
0x22fb   :  { %3703 = vmatprep.subr.mxu0 %v3817_v0 }
0x22fc   :  { %3704 = vmatpush3.msra.mxu0 %v4649_v35 }
0x22fd   :  { %3705 = vmatprep.subr.mxu0 %v3817_v0 }
0x22fe   :  { %3706 = vmatpush3.msra.mxu0 %v4656_v21 }
0x23b7   :  { %v3010_v23 = vpop.f32.mrf.mxu0 }
0x23b8   :  { %v3011_v39 = vadd.f32 %v3010_v23, %v2937_v48 }
0x23b9   :  { %v3698_v5 = vpop.f32.mrf.mxu0 }
0x23ba   :  { %v3014_v7 = vadd.f32 %v4663_v38, %v3011_v39 }
0x23bc   :  { %3788 = vtanh.f32 %v3014_v7  ;;  %v3184_v9 = vmul.f32 -1.442695, %v3014_v7 }
0x23be   :  { %3790 = vpow2.f32 %v3184_v9 }
0x23c9   :  { %v3789_v8 = vpop.eup %3788 }
0x23ca   :  { %3024 = vrot.lane.b32.xlu1 %v3789_v8, %s3821_s24 }
0x23cb   :  { %v3791_v10 = vpop.eup %3790 }
0x23cc   :  { %v3018_v50 = vadd.f32 1.0, %v3791_v10 }
0x23ce   :  { %3792 = vrcp.f32 %v3018_v50 }
0x23db   :  { %v3793_v51 = vpop.eup %3792 }
0x23dc   :  { %v3022_v0 = vmul.f32 %v3793_v51, %v4669_v44 }
0x243c   :  { %v3025_v52 = vpop.permute.xlu1 %3024 }
0x243d   :  { %v3027_v53 = vmul.f32 %v3793_v51, %v3025_v52 }
0x243f   :  { %3029 = vrot.lane.b32.xlu0 %v3027_v53, %s3821_s24 }
0x24b1   :  { %v3030_v11 = vpop.permute.xlu0 %3029 }
0x24b2   :  { %v3032_v16 = vadd.f32 %v3030_v11, %v3022_v0 }
0x24b4   :  { %3794 = vtanh.f32 %v3032_v16 }
0x24c1   :  { %v3795_v12 = vpop.eup %3794 }
0x24c2   :  { %3035 = vrot.lane.b32.xlu1 %v3795_v12, %s3821_s24 }
0x2534   :  { %v3036_v14 = vpop.permute.xlu1 %3035 }
0x2535   :  { %v3038_v25 = vmul.f32 %v3793_v51, %v3036_v14 }
0x2537   :  { %3040 = vrot.lane.b32.xlu0 %v3038_v25, %s3822_s29 }
0x25a9   :  { %v3041_v15 = vpop.permute.xlu0 %3040 }
0x25aa   :  { %3708 = vmatmul.mubr.msk.f32.vlgmr.msra.gmra.mxu0 %vm75_vm0, %v3041_v15 }
0x266a   :  { %v3110_v17 = vpop.f32.mrf.mxu0 }
0x266b   :  { %v3111_v20 = vadd.f32 %v4688_v28, %v3110_v17 }
0x266c   :  { %v3709_v34 = vpop.f32.mrf.mxu0 }
0x266d   :  { %3122 = vst.msk [vmem:[%s4753_s20 + $0x38] sm:$0xff] %vm3114_vm5, %v3111_v20 }

</bundles_post_ra>
